<compile_context>
chip_gen: v7x
topology: tpu7x:2x2x1
jax: 0.10.0
libtpu: 0.0.40
codegen_flags: <defaults>
</compile_context>

<pallas_src>
import functools

import jax
import jax.numpy as jnp
from jax.experimental import pallas as pl
from jax.experimental.pallas import tpu as pltpu

_EPS = 1e-5
_LANES = 128


def _round_up(x, m):
    return ((x + m - 1) // m) * m


def _pick_row_tile(ho, wo):
    """Largest divisor of ho giving <=~256 flat output rows per tile and (when
    possible) at least two row tiles per image so the pipeline has work."""
    target = max(1, 256 // max(wo, 1))
    cap = max(1, ho // 2) if ho > 1 else 1
    limit = min(target, cap)
    best = 1
    for d in range(1, ho + 1):
        if ho % d == 0 and d <= limit:
            best = d
    return best


def _vmem_limit(est_bytes):
    if est_bytes <= 16 * 1024 * 1024:
        return None                       # default scoped VMEM limit is plenty
    return int(min(64 * 1024 * 1024, est_bytes))


def _flat_row_tile(m):
    if m >= 4096:
        return 1024
    if m >= 512:
        return 512
    return _round_up(m, 8)


# ---------------------------------------------------------------------------
# Pallas kernels
# ---------------------------------------------------------------------------
def _conv_kernel(*refs, k, stride, pad, h, w, wo, tr, fuse_bn_relu):
    """kxk conv, im2col fused as k*k shifted-slice matmuls, row-tiled.

    Grid: (batch, row_tile).  Refs (inputs, outputs, scratch):
      x_ref : (h, w, Cin_p)          unpadded NHWC image (resident across tiles)
      w_ref : (k*k, Cin_p, Cout_p)   bf16 weights (resident)
      [sc_ref, sh_ref : (1, Cin_p)]  fused BN scale/shift (only if fuse_bn_relu)
      y_ref : (tr*wo, Cout_p)        f32 conv output tile (pre-BN)
      st_ref: (8, Cout_p)            rows 0/1 = per-image [sum, sum_sq] (resident)
      xpad_ref: (h+2p, w+2p, Cin_p)  f32 VMEM scratch, zero-bordered (+bn+relu)
    """
    if fuse_bn_relu:
        x_ref, w_ref, sc_ref, sh_ref, y_ref, st_ref, xpad_ref = refs
    else:
        x_ref, w_ref, y_ref, st_ref, xpad_ref = refs

    r = pl.program_id(1)
    cin = x_ref.shape[-1]
    cout = w_ref.shape[-1]

    # Per-image prologue (first row tile only): build the zero-padded image in
    # VMEM, fusing the previous BN scale/shift + ReLU when requested, and reset
    # the per-image statistics accumulator.
    @pl.when(r == 0)
    def _prologue():
        if pad > 0:
            xpad_ref[...] = jnp.zeros_like(xpad_ref)
        img = x_ref[...]
        if fuse_bn_relu:
            sc = sc_ref[...].reshape(1, 1, cin)
            sh = sh_ref[...].reshape(1, 1, cin)
            img = jnp.maximum(img * sc + sh, 0.0)
        xpad_ref[pad:pad + h, pad:pad + w, :] = img
        st_ref[...] = jnp.zeros_like(st_ref)

    # Row-tiled conv: bf16 MXU matmuls, f32 accumulation (small, spill-free).
    acc = jnp.zeros((tr * wo, cout), jnp.float32)
    r0 = pl.multiple_of(r * (tr * stride), tr * stride)
    for u in range(k):
        for v in range(k):
            if stride == 1:
                xs = xpad_ref[pl.ds(r0 + u, tr), v:v + wo, :]
            else:
                xs = xpad_ref[pl.ds(r0 + u, tr, stride=stride),
                              pl.ds(v, wo, stride=stride), :]
            xs = xs.reshape(tr * wo, cin).astype(jnp.bfloat16)
            acc = acc + jnp.dot(xs, w_ref[u * k + v],
                                preferred_element_type=jnp.float32)
    y_ref[...] = acc

    # Accumulate per-image BN statistics into the resident (8, Cout_p) block.
    st_ref[0:1, :] = st_ref[0:1, :] + jnp.sum(acc, axis=0, keepdims=True)
    st_ref[1:2, :] = st_ref[1:2, :] + jnp.sum(acc * acc, axis=0, keepdims=True)


def _bn_add_relu_kernel(y_ref, sc_ref, sh_ref, r_ref, rsc_ref, rsh_ref, o_ref):
    out = (y_ref[...] * sc_ref[...] + sh_ref[...]
           + r_ref[...] * rsc_ref[...] + rsh_ref[...])
    o_ref[...] = jnp.maximum(out, 0.0)


# ---------------------------------------------------------------------------
# JAX glue
# ---------------------------------------------------------------------------
def _conv2d(x_nhwc_p, w_oihw, *, stride, pad, prologue=None):
    """x_nhwc_p: (N, H, W, Cin_p) channel-padded NHWC f32.
    prologue: optional (scale, shift), each (1, Cin_p): relu(x*scale+shift) is
    applied to the conv input inside the kernel (fused bn1+relu for conv2).
    Returns y (N, Ho*Wo, Cout_p) f32, stats (2, Cout_p), (Ho, Wo)."""
    n, h, w, cin_p = x_nhwc_p.shape
    cout, cin, k, _ = w_oihw.shape
    cout_p = _round_up(cout, _LANES)
    ho = (h + 2 * pad - k) // stride + 1
    wo = (w + 2 * pad - k) // stride + 1
    hp, wp = h + 2 * pad, w + 2 * pad

    # OIHW -> (k*k, Cin_p, Cout_p) bf16, zero-padded -> lane-dense MXU operands.
    wmat = jnp.transpose(w_oihw, (2, 3, 1, 0)).reshape(k * k, cin, cout)
    wmat = jnp.pad(wmat, ((0, 0), (0, cin_p - cin), (0, cout_p - cout)))
    wmat = wmat.astype(jnp.bfloat16)

    tr = _pick_row_tile(ho, wo)
    n_rt = ho // tr

    kern = functools.partial(_conv_kernel, k=k, stride=stride, pad=pad,
                             h=h, w=w, wo=wo, tr=tr,
                             fuse_bn_relu=prologue is not None)

    in_specs = [pl.BlockSpec((None, h, w, cin_p), lambda b, r: (b, 0, 0, 0)),
                pl.BlockSpec((k * k, cin_p, cout_p), lambda b, r: (0, 0, 0))]
    args = [x_nhwc_p, wmat]
    if prologue is not None:
        scale, shift = prologue
        in_specs += [pl.BlockSpec((1, cin_p), lambda b, r: (0, 0)),
                     pl.BlockSpec((1, cin_p), lambda b, r: (0, 0))]
        args += [scale, shift]

    flops = 2 * n * ho * wo * k * k * cin_p * cout_p
    bytes_accessed = (x_nhwc_p.size * 4 + wmat.size * 2
                      + n * ho * wo * cout_p * 4 + n * 8 * cout_p * 4)
    est_vmem = (2 * h * w * cin_p * 4            # input image (double-buffered)
                + 2 * wmat.size * 2              # weights
                + hp * wp * cin_p * 4            # padded-image scratch
                + 2 * tr * wo * cout_p * 4       # output tiles
                + 2 * 8 * cout_p * 4             # stats block
                + (2 << 20))                     # slack

    y, stats = pl.pallas_call(
        kern,
        grid=(n, n_rt),
        in_specs=in_specs,
        out_specs=(pl.BlockSpec((None, tr * wo, cout_p), lambda b, r: (b, r, 0)),
                   pl.BlockSpec((None, 8, cout_p), lambda b, r: (b, 0, 0))),
        out_shape=(jax.ShapeDtypeStruct((n, ho * wo, cout_p), jnp.float32),
                   jax.ShapeDtypeStruct((n, 8, cout_p), jnp.float32)),
        scratch_shapes=[pltpu.VMEM((hp, wp, cin_p), jnp.float32)],
        compiler_params=pltpu.CompilerParams(
            dimension_semantics=("parallel", "arbitrary"),
            vmem_limit_bytes=_vmem_limit(est_vmem)),
        cost_estimate=pl.CostEstimate(flops=flops, transcendentals=0,
                                      bytes_accessed=bytes_accessed),
    )(*args)
    stats = jnp.sum(stats[:, 0:2, :], axis=0)        # (2, Cout_p) global sums
    return y, stats, (ho, wo)


def _bn_scale_shift(stats, count, gamma, beta, cout_p):
    """Fold BatchNorm (batch statistics) into per-channel scale/shift."""
    gamma_p = jnp.pad(gamma.astype(jnp.float32), (0, cout_p - gamma.shape[0]))
    beta_p = jnp.pad(beta.astype(jnp.float32), (0, cout_p - beta.shape[0]))
    mean = stats[0] / count
    var = jnp.maximum(stats[1] / count - mean * mean, 0.0)   # biased (train) var
    scale = gamma_p * jax.lax.rsqrt(var + _EPS)              # padded gamma==0 -> 0
    shift = beta_p - mean * scale
    return scale.reshape(1, -1), shift.reshape(1, -1)


def _bn_add_relu(y, scale, shift, res, rscale, rshift):
    m, cp = y.shape
    tm = _flat_row_tile(m)
    mp = _round_up(m, tm)
    if mp != m:                       # pad rows instead of one giant block
        y = jnp.pad(y, ((0, mp - m), (0, 0)))
        res = jnp.pad(res, ((0, mp - m), (0, 0)))
    out = pl.pallas_call(
        _bn_add_relu_kernel,
        grid=(mp // tm,),
        in_specs=[pl.BlockSpec((tm, cp), lambda i: (i, 0)),
                  pl.BlockSpec((1, cp), lambda i: (0, 0)),
                  pl.BlockSpec((1, cp), lambda i: (0, 0)),
                  pl.BlockSpec((tm, cp), lambda i: (i, 0)),
                  pl.BlockSpec((1, cp), lambda i: (0, 0)),
                  pl.BlockSpec((1, cp), lambda i: (0, 0))],
        out_specs=pl.BlockSpec((tm, cp), lambda i: (i, 0)),
        out_shape=jax.ShapeDtypeStruct((mp, cp), jnp.float32),
        compiler_params=pltpu.CompilerParams(
            dimension_semantics=("parallel",)),
    )(y, scale, shift, res, rscale, rshift)
    return out[:m]


def basic_block_forward(x_nchw, params, *, stride=1):
    """ResNet BasicBlock: relu(bn2(conv2(relu(bn1(conv1(x))))) + shortcut(x))."""
    w1 = params["conv1_w"]
    g1, b1 = params["bn1"]
    w2 = params["conv2_w"]
    g2, b2 = params["bn2"]
    planes, in_planes = w1.shape[0], w1.shape[1]
    n = x_nchw.shape[0]

    cin_p = _round_up(in_planes, _LANES)
    cout_p = _round_up(planes, _LANES)

    # NCHW -> NHWC, pad channels once to the lane-dense width.
    x = jnp.transpose(x_nchw, (0, 2, 3, 1)).astype(jnp.float32)
    x = jnp.pad(x, ((0, 0), (0, 0), (0, 0), (0, cin_p - in_planes)))

    # conv1 (3x3, stride)
    y1, st1, (ho, wo) = _conv2d(x, w1, stride=stride, pad=1)
    m = n * ho * wo
    s1, h1 = _bn_scale_shift(st1, m, g1, b1, cout_p)

    # conv2 (3x3, stride 1) with bn1+ReLU fused into its padded-input prologue.
    y2, st2, _ = _conv2d(y1.reshape(n, ho, wo, cout_p), w2, stride=1, pad=1,
                         prologue=(s1, h1))
    s2, h2 = _bn_scale_shift(st2, m, g2, b2, cout_p)

    # shortcut: identity, or 1x1 conv + BN (projection).
    if stride != 1 or in_planes != planes:
        wsc = params["shortcut_conv_w"]
        gsc, bsc = params["shortcut_bn"]
        ysc, stsc, _ = _conv2d(x, wsc, stride=stride, pad=0)
        ssc, hsc = _bn_scale_shift(stsc, m, gsc, bsc, cout_p)
        res = ysc.reshape(m, cout_p)
    else:
        res = x.reshape(m, cout_p)            # cin_p == cout_p in this branch
        ssc = jnp.ones((1, cout_p), jnp.float32)
        hsc = jnp.zeros((1, cout_p), jnp.float32)

    # bn2 + (bn'd) shortcut add + ReLU, fused in one tiled elementwise kernel.
    out = _bn_add_relu(y2.reshape(m, cout_p), s2, h2, res, ssc, hsc)

    out = out.reshape(n, ho, wo, cout_p)[:, :, :, :planes]
    return jnp.transpose(out, (0, 3, 1, 2))   # back to NCHW


# ---------------------------------------------------------------------------
# Params, reference, test
# ---------------------------------------------------------------------------
def init_params(key, in_planes, planes, stride=1):
    ks = jax.random.split(key, 3)

    def conv_w(k, cout, cin, ksz):
        bound = (1.0 / (cin * ksz * ksz)) ** 0.5
        return jax.random.uniform(k, (cout, cin, ksz, ksz), jnp.float32,
                                  -bound, bound)

    def bn(c):
        return (jnp.ones((c,), jnp.float32), jnp.zeros((c,), jnp.float32))

    params = {
        "conv1_w": conv_w(ks[0], planes, in_planes, 3),
        "bn1": bn(planes),
        "conv2_w": conv_w(ks[1], planes, planes, 3),
        "bn2": bn(planes),
    }
    if stride != 1 or in_planes != planes:
        params["shortcut_conv_w"] = conv_w(ks[2], planes, in_planes, 1)
        params["shortcut_bn"] = bn(planes)
    return params


def _reference_forward(x, params, stride):
    """Pure-JAX reference (matches the PyTorch BasicBlock forward, training BN)."""
    def conv(xx, w, s, p):
        return jax.lax.conv_general_dilated(
            xx, w, (s, s), ((p, p), (p, p)),
            dimension_numbers=("NCHW", "OIHW", "NCHW"))

    def bn(xx, gb):
        g, b = gb
        mean = jnp.mean(xx, axis=(0, 2, 3), keepdims=True)
        var = jnp.mean((xx - mean) ** 2, axis=(0, 2, 3), keepdims=True)
        return (g.reshape(1, -1, 1, 1) * (xx - mean) * jax.lax.rsqrt(var + _EPS)
                + b.reshape(1, -1, 1, 1))

    planes, in_planes = params["conv1_w"].shape[:2]
    out = jax.nn.relu(bn(conv(x, params["conv1_w"], stride, 1), params["bn1"]))
    out = bn(conv(out, params["conv2_w"], 1, 1), params["bn2"])
    if stride != 1 or in_planes != planes:
        sc = bn(conv(x, params["shortcut_conv_w"], stride, 0),
                params["shortcut_bn"])
    else:
        sc = x
    return jax.nn.relu(out + sc)


if __name__ == "__main__":
    batch, in_planes, planes, stride = 2, 4, 8, 1
    h = w = 16
    key = jax.random.PRNGKey(0)
    k_in, k_par = jax.random.split(key)
    x = jax.random.normal(k_in, (batch, in_planes, h, w), jnp.float32)
    params = init_params(k_par, in_planes, planes, stride)

    fwd = jax.jit(functools.partial(basic_block_forward, stride=stride))
    out = fwd(x, params)
    jax.block_until_ready(out)
    assert out.shape == (batch, planes, h // stride, w // stride)

    # Loose numerical check vs. a pure-JAX reference (kernel uses bf16 MXU
    # operands with f32 accumulation, so allow a small tolerance).
    ref = _reference_forward(x, params, stride)
    err = float(jnp.max(jnp.abs(out - ref)))
    assert err < 1e-1, f"max |err| vs reference = {err}"
    print("KERNEL_OK")
</pallas_src>

<mosaic_0001>
module attributes {stable_mosaic.version = 11 : i64} {
  func.func @_conv_kernel(%arg0: i32, %arg1: i32, %arg2: memref<1x16x16x128xf32, #tpu.memory_space<vmem>>, %arg3: memref<9x128x128xbf16, #tpu.memory_space<vmem>>, %arg4: memref<1x128x128xf32, #tpu.memory_space<vmem>>, %arg5: memref<1x8x128xf32, #tpu.memory_space<vmem>>, %arg6: memref<18x18x128xf32, #tpu.memory_space<vmem>>) attributes {dimension_semantics = [#tpu.dimension_semantics<parallel>, #tpu.dimension_semantics<arbitrary>], iteration_bounds = array<i64: 2, 2>, scalar_prefetch = 0 : i64, scratch_operands = 1 : i64, tpu.core_type = #tpu.core_type<tc>, window_params = [{transform_indices = @transform_0, window_bounds = array<i64: 1, 16, 16, 128>}, {pipeline_mode = #tpu.pipeline_mode<synchronous>, transform_indices = @transform_1, window_bounds = array<i64: 9, 128, 128>}, {transform_indices = @transform_2, window_bounds = array<i64: 1, 128, 128>}, {transform_indices = @transform_3, window_bounds = array<i64: 1, 8, 128>}]} {
    %c0_i32 = arith.constant 0 : i32
    %0 = arith.cmpi eq, %arg1, %c0_i32 : i32
    %1 = arith.extui %0 : i1 to i32
    %c0_i32_0 = arith.constant 0 : i32
    %2 = arith.cmpi ne, %1, %c0_i32_0 : i32
    scf.if %2 {
      %cst_70 = arith.constant 0.000000e+00 : f32
      %107 = vector.broadcast %cst_70 : f32 to vector<18x18x128xf32>
      %c0_71 = arith.constant 0 : index
      %c0_72 = arith.constant 0 : index
      %c0_73 = arith.constant 0 : index
      %108 = vector.load %arg6[%c0_71, %c0_72, %c0_73] : memref<18x18x128xf32, #tpu.memory_space<vmem>>, vector<18x18x128xf32>
      tpu.vector_store %arg6[%c0_71, %c0_72, %c0_73], %107 {strides = array<i32>} : memref<18x18x128xf32, #tpu.memory_space<vmem>>, vector<18x18x128xf32>,
      %c0_74 = arith.constant 0 : index
      %c0_75 = arith.constant 0 : index
      %c0_76 = arith.constant 0 : index
      %c0_77 = arith.constant 0 : index
      %109 = vector.load %arg2[%c0_74, %c0_75, %c0_76, %c0_77] : memref<1x16x16x128xf32, #tpu.memory_space<vmem>>, vector<1x16x16x128xf32>
      %110 = vector.shape_cast %109 : vector<1x16x16x128xf32> to vector<16x16x128xf32>
      %c1_78 = arith.constant 1 : index
      %c1_79 = arith.constant 1 : index
      %c0_80 = arith.constant 0 : index
      %111 = vector.load %arg6[%c1_78, %c1_79, %c0_80] : memref<18x18x128xf32, #tpu.memory_space<vmem>>, vector<16x16x128xf32>
      tpu.vector_store %arg6[%c1_78, %c1_79, %c0_80], %110 {strides = array<i32>} : memref<18x18x128xf32, #tpu.memory_space<vmem>>, vector<16x16x128xf32>,
      %cst_81 = arith.constant 0.000000e+00 : f32
      %112 = vector.broadcast %cst_81 : f32 to vector<8x128xf32>
      %c0_82 = arith.constant 0 : index
      %c0_83 = arith.constant 0 : index
      %c0_84 = arith.constant 0 : index
      %113 = vector.load %arg5[%c0_82, %c0_83, %c0_84] : memref<1x8x128xf32, #tpu.memory_space<vmem>>, vector<1x8x128xf32>
      %114 = vector.shape_cast %113 : vector<1x8x128xf32> to vector<8x128xf32>
      %115 = vector.shape_cast %112 : vector<8x128xf32> to vector<1x8x128xf32>
      tpu.vector_store %arg5[%c0_82, %c0_83, %c0_84], %115 {strides = array<i32>} : memref<1x8x128xf32, #tpu.memory_space<vmem>>, vector<1x8x128xf32>,
    } else {
    }
    %cst = arith.constant 0.000000e+00 : f32
    %3 = vector.broadcast %cst : f32 to vector<128x128xf32>
    %c8_i32 = arith.constant 8 : i32
    %4 = arith.muli %arg1, %c8_i32 : i32
    %5 = tpu.assume_multiple %4, 8 : i32
    %c0_i32_1 = arith.constant 0 : i32
    %6 = arith.addi %5, %c0_i32_1 : i32
    %7 = arith.index_cast %6 : i32 to index
    %c0 = arith.constant 0 : index
    %c0_2 = arith.constant 0 : index
    %8 = vector.load %arg6[%7, %c0, %c0_2] : memref<18x18x128xf32, #tpu.memory_space<vmem>>, vector<8x16x128xf32>
    %9 = vector.shape_cast %8 : vector<8x16x128xf32> to vector<128x128xf32>
    %10 = arith.truncf %9 : vector<128x128xf32> to vector<128x128xbf16>
    %c0_3 = arith.constant 0 : index
    %c0_4 = arith.constant 0 : index
    %c0_5 = arith.constant 0 : index
    %11 = vector.load %arg3[%c0_3, %c0_4, %c0_5] : memref<9x128x128xbf16, #tpu.memory_space<vmem>>, vector<1x128x128xbf16>
    %12 = vector.shape_cast %11 : vector<1x128x128xbf16> to vector<128x128xbf16>
    %cst_6 = arith.constant dense<0.000000e+00> : vector<128x128xf32>
    %13 = tpu.matmul %10, %12, %cst_6 {dimension_numbers = #tpu.dot_dimension_numbers<[1], [0], [0], [1], [0, 0, 1, 1], [], []>} : vector<128x128xbf16>, vector<128x128xbf16>, vector<128x128xf32> -> vector<128x128xf32>
    %14 = arith.addf %3, %13 : vector<128x128xf32>
    %c0_i32_7 = arith.constant 0 : i32
    %15 = arith.addi %5, %c0_i32_7 : i32
    %16 = arith.index_cast %15 : i32 to index
    %c1 = arith.constant 1 : index
    %c0_8 = arith.constant 0 : index
    %17 = vector.load %arg6[%16, %c1, %c0_8] : memref<18x18x128xf32, #tpu.memory_space<vmem>>, vector<8x16x128xf32>
    %18 = vector.shape_cast %17 : vector<8x16x128xf32> to vector<128x128xf32>
    %19 = arith.truncf %18 : vector<128x128xf32> to vector<128x128xbf16>
    %c1_9 = arith.constant 1 : index
    %c0_10 = arith.constant 0 : index
    %c0_11 = arith.constant 0 : index
    %20 = vector.load %arg3[%c1_9, %c0_10, %c0_11] : memref<9x128x128xbf16, #tpu.memory_space<vmem>>, vector<1x128x128xbf16>
    %21 = vector.shape_cast %20 : vector<1x128x128xbf16> to vector<128x128xbf16>
    %cst_12 = arith.constant dense<0.000000e+00> : vector<128x128xf32>
    %22 = tpu.matmul %19, %21, %cst_12 {dimension_numbers = #tpu.dot_dimension_numbers<[1], [0], [0], [1], [0, 0, 1, 1], [], []>} : vector<128x128xbf16>, vector<128x128xbf16>, vector<128x128xf32> -> vector<128x128xf32>
    %23 = arith.addf %14, %22 : vector<128x128xf32>
    %c0_i32_13 = arith.constant 0 : i32
    %24 = arith.addi %5, %c0_i32_13 : i32
    %25 = arith.index_cast %24 : i32 to index
    %c2 = arith.constant 2 : index
    %c0_14 = arith.constant 0 : index
    %26 = vector.load %arg6[%25, %c2, %c0_14] : memref<18x18x128xf32, #tpu.memory_space<vmem>>, vector<8x16x128xf32>
    %27 = vector.shape_cast %26 : vector<8x16x128xf32> to vector<128x128xf32>
    %28 = arith.truncf %27 : vector<128x128xf32> to vector<128x128xbf16>
    %c2_15 = arith.constant 2 : index
    %c0_16 = arith.constant 0 : index
    %c0_17 = arith.constant 0 : index
    %29 = vector.load %arg3[%c2_15, %c0_16, %c0_17] : memref<9x128x128xbf16, #tpu.memory_space<vmem>>, vector<1x128x128xbf16>
    %30 = vector.shape_cast %29 : vector<1x128x128xbf16> to vector<128x128xbf16>
    %cst_18 = arith.constant dense<0.000000e+00> : vector<128x128xf32>
    %31 = tpu.matmul %28, %30, %cst_18 {dimension_numbers = #tpu.dot_dimension_numbers<[1], [0], [0], [1], [0, 0, 1, 1], [], []>} : vector<128x128xbf16>, vector<128x128xbf16>, vector<128x128xf32> -> vector<128x128xf32>
    %32 = arith.addf %23, %31 : vector<128x128xf32>
    %c1_i32 = arith.constant 1 : i32
    %33 = arith.addi %5, %c1_i32 : i32
    %34 = arith.index_cast %33 : i32 to index
    %c0_19 = arith.constant 0 : index
    %c0_20 = arith.constant 0 : index
    %35 = vector.load %arg6[%34, %c0_19, %c0_20] : memref<18x18x128xf32, #tpu.memory_space<vmem>>, vector<8x16x128xf32>
    %36 = vector.shape_cast %35 : vector<8x16x128xf32> to vector<128x128xf32>
    %37 = arith.truncf %36 : vector<128x128xf32> to vector<128x128xbf16>
    %c3 = arith.constant 3 : index
    %c0_21 = arith.constant 0 : index
    %c0_22 = arith.constant 0 : index
    %38 = vector.load %arg3[%c3, %c0_21, %c0_22] : memref<9x128x128xbf16, #tpu.memory_space<vmem>>, vector<1x128x128xbf16>
    %39 = vector.shape_cast %38 : vector<1x128x128xbf16> to vector<128x128xbf16>
    %cst_23 = arith.constant dense<0.000000e+00> : vector<128x128xf32>
    %40 = tpu.matmul %37, %39, %cst_23 {dimension_numbers = #tpu.dot_dimension_numbers<[1], [0], [0], [1], [0, 0, 1, 1], [], []>} : vector<128x128xbf16>, vector<128x128xbf16>, vector<128x128xf32> -> vector<128x128xf32>
    %41 = arith.addf %32, %40 : vector<128x128xf32>
    %c1_i32_24 = arith.constant 1 : i32
    %42 = arith.addi %5, %c1_i32_24 : i32
    %43 = arith.index_cast %42 : i32 to index
    %c1_25 = arith.constant 1 : index
    %c0_26 = arith.constant 0 : index
    %44 = vector.load %arg6[%43, %c1_25, %c0_26] : memref<18x18x128xf32, #tpu.memory_space<vmem>>, vector<8x16x128xf32>
    %45 = vector.shape_cast %44 : vector<8x16x128xf32> to vector<128x128xf32>
    %46 = arith.truncf %45 : vector<128x128xf32> to vector<128x128xbf16>
    %c4 = arith.constant 4 : index
    %c0_27 = arith.constant 0 : index
    %c0_28 = arith.constant 0 : index
    %47 = vector.load %arg3[%c4, %c0_27, %c0_28] : memref<9x128x128xbf16, #tpu.memory_space<vmem>>, vector<1x128x128xbf16>
    %48 = vector.shape_cast %47 : vector<1x128x128xbf16> to vector<128x128xbf16>
    %cst_29 = arith.constant dense<0.000000e+00> : vector<128x128xf32>
    %49 = tpu.matmul %46, %48, %cst_29 {dimension_numbers = #tpu.dot_dimension_numbers<[1], [0], [0], [1], [0, 0, 1, 1], [], []>} : vector<128x128xbf16>, vector<128x128xbf16>, vector<128x128xf32> -> vector<128x128xf32>
    %50 = arith.addf %41, %49 : vector<128x128xf32>
    %c1_i32_30 = arith.constant 1 : i32
    %51 = arith.addi %5, %c1_i32_30 : i32
    %52 = arith.index_cast %51 : i32 to index
    %c2_31 = arith.constant 2 : index
    %c0_32 = arith.constant 0 : index
    %53 = vector.load %arg6[%52, %c2_31, %c0_32] : memref<18x18x128xf32, #tpu.memory_space<vmem>>, vector<8x16x128xf32>
    %54 = vector.shape_cast %53 : vector<8x16x128xf32> to vector<128x128xf32>
    %55 = arith.truncf %54 : vector<128x128xf32> to vector<128x128xbf16>
    %c5 = arith.constant 5 : index
    %c0_33 = arith.constant 0 : index
    %c0_34 = arith.constant 0 : index
    %56 = vector.load %arg3[%c5, %c0_33, %c0_34] : memref<9x128x128xbf16, #tpu.memory_space<vmem>>, vector<1x128x128xbf16>
    %57 = vector.shape_cast %56 : vector<1x128x128xbf16> to vector<128x128xbf16>
    %cst_35 = arith.constant dense<0.000000e+00> : vector<128x128xf32>
    %58 = tpu.matmul %55, %57, %cst_35 {dimension_numbers = #tpu.dot_dimension_numbers<[1], [0], [0], [1], [0, 0, 1, 1], [], []>} : vector<128x128xbf16>, vector<128x128xbf16>, vector<128x128xf32> -> vector<128x128xf32>
    %59 = arith.addf %50, %58 : vector<128x128xf32>
    %c2_i32 = arith.constant 2 : i32
    %60 = arith.addi %5, %c2_i32 : i32
    %61 = arith.index_cast %60 : i32 to index
    %c0_36 = arith.constant 0 : index
    %c0_37 = arith.constant 0 : index
    %62 = vector.load %arg6[%61, %c0_36, %c0_37] : memref<18x18x128xf32, #tpu.memory_space<vmem>>, vector<8x16x128xf32>
    %63 = vector.shape_cast %62 : vector<8x16x128xf32> to vector<128x128xf32>
    %64 = arith.truncf %63 : vector<128x128xf32> to vector<128x128xbf16>
    %c6 = arith.constant 6 : index
    %c0_38 = arith.constant 0 : index
    %c0_39 = arith.constant 0 : index
    %65 = vector.load %arg3[%c6, %c0_38, %c0_39] : memref<9x128x128xbf16, #tpu.memory_space<vmem>>, vector<1x128x128xbf16>
    %66 = vector.shape_cast %65 : vector<1x128x128xbf16> to vector<128x128xbf16>
    %cst_40 = arith.constant dense<0.000000e+00> : vector<128x128xf32>
    %67 = tpu.matmul %64, %66, %cst_40 {dimension_numbers = #tpu.dot_dimension_numbers<[1], [0], [0], [1], [0, 0, 1, 1], [], []>} : vector<128x128xbf16>, vector<128x128xbf16>, vector<128x128xf32> -> vector<128x128xf32>
    %68 = arith.addf %59, %67 : vector<128x128xf32>
    %c2_i32_41 = arith.constant 2 : i32
    %69 = arith.addi %5, %c2_i32_41 : i32
    %70 = arith.index_cast %69 : i32 to index
    %c1_42 = arith.constant 1 : index
    %c0_43 = arith.constant 0 : index
    %71 = vector.load %arg6[%70, %c1_42, %c0_43] : memref<18x18x128xf32, #tpu.memory_space<vmem>>, vector<8x16x128xf32>
    %72 = vector.shape_cast %71 : vector<8x16x128xf32> to vector<128x128xf32>
    %73 = arith.truncf %72 : vector<128x128xf32> to vector<128x128xbf16>
    %c7 = arith.constant 7 : index
    %c0_44 = arith.constant 0 : index
    %c0_45 = arith.constant 0 : index
    %74 = vector.load %arg3[%c7, %c0_44, %c0_45] : memref<9x128x128xbf16, #tpu.memory_space<vmem>>, vector<1x128x128xbf16>
    %75 = vector.shape_cast %74 : vector<1x128x128xbf16> to vector<128x128xbf16>
    %cst_46 = arith.constant dense<0.000000e+00> : vector<128x128xf32>
    %76 = tpu.matmul %73, %75, %cst_46 {dimension_numbers = #tpu.dot_dimension_numbers<[1], [0], [0], [1], [0, 0, 1, 1], [], []>} : vector<128x128xbf16>, vector<128x128xbf16>, vector<128x128xf32> -> vector<128x128xf32>
    %77 = arith.addf %68, %76 : vector<128x128xf32>
    %c2_i32_47 = arith.constant 2 : i32
    %78 = arith.addi %5, %c2_i32_47 : i32
    %79 = arith.index_cast %78 : i32 to index
    %c2_48 = arith.constant 2 : index
    %c0_49 = arith.constant 0 : index
    %80 = vector.load %arg6[%79, %c2_48, %c0_49] : memref<18x18x128xf32, #tpu.memory_space<vmem>>, vector<8x16x128xf32>
    %81 = vector.shape_cast %80 : vector<8x16x128xf32> to vector<128x128xf32>
    %82 = arith.truncf %81 : vector<128x128xf32> to vector<128x128xbf16>
    %c8 = arith.constant 8 : index
    %c0_50 = arith.constant 0 : index
    %c0_51 = arith.constant 0 : index
    %83 = vector.load %arg3[%c8, %c0_50, %c0_51] : memref<9x128x128xbf16, #tpu.memory_space<vmem>>, vector<1x128x128xbf16>
    %84 = vector.shape_cast %83 : vector<1x128x128xbf16> to vector<128x128xbf16>
    %cst_52 = arith.constant dense<0.000000e+00> : vector<128x128xf32>
    %85 = tpu.matmul %82, %84, %cst_52 {dimension_numbers = #tpu.dot_dimension_numbers<[1], [0], [0], [1], [0, 0, 1, 1], [], []>} : vector<128x128xbf16>, vector<128x128xbf16>, vector<128x128xf32> -> vector<128x128xf32>
    %86 = arith.addf %77, %85 : vector<128x128xf32>
    %c0_53 = arith.constant 0 : index
    %c0_54 = arith.constant 0 : index
    %c0_55 = arith.constant 0 : index
    %87 = vector.load %arg4[%c0_53, %c0_54, %c0_55] : memref<1x128x128xf32, #tpu.memory_space<vmem>>, vector<1x128x128xf32>
    %88 = vector.shape_cast %87 : vector<1x128x128xf32> to vector<128x128xf32>
    %89 = vector.shape_cast %86 : vector<128x128xf32> to vector<1x128x128xf32>
    tpu.vector_store %arg4[%c0_53, %c0_54, %c0_55], %89 {strides = array<i32>} : memref<1x128x128xf32, #tpu.memory_space<vmem>>, vector<1x128x128xf32>,
    %c0_56 = arith.constant 0 : index
    %c0_57 = arith.constant 0 : index
    %c0_58 = arith.constant 0 : index
    %90 = vector.load %arg5[%c0_56, %c0_57, %c0_58] : memref<1x8x128xf32, #tpu.memory_space<vmem>>, vector<1x1x128xf32>
    %91 = vector.shape_cast %90 : vector<1x1x128xf32> to vector<1x128xf32>
    %cst_59 = arith.constant dense<0.000000e+00> : vector<128xf32>
    %92 = vector.multi_reduction <add>, %86, %cst_59 [0] : vector<128x128xf32> to vector<128xf32>
    %93 = vector.shape_cast %92 : vector<128xf32> to vector<1x128xf32>
    %94 = arith.addf %91, %93 : vector<1x128xf32>
    %c0_60 = arith.constant 0 : index
    %c0_61 = arith.constant 0 : index
    %c0_62 = arith.constant 0 : index
    %95 = vector.load %arg5[%c0_60, %c0_61, %c0_62] : memref<1x8x128xf32, #tpu.memory_space<vmem>>, vector<1x1x128xf32>
    %96 = vector.shape_cast %95 : vector<1x1x128xf32> to vector<1x128xf32>
    %97 = vector.shape_cast %94 : vector<1x128xf32> to vector<1x1x128xf32>
    tpu.vector_store %arg5[%c0_60, %c0_61, %c0_62], %97 {strides = array<i32>} : memref<1x8x128xf32, #tpu.memory_space<vmem>>, vector<1x1x128xf32>,
    %c0_63 = arith.constant 0 : index
    %c1_64 = arith.constant 1 : index
    %c0_65 = arith.constant 0 : index
    %98 = vector.load %arg5[%c0_63, %c1_64, %c0_65] : memref<1x8x128xf32, #tpu.memory_space<vmem>>, vector<1x1x128xf32>
    %99 = vector.shape_cast %98 : vector<1x1x128xf32> to vector<1x128xf32>
    %100 = arith.mulf %86, %86 : vector<128x128xf32>
    %cst_66 = arith.constant dense<0.000000e+00> : vector<128xf32>
    %101 = vector.multi_reduction <add>, %100, %cst_66 [0] : vector<128x128xf32> to vector<128xf32>
    %102 = vector.shape_cast %101 : vector<128xf32> to vector<1x128xf32>
    %103 = arith.addf %99, %102 : vector<1x128xf32>
    %c0_67 = arith.constant 0 : index
    %c1_68 = arith.constant 1 : index
    %c0_69 = arith.constant 0 : index
    %104 = vector.load %arg5[%c0_67, %c1_68, %c0_69] : memref<1x8x128xf32, #tpu.memory_space<vmem>>, vector<1x1x128xf32>
    %105 = vector.shape_cast %104 : vector<1x1x128xf32> to vector<1x128xf32>
    %106 = vector.shape_cast %103 : vector<1x128xf32> to vector<1x1x128xf32>
    tpu.vector_store %arg5[%c0_67, %c1_68, %c0_69], %106 {strides = array<i32>} : memref<1x8x128xf32, #tpu.memory_space<vmem>>, vector<1x1x128xf32>,
    return
  }
  func.func @transform_0(%arg0: i32, %arg1: i32) -> (i32, i32, i32, i32) {
    %c0_i32 = arith.constant 0 : i32
    %c0_i32_0 = arith.constant 0 : i32
    %c0_i32_1 = arith.constant 0 : i32
    %c0_i32_2 = arith.constant 0 : i32
    return %arg0, %c0_i32, %c0_i32_0, %c0_i32_1 : i32, i32, i32, i32
  }
  func.func @transform_1(%arg0: i32, %arg1: i32) -> (i32, i32, i32) {
    %c0_i32 = arith.constant 0 : i32
    %c0_i32_0 = arith.constant 0 : i32
    %c0_i32_1 = arith.constant 0 : i32
    %c0_i32_2 = arith.constant 0 : i32
    return %c0_i32, %c0_i32_0, %c0_i32_1 : i32, i32, i32
  }
  func.func @transform_2(%arg0: i32, %arg1: i32) -> (i32, i32, i32) {
    %c0_i32 = arith.constant 0 : i32
    %c0_i32_0 = arith.constant 0 : i32
    return %arg0, %arg1, %c0_i32 : i32, i32, i32
  }
  func.func @transform_3(%arg0: i32, %arg1: i32) -> (i32, i32, i32) {
    %c0_i32 = arith.constant 0 : i32
    %c0_i32_0 = arith.constant 0 : i32
    %c0_i32_1 = arith.constant 0 : i32
    return %arg0, %c0_i32, %c0_i32_0 : i32, i32, i32
  }
}

module attributes {stable_mosaic.version = 11 : i64} {
  func.func @_conv_kernel(%arg0: i32, %arg1: i32, %arg2: memref<1x16x16x128xf32, #tpu.memory_space<vmem>>, %arg3: memref<9x128x128xbf16, #tpu.memory_space<vmem>>, %arg4: memref<1x128xf32, #tpu.memory_space<vmem>>, %arg5: memref<1x128xf32, #tpu.memory_space<vmem>>, %arg6: memref<1x128x128xf32, #tpu.memory_space<vmem>>, %arg7: memref<1x8x128xf32, #tpu.memory_space<vmem>>, %arg8: memref<18x18x128xf32, #tpu.memory_space<vmem>>) attributes {dimension_semantics = [#tpu.dimension_semantics<parallel>, #tpu.dimension_semantics<arbitrary>], iteration_bounds = array<i64: 2, 2>, scalar_prefetch = 0 : i64, scratch_operands = 1 : i64, tpu.core_type = #tpu.core_type<tc>, window_params = [{transform_indices = @transform_0, window_bounds = array<i64: 1, 16, 16, 128>}, {pipeline_mode = #tpu.pipeline_mode<synchronous>, transform_indices = @transform_1, window_bounds = array<i64: 9, 128, 128>}, {pipeline_mode = #tpu.pipeline_mode<synchronous>, transform_indices = @transform_2, window_bounds = array<i64: 1, 128>}, {pipeline_mode = #tpu.pipeline_mode<synchronous>, transform_indices = @transform_3, window_bounds = array<i64: 1, 128>}, {transform_indices = @transform_4, window_bounds = array<i64: 1, 128, 128>}, {transform_indices = @transform_5, window_bounds = array<i64: 1, 8, 128>}]} {
    %c0_i32 = arith.constant 0 : i32
    %0 = arith.cmpi eq, %arg1, %c0_i32 : i32
    %1 = arith.extui %0 : i1 to i32
    %c0_i32_0 = arith.constant 0 : i32
    %2 = arith.cmpi ne, %1, %c0_i32_0 : i32
    scf.if %2 {
      %cst_70 = arith.constant 0.000000e+00 : f32
      %107 = vector.broadcast %cst_70 : f32 to vector<18x18x128xf32>
      %c0_71 = arith.constant 0 : index
      %c0_72 = arith.constant 0 : index
      %c0_73 = arith.constant 0 : index
      %108 = vector.load %arg8[%c0_71, %c0_72, %c0_73] : memref<18x18x128xf32, #tpu.memory_space<vmem>>, vector<18x18x128xf32>
      tpu.vector_store %arg8[%c0_71, %c0_72, %c0_73], %107 {strides = array<i32>} : memref<18x18x128xf32, #tpu.memory_space<vmem>>, vector<18x18x128xf32>,
      %c0_74 = arith.constant 0 : index
      %c0_75 = arith.constant 0 : index
      %c0_76 = arith.constant 0 : index
      %c0_77 = arith.constant 0 : index
      %109 = vector.load %arg2[%c0_74, %c0_75, %c0_76, %c0_77] : memref<1x16x16x128xf32, #tpu.memory_space<vmem>>, vector<1x16x16x128xf32>
      %110 = vector.shape_cast %109 : vector<1x16x16x128xf32> to vector<16x16x128xf32>
      %c0_78 = arith.constant 0 : index
      %c0_79 = arith.constant 0 : index
      %111 = vector.load %arg4[%c0_78, %c0_79] : memref<1x128xf32, #tpu.memory_space<vmem>>, vector<1x128xf32>
      %112 = vector.shape_cast %111 : vector<1x128xf32> to vector<1x1x128xf32>
      %c0_80 = arith.constant 0 : index
      %c0_81 = arith.constant 0 : index
      %113 = vector.load %arg5[%c0_80, %c0_81] : memref<1x128xf32, #tpu.memory_space<vmem>>, vector<1x128xf32>
      %114 = vector.shape_cast %113 : vector<1x128xf32> to vector<1x1x128xf32>
      %115 = vector.broadcast %112 : vector<1x1x128xf32> to vector<16x16x128xf32>
      %116 = arith.mulf %110, %115 : vector<16x16x128xf32>
      %117 = vector.broadcast %114 : vector<1x1x128xf32> to vector<16x16x128xf32>
      %118 = arith.addf %116, %117 : vector<16x16x128xf32>
      %cst_82 = arith.constant 0.000000e+00 : f32
      %119 = vector.broadcast %cst_82 : f32 to vector<16x16x128xf32>
      %120 = arith.maximumf %118, %119 : vector<16x16x128xf32>
      %c1_83 = arith.constant 1 : index
      %c1_84 = arith.constant 1 : index
      %c0_85 = arith.constant 0 : index
      %121 = vector.load %arg8[%c1_83, %c1_84, %c0_85] : memref<18x18x128xf32, #tpu.memory_space<vmem>>, vector<16x16x128xf32>
      tpu.vector_store %arg8[%c1_83, %c1_84, %c0_85], %120 {strides = array<i32>} : memref<18x18x128xf32, #tpu.memory_space<vmem>>, vector<16x16x128xf32>,
      %cst_86 = arith.constant 0.000000e+00 : f32
      %122 = vector.broadcast %cst_86 : f32 to vector<8x128xf32>
      %c0_87 = arith.constant 0 : index
      %c0_88 = arith.constant 0 : index
      %c0_89 = arith.constant 0 : index
      %123 = vector.load %arg7[%c0_87, %c0_88, %c0_89] : memref<1x8x128xf32, #tpu.memory_space<vmem>>, vector<1x8x128xf32>
      %124 = vector.shape_cast %123 : vector<1x8x128xf32> to vector<8x128xf32>
      %125 = vector.shape_cast %122 : vector<8x128xf32> to vector<1x8x128xf32>
      tpu.vector_store %arg7[%c0_87, %c0_88, %c0_89], %125 {strides = array<i32>} : memref<1x8x128xf32, #tpu.memory_space<vmem>>, vector<1x8x128xf32>,
    } else {
    }
    %cst = arith.constant 0.000000e+00 : f32
    %3 = vector.broadcast %cst : f32 to vector<128x128xf32>
    %c8_i32 = arith.constant 8 : i32
    %4 = arith.muli %arg1, %c8_i32 : i32
    %5 = tpu.assume_multiple %4, 8 : i32
    %c0_i32_1 = arith.constant 0 : i32
    %6 = arith.addi %5, %c0_i32_1 : i32
    %7 = arith.index_cast %6 : i32 to index
    %c0 = arith.constant 0 : index
    %c0_2 = arith.constant 0 : index
    %8 = vector.load %arg8[%7, %c0, %c0_2] : memref<18x18x128xf32, #tpu.memory_space<vmem>>, vector<8x16x128xf32>
    %9 = vector.shape_cast %8 : vector<8x16x128xf32> to vector<128x128xf32>
    %10 = arith.truncf %9 : vector<128x128xf32> to vector<128x128xbf16>
    %c0_3 = arith.constant 0 : index
    %c0_4 = arith.constant 0 : index
    %c0_5 = arith.constant 0 : index
    %11 = vector.load %arg3[%c0_3, %c0_4, %c0_5] : memref<9x128x128xbf16, #tpu.memory_space<vmem>>, vector<1x128x128xbf16>
    %12 = vector.shape_cast %11 : vector<1x128x128xbf16> to vector<128x128xbf16>
    %cst_6 = arith.constant dense<0.000000e+00> : vector<128x128xf32>
    %13 = tpu.matmul %10, %12, %cst_6 {dimension_numbers = #tpu.dot_dimension_numbers<[1], [0], [0], [1], [0, 0, 1, 1], [], []>} : vector<128x128xbf16>, vector<128x128xbf16>, vector<128x128xf32> -> vector<128x128xf32>
    %14 = arith.addf %3, %13 : vector<128x128xf32>
    %c0_i32_7 = arith.constant 0 : i32
    %15 = arith.addi %5, %c0_i32_7 : i32
    %16 = arith.index_cast %15 : i32 to index
    %c1 = arith.constant 1 : index
    %c0_8 = arith.constant 0 : index
    %17 = vector.load %arg8[%16, %c1, %c0_8] : memref<18x18x128xf32, #tpu.memory_space<vmem>>, vector<8x16x128xf32>
    %18 = vector.shape_cast %17 : vector<8x16x128xf32> to vector<128x128xf32>
    %19 = arith.truncf %18 : vector<128x128xf32> to vector<128x128xbf16>
    %c1_9 = arith.constant 1 : index
    %c0_10 = arith.constant 0 : index
    %c0_11 = arith.constant 0 : index
    %20 = vector.load %arg3[%c1_9, %c0_10, %c0_11] : memref<9x128x128xbf16, #tpu.memory_space<vmem>>, vector<1x128x128xbf16>
    %21 = vector.shape_cast %20 : vector<1x128x128xbf16> to vector<128x128xbf16>
    %cst_12 = arith.constant dense<0.000000e+00> : vector<128x128xf32>
    %22 = tpu.matmul %19, %21, %cst_12 {dimension_numbers = #tpu.dot_dimension_numbers<[1], [0], [0], [1], [0, 0, 1, 1], [], []>} : vector<128x128xbf16>, vector<128x128xbf16>, vector<128x128xf32> -> vector<128x128xf32>
    %23 = arith.addf %14, %22 : vector<128x128xf32>
    %c0_i32_13 = arith.constant 0 : i32
    %24 = arith.addi %5, %c0_i32_13 : i32
    %25 = arith.index_cast %24 : i32 to index
    %c2 = arith.constant 2 : index
    %c0_14 = arith.constant 0 : index
    %26 = vector.load %arg8[%25, %c2, %c0_14] : memref<18x18x128xf32, #tpu.memory_space<vmem>>, vector<8x16x128xf32>
    %27 = vector.shape_cast %26 : vector<8x16x128xf32> to vector<128x128xf32>
    %28 = arith.truncf %27 : vector<128x128xf32> to vector<128x128xbf16>
    %c2_15 = arith.constant 2 : index
    %c0_16 = arith.constant 0 : index
    %c0_17 = arith.constant 0 : index
    %29 = vector.load %arg3[%c2_15, %c0_16, %c0_17] : memref<9x128x128xbf16, #tpu.memory_space<vmem>>, vector<1x128x128xbf16>
    %30 = vector.shape_cast %29 : vector<1x128x128xbf16> to vector<128x128xbf16>
    %cst_18 = arith.constant dense<0.000000e+00> : vector<128x128xf32>
    %31 = tpu.matmul %28, %30, %cst_18 {dimension_numbers = #tpu.dot_dimension_numbers<[1], [0], [0], [1], [0, 0, 1, 1], [], []>} : vector<128x128xbf16>, vector<128x128xbf16>, vector<128x128xf32> -> vector<128x128xf32>
    %32 = arith.addf %23, %31 : vector<128x128xf32>
    %c1_i32 = arith.constant 1 : i32
    %33 = arith.addi %5, %c1_i32 : i32
    %34 = arith.index_cast %33 : i32 to index
    %c0_19 = arith.constant 0 : index
    %c0_20 = arith.constant 0 : index
    %35 = vector.load %arg8[%34, %c0_19, %c0_20] : memref<18x18x128xf32, #tpu.memory_space<vmem>>, vector<8x16x128xf32>
    %36 = vector.shape_cast %35 : vector<8x16x128xf32> to vector<128x128xf32>
    %37 = arith.truncf %36 : vector<128x128xf32> to vector<128x128xbf16>
    %c3 = arith.constant 3 : index
    %c0_21 = arith.constant 0 : index
    %c0_22 = arith.constant 0 : index
    %38 = vector.load %arg3[%c3, %c0_21, %c0_22] : memref<9x128x128xbf16, #tpu.memory_space<vmem>>, vector<1x128x128xbf16>
    %39 = vector.shape_cast %38 : vector<1x128x128xbf16> to vector<128x128xbf16>
    %cst_23 = arith.constant dense<0.000000e+00> : vector<128x128xf32>
    %40 = tpu.matmul %37, %39, %cst_23 {dimension_numbers = #tpu.dot_dimension_numbers<[1], [0], [0], [1], [0, 0, 1, 1], [], []>} : vector<128x128xbf16>, vector<128x128xbf16>, vector<128x128xf32> -> vector<128x128xf32>
    %41 = arith.addf %32, %40 : vector<128x128xf32>
    %c1_i32_24 = arith.constant 1 : i32
    %42 = arith.addi %5, %c1_i32_24 : i32
    %43 = arith.index_cast %42 : i32 to index
    %c1_25 = arith.constant 1 : index
    %c0_26 = arith.constant 0 : index
    %44 = vector.load %arg8[%43, %c1_25, %c0_26] : memref<18x18x128xf32, #tpu.memory_space<vmem>>, vector<8x16x128xf32>
    %45 = vector.shape_cast %44 : vector<8x16x128xf32> to vector<128x128xf32>
    %46 = arith.truncf %45 : vector<128x128xf32> to vector<128x128xbf16>
    %c4 = arith.constant 4 : index
    %c0_27 = arith.constant 0 : index
    %c0_28 = arith.constant 0 : index
    %47 = vector.load %arg3[%c4, %c0_27, %c0_28] : memref<9x128x128xbf16, #tpu.memory_space<vmem>>, vector<1x128x128xbf16>
    %48 = vector.shape_cast %47 : vector<1x128x128xbf16> to vector<128x128xbf16>
    %cst_29 = arith.constant dense<0.000000e+00> : vector<128x128xf32>
    %49 = tpu.matmul %46, %48, %cst_29 {dimension_numbers = #tpu.dot_dimension_numbers<[1], [0], [0], [1], [0, 0, 1, 1], [], []>} : vector<128x128xbf16>, vector<128x128xbf16>, vector<128x128xf32> -> vector<128x128xf32>
    %50 = arith.addf %41, %49 : vector<128x128xf32>
    %c1_i32_30 = arith.constant 1 : i32
    %51 = arith.addi %5, %c1_i32_30 : i32
    %52 = arith.index_cast %51 : i32 to index
    %c2_31 = arith.constant 2 : index
    %c0_32 = arith.constant 0 : index
    %53 = vector.load %arg8[%52, %c2_31, %c0_32] : memref<18x18x128xf32, #tpu.memory_space<vmem>>, vector<8x16x128xf32>
    %54 = vector.shape_cast %53 : vector<8x16x128xf32> to vector<128x128xf32>
    %55 = arith.truncf %54 : vector<128x128xf32> to vector<128x128xbf16>
    %c5 = arith.constant 5 : index
    %c0_33 = arith.constant 0 : index
    %c0_34 = arith.constant 0 : index
    %56 = vector.load %arg3[%c5, %c0_33, %c0_34] : memref<9x128x128xbf16, #tpu.memory_space<vmem>>, vector<1x128x128xbf16>
    %57 = vector.shape_cast %56 : vector<1x128x128xbf16> to vector<128x128xbf16>
    %cst_35 = arith.constant dense<0.000000e+00> : vector<128x128xf32>
    %58 = tpu.matmul %55, %57, %cst_35 {dimension_numbers = #tpu.dot_dimension_numbers<[1], [0], [0], [1], [0, 0, 1, 1], [], []>} : vector<128x128xbf16>, vector<128x128xbf16>, vector<128x128xf32> -> vector<128x128xf32>
    %59 = arith.addf %50, %58 : vector<128x128xf32>
    %c2_i32 = arith.constant 2 : i32
    %60 = arith.addi %5, %c2_i32 : i32
    %61 = arith.index_cast %60 : i32 to index
    %c0_36 = arith.constant 0 : index
    %c0_37 = arith.constant 0 : index
    %62 = vector.load %arg8[%61, %c0_36, %c0_37] : memref<18x18x128xf32, #tpu.memory_space<vmem>>, vector<8x16x128xf32>
    %63 = vector.shape_cast %62 : vector<8x16x128xf32> to vector<128x128xf32>
    %64 = arith.truncf %63 : vector<128x128xf32> to vector<128x128xbf16>
    %c6 = arith.constant 6 : index
    %c0_38 = arith.constant 0 : index
    %c0_39 = arith.constant 0 : index
    %65 = vector.load %arg3[%c6, %c0_38, %c0_39] : memref<9x128x128xbf16, #tpu.memory_space<vmem>>, vector<1x128x128xbf16>
    %66 = vector.shape_cast %65 : vector<1x128x128xbf16> to vector<128x128xbf16>
    %cst_40 = arith.constant dense<0.000000e+00> : vector<128x128xf32>
    %67 = tpu.matmul %64, %66, %cst_40 {dimension_numbers = #tpu.dot_dimension_numbers<[1], [0], [0], [1], [0, 0, 1, 1], [], []>} : vector<128x128xbf16>, vector<128x128xbf16>, vector<128x128xf32> -> vector<128x128xf32>
    %68 = arith.addf %59, %67 : vector<128x128xf32>
    %c2_i32_41 = arith.constant 2 : i32
    %69 = arith.addi %5, %c2_i32_41 : i32
    %70 = arith.index_cast %69 : i32 to index
    %c1_42 = arith.constant 1 : index
    %c0_43 = arith.constant 0 : index
    %71 = vector.load %arg8[%70, %c1_42, %c0_43] : memref<18x18x128xf32, #tpu.memory_space<vmem>>, vector<8x16x128xf32>
    %72 = vector.shape_cast %71 : vector<8x16x128xf32> to vector<128x128xf32>
    %73 = arith.truncf %72 : vector<128x128xf32> to vector<128x128xbf16>
    %c7 = arith.constant 7 : index
    %c0_44 = arith.constant 0 : index
    %c0_45 = arith.constant 0 : index
    %74 = vector.load %arg3[%c7, %c0_44, %c0_45] : memref<9x128x128xbf16, #tpu.memory_space<vmem>>, vector<1x128x128xbf16>
    %75 = vector.shape_cast %74 : vector<1x128x128xbf16> to vector<128x128xbf16>
    %cst_46 = arith.constant dense<0.000000e+00> : vector<128x128xf32>
    %76 = tpu.matmul %73, %75, %cst_46 {dimension_numbers = #tpu.dot_dimension_numbers<[1], [0], [0], [1], [0, 0, 1, 1], [], []>} : vector<128x128xbf16>, vector<128x128xbf16>, vector<128x128xf32> -> vector<128x128xf32>
    %77 = arith.addf %68, %76 : vector<128x128xf32>
    %c2_i32_47 = arith.constant 2 : i32
    %78 = arith.addi %5, %c2_i32_47 : i32
    %79 = arith.index_cast %78 : i32 to index
    %c2_48 = arith.constant 2 : index
    %c0_49 = arith.constant 0 : index
    %80 = vector.load %arg8[%79, %c2_48, %c0_49] : memref<18x18x128xf32, #tpu.memory_space<vmem>>, vector<8x16x128xf32>
    %81 = vector.shape_cast %80 : vector<8x16x128xf32> to vector<128x128xf32>
    %82 = arith.truncf %81 : vector<128x128xf32> to vector<128x128xbf16>
    %c8 = arith.constant 8 : index
    %c0_50 = arith.constant 0 : index
    %c0_51 = arith.constant 0 : index
    %83 = vector.load %arg3[%c8, %c0_50, %c0_51] : memref<9x128x128xbf16, #tpu.memory_space<vmem>>, vector<1x128x128xbf16>
    %84 = vector.shape_cast %83 : vector<1x128x128xbf16> to vector<128x128xbf16>
    %cst_52 = arith.constant dense<0.000000e+00> : vector<128x128xf32>
    %85 = tpu.matmul %82, %84, %cst_52 {dimension_numbers = #tpu.dot_dimension_numbers<[1], [0], [0], [1], [0, 0, 1, 1], [], []>} : vector<128x128xbf16>, vector<128x128xbf16>, vector<128x128xf32> -> vector<128x128xf32>
    %86 = arith.addf %77, %85 : vector<128x128xf32>
    %c0_53 = arith.constant 0 : index
    %c0_54 = arith.constant 0 : index
    %c0_55 = arith.constant 0 : index
    %87 = vector.load %arg6[%c0_53, %c0_54, %c0_55] : memref<1x128x128xf32, #tpu.memory_space<vmem>>, vector<1x128x128xf32>
    %88 = vector.shape_cast %87 : vector<1x128x128xf32> to vector<128x128xf32>
    %89 = vector.shape_cast %86 : vector<128x128xf32> to vector<1x128x128xf32>
    tpu.vector_store %arg6[%c0_53, %c0_54, %c0_55], %89 {strides = array<i32>} : memref<1x128x128xf32, #tpu.memory_space<vmem>>, vector<1x128x128xf32>,
    %c0_56 = arith.constant 0 : index
    %c0_57 = arith.constant 0 : index
    %c0_58 = arith.constant 0 : index
    %90 = vector.load %arg7[%c0_56, %c0_57, %c0_58] : memref<1x8x128xf32, #tpu.memory_space<vmem>>, vector<1x1x128xf32>
    %91 = vector.shape_cast %90 : vector<1x1x128xf32> to vector<1x128xf32>
    %cst_59 = arith.constant dense<0.000000e+00> : vector<128xf32>
    %92 = vector.multi_reduction <add>, %86, %cst_59 [0] : vector<128x128xf32> to vector<128xf32>
    %93 = vector.shape_cast %92 : vector<128xf32> to vector<1x128xf32>
    %94 = arith.addf %91, %93 : vector<1x128xf32>
    %c0_60 = arith.constant 0 : index
    %c0_61 = arith.constant 0 : index
    %c0_62 = arith.constant 0 : index
    %95 = vector.load %arg7[%c0_60, %c0_61, %c0_62] : memref<1x8x128xf32, #tpu.memory_space<vmem>>, vector<1x1x128xf32>
    %96 = vector.shape_cast %95 : vector<1x1x128xf32> to vector<1x128xf32>
    %97 = vector.shape_cast %94 : vector<1x128xf32> to vector<1x1x128xf32>
    tpu.vector_store %arg7[%c0_60, %c0_61, %c0_62], %97 {strides = array<i32>} : memref<1x8x128xf32, #tpu.memory_space<vmem>>, vector<1x1x128xf32>,
    %c0_63 = arith.constant 0 : index
    %c1_64 = arith.constant 1 : index
    %c0_65 = arith.constant 0 : index
    %98 = vector.load %arg7[%c0_63, %c1_64, %c0_65] : memref<1x8x128xf32, #tpu.memory_space<vmem>>, vector<1x1x128xf32>
    %99 = vector.shape_cast %98 : vector<1x1x128xf32> to vector<1x128xf32>
    %100 = arith.mulf %86, %86 : vector<128x128xf32>
    %cst_66 = arith.constant dense<0.000000e+00> : vector<128xf32>
    %101 = vector.multi_reduction <add>, %100, %cst_66 [0] : vector<128x128xf32> to vector<128xf32>
    %102 = vector.shape_cast %101 : vector<128xf32> to vector<1x128xf32>
    %103 = arith.addf %99, %102 : vector<1x128xf32>
    %c0_67 = arith.constant 0 : index
    %c1_68 = arith.constant 1 : index
    %c0_69 = arith.constant 0 : index
    %104 = vector.load %arg7[%c0_67, %c1_68, %c0_69] : memref<1x8x128xf32, #tpu.memory_space<vmem>>, vector<1x1x128xf32>
    %105 = vector.shape_cast %104 : vector<1x1x128xf32> to vector<1x128xf32>
    %106 = vector.shape_cast %103 : vector<1x128xf32> to vector<1x1x128xf32>
    tpu.vector_store %arg7[%c0_67, %c1_68, %c0_69], %106 {strides = array<i32>} : memref<1x8x128xf32, #tpu.memory_space<vmem>>, vector<1x1x128xf32>,
    return
  }
  func.func @transform_0(%arg0: i32, %arg1: i32) -> (i32, i32, i32, i32) {
    %c0_i32 = arith.constant 0 : i32
    %c0_i32_0 = arith.constant 0 : i32
    %c0_i32_1 = arith.constant 0 : i32
    %c0_i32_2 = arith.constant 0 : i32
    return %arg0, %c0_i32, %c0_i32_0, %c0_i32_1 : i32, i32, i32, i32
  }
  func.func @transform_1(%arg0: i32, %arg1: i32) -> (i32, i32, i32) {
    %c0_i32 = arith.constant 0 : i32
    %c0_i32_0 = arith.constant 0 : i32
    %c0_i32_1 = arith.constant 0 : i32
    %c0_i32_2 = arith.constant 0 : i32
    return %c0_i32, %c0_i32_0, %c0_i32_1 : i32, i32, i32
  }
  func.func @transform_2(%arg0: i32, %arg1: i32) -> (i32, i32) {
    %c0_i32 = arith.constant 0 : i32
    %c0_i32_0 = arith.constant 0 : i32
    %c0_i32_1 = arith.constant 0 : i32
    return %c0_i32, %c0_i32_0 : i32, i32
  }
  func.func @transform_3(%arg0: i32, %arg1: i32) -> (i32, i32) {
    %c0_i32 = arith.constant 0 : i32
    %c0_i32_0 = arith.constant 0 : i32
    %c0_i32_1 = arith.constant 0 : i32
    return %c0_i32, %c0_i32_0 : i32, i32
  }
  func.func @transform_4(%arg0: i32, %arg1: i32) -> (i32, i32, i32) {
    %c0_i32 = arith.constant 0 : i32
    %c0_i32_0 = arith.constant 0 : i32
    return %arg0, %arg1, %c0_i32 : i32, i32, i32
  }
  func.func @transform_5(%arg0: i32, %arg1: i32) -> (i32, i32, i32) {
    %c0_i32 = arith.constant 0 : i32
    %c0_i32_0 = arith.constant 0 : i32
    %c0_i32_1 = arith.constant 0 : i32
    return %arg0, %c0_i32, %c0_i32_0 : i32, i32, i32
  }
}

module attributes {stable_mosaic.version = 11 : i64} {
  func.func @_conv_kernel(%arg0: i32, %arg1: i32, %arg2: memref<1x16x16x128xf32, #tpu.memory_space<vmem>>, %arg3: memref<1x128x128xbf16, #tpu.memory_space<vmem>>, %arg4: memref<1x128x128xf32, #tpu.memory_space<vmem>>, %arg5: memref<1x8x128xf32, #tpu.memory_space<vmem>>, %arg6: memref<16x16x128xf32, #tpu.memory_space<vmem>>) attributes {dimension_semantics = [#tpu.dimension_semantics<parallel>, #tpu.dimension_semantics<arbitrary>], iteration_bounds = array<i64: 2, 2>, scalar_prefetch = 0 : i64, scratch_operands = 1 : i64, tpu.core_type = #tpu.core_type<tc>, window_params = [{transform_indices = @transform_0, window_bounds = array<i64: 1, 16, 16, 128>}, {pipeline_mode = #tpu.pipeline_mode<synchronous>, transform_indices = @transform_1, window_bounds = array<i64: 1, 128, 128>}, {transform_indices = @transform_2, window_bounds = array<i64: 1, 128, 128>}, {transform_indices = @transform_3, window_bounds = array<i64: 1, 8, 128>}]} {
    %c0_i32 = arith.constant 0 : i32
    %0 = arith.cmpi eq, %arg1, %c0_i32 : i32
    %1 = arith.extui %0 : i1 to i32
    %c0_i32_0 = arith.constant 0 : i32
    %2 = arith.cmpi ne, %1, %c0_i32_0 : i32
    scf.if %2 {
      %c0_23 = arith.constant 0 : index
      %c0_24 = arith.constant 0 : index
      %c0_25 = arith.constant 0 : index
      %c0_26 = arith.constant 0 : index
      %35 = vector.load %arg2[%c0_23, %c0_24, %c0_25, %c0_26] : memref<1x16x16x128xf32, #tpu.memory_space<vmem>>, vector<1x16x16x128xf32>
      %36 = vector.shape_cast %35 : vector<1x16x16x128xf32> to vector<16x16x128xf32>
      %c0_27 = arith.constant 0 : index
      %c0_28 = arith.constant 0 : index
      %c0_29 = arith.constant 0 : index
      %37 = vector.load %arg6[%c0_27, %c0_28, %c0_29] : memref<16x16x128xf32, #tpu.memory_space<vmem>>, vector<16x16x128xf32>
      tpu.vector_store %arg6[%c0_27, %c0_28, %c0_29], %36 {strides = array<i32>} : memref<16x16x128xf32, #tpu.memory_space<vmem>>, vector<16x16x128xf32>,
      %cst_30 = arith.constant 0.000000e+00 : f32
      %38 = vector.broadcast %cst_30 : f32 to vector<8x128xf32>
      %c0_31 = arith.constant 0 : index
      %c0_32 = arith.constant 0 : index
      %c0_33 = arith.constant 0 : index
      %39 = vector.load %arg5[%c0_31, %c0_32, %c0_33] : memref<1x8x128xf32, #tpu.memory_space<vmem>>, vector<1x8x128xf32>
      %40 = vector.shape_cast %39 : vector<1x8x128xf32> to vector<8x128xf32>
      %41 = vector.shape_cast %38 : vector<8x128xf32> to vector<1x8x128xf32>
      tpu.vector_store %arg5[%c0_31, %c0_32, %c0_33], %41 {strides = array<i32>} : memref<1x8x128xf32, #tpu.memory_space<vmem>>, vector<1x8x128xf32>,
    } else {
    }
    %cst = arith.constant 0.000000e+00 : f32
    %3 = vector.broadcast %cst : f32 to vector<128x128xf32>
    %c8_i32 = arith.constant 8 : i32
    %4 = arith.muli %arg1, %c8_i32 : i32
    %5 = tpu.assume_multiple %4, 8 : i32
    %c0_i32_1 = arith.constant 0 : i32
    %6 = arith.addi %5, %c0_i32_1 : i32
    %7 = arith.index_cast %6 : i32 to index
    %c0 = arith.constant 0 : index
    %c0_2 = arith.constant 0 : index
    %8 = vector.load %arg6[%7, %c0, %c0_2] : memref<16x16x128xf32, #tpu.memory_space<vmem>>, vector<8x16x128xf32>
    %9 = vector.shape_cast %8 : vector<8x16x128xf32> to vector<128x128xf32>
    %10 = arith.truncf %9 : vector<128x128xf32> to vector<128x128xbf16>
    %c0_3 = arith.constant 0 : index
    %c0_4 = arith.constant 0 : index
    %c0_5 = arith.constant 0 : index
    %11 = vector.load %arg3[%c0_3, %c0_4, %c0_5] : memref<1x128x128xbf16, #tpu.memory_space<vmem>>, vector<1x128x128xbf16>
    %12 = vector.shape_cast %11 : vector<1x128x128xbf16> to vector<128x128xbf16>
    %cst_6 = arith.constant dense<0.000000e+00> : vector<128x128xf32>
    %13 = tpu.matmul %10, %12, %cst_6 {dimension_numbers = #tpu.dot_dimension_numbers<[1], [0], [0], [1], [0, 0, 1, 1], [], []>} : vector<128x128xbf16>, vector<128x128xbf16>, vector<128x128xf32> -> vector<128x128xf32>
    %14 = arith.addf %3, %13 : vector<128x128xf32>
    %c0_7 = arith.constant 0 : index
    %c0_8 = arith.constant 0 : index
    %c0_9 = arith.constant 0 : index
    %15 = vector.load %arg4[%c0_7, %c0_8, %c0_9] : memref<1x128x128xf32, #tpu.memory_space<vmem>>, vector<1x128x128xf32>
    %16 = vector.shape_cast %15 : vector<1x128x128xf32> to vector<128x128xf32>
    %17 = vector.shape_cast %14 : vector<128x128xf32> to vector<1x128x128xf32>
    tpu.vector_store %arg4[%c0_7, %c0_8, %c0_9], %17 {strides = array<i32>} : memref<1x128x128xf32, #tpu.memory_space<vmem>>, vector<1x128x128xf32>,
    %c0_10 = arith.constant 0 : index
    %c0_11 = arith.constant 0 : index
    %c0_12 = arith.constant 0 : index
    %18 = vector.load %arg5[%c0_10, %c0_11, %c0_12] : memref<1x8x128xf32, #tpu.memory_space<vmem>>, vector<1x1x128xf32>
    %19 = vector.shape_cast %18 : vector<1x1x128xf32> to vector<1x128xf32>
    %cst_13 = arith.constant dense<0.000000e+00> : vector<128xf32>
    %20 = vector.multi_reduction <add>, %14, %cst_13 [0] : vector<128x128xf32> to vector<128xf32>
    %21 = vector.shape_cast %20 : vector<128xf32> to vector<1x128xf32>
    %22 = arith.addf %19, %21 : vector<1x128xf32>
    %c0_14 = arith.constant 0 : index
    %c0_15 = arith.constant 0 : index
    %c0_16 = arith.constant 0 : index
    %23 = vector.load %arg5[%c0_14, %c0_15, %c0_16] : memref<1x8x128xf32, #tpu.memory_space<vmem>>, vector<1x1x128xf32>
    %24 = vector.shape_cast %23 : vector<1x1x128xf32> to vector<1x128xf32>
    %25 = vector.shape_cast %22 : vector<1x128xf32> to vector<1x1x128xf32>
    tpu.vector_store %arg5[%c0_14, %c0_15, %c0_16], %25 {strides = array<i32>} : memref<1x8x128xf32, #tpu.memory_space<vmem>>, vector<1x1x128xf32>,
    %c0_17 = arith.constant 0 : index
    %c1 = arith.constant 1 : index
    %c0_18 = arith.constant 0 : index
    %26 = vector.load %arg5[%c0_17, %c1, %c0_18] : memref<1x8x128xf32, #tpu.memory_space<vmem>>, vector<1x1x128xf32>
    %27 = vector.shape_cast %26 : vector<1x1x128xf32> to vector<1x128xf32>
    %28 = arith.mulf %14, %14 : vector<128x128xf32>
    %cst_19 = arith.constant dense<0.000000e+00> : vector<128xf32>
    %29 = vector.multi_reduction <add>, %28, %cst_19 [0] : vector<128x128xf32> to vector<128xf32>
    %30 = vector.shape_cast %29 : vector<128xf32> to vector<1x128xf32>
    %31 = arith.addf %27, %30 : vector<1x128xf32>
    %c0_20 = arith.constant 0 : index
    %c1_21 = arith.constant 1 : index
    %c0_22 = arith.constant 0 : index
    %32 = vector.load %arg5[%c0_20, %c1_21, %c0_22] : memref<1x8x128xf32, #tpu.memory_space<vmem>>, vector<1x1x128xf32>
    %33 = vector.shape_cast %32 : vector<1x1x128xf32> to vector<1x128xf32>
    %34 = vector.shape_cast %31 : vector<1x128xf32> to vector<1x1x128xf32>
    tpu.vector_store %arg5[%c0_20, %c1_21, %c0_22], %34 {strides = array<i32>} : memref<1x8x128xf32, #tpu.memory_space<vmem>>, vector<1x1x128xf32>,
    return
  }
  func.func @transform_0(%arg0: i32, %arg1: i32) -> (i32, i32, i32, i32) {
    %c0_i32 = arith.constant 0 : i32
    %c0_i32_0 = arith.constant 0 : i32
    %c0_i32_1 = arith.constant 0 : i32
    %c0_i32_2 = arith.constant 0 : i32
    return %arg0, %c0_i32, %c0_i32_0, %c0_i32_1 : i32, i32, i32, i32
  }
  func.func @transform_1(%arg0: i32, %arg1: i32) -> (i32, i32, i32) {
    %c0_i32 = arith.constant 0 : i32
    %c0_i32_0 = arith.constant 0 : i32
    %c0_i32_1 = arith.constant 0 : i32
    %c0_i32_2 = arith.constant 0 : i32
    return %c0_i32, %c0_i32_0, %c0_i32_1 : i32, i32, i32
  }
  func.func @transform_2(%arg0: i32, %arg1: i32) -> (i32, i32, i32) {
    %c0_i32 = arith.constant 0 : i32
    %c0_i32_0 = arith.constant 0 : i32
    return %arg0, %arg1, %c0_i32 : i32, i32, i32
  }
  func.func @transform_3(%arg0: i32, %arg1: i32) -> (i32, i32, i32) {
    %c0_i32 = arith.constant 0 : i32
    %c0_i32_0 = arith.constant 0 : i32
    %c0_i32_1 = arith.constant 0 : i32
    return %arg0, %c0_i32, %c0_i32_0 : i32, i32, i32
  }
}

module attributes {stable_mosaic.version = 11 : i64} {
  func.func @_bn_add_relu_kernel(%arg0: i32, %arg1: memref<512x128xf32, #tpu.memory_space<vmem>>, %arg2: memref<1x128xf32, #tpu.memory_space<vmem>>, %arg3: memref<1x128xf32, #tpu.memory_space<vmem>>, %arg4: memref<512x128xf32, #tpu.memory_space<vmem>>, %arg5: memref<1x128xf32, #tpu.memory_space<vmem>>, %arg6: memref<1x128xf32, #tpu.memory_space<vmem>>, %arg7: memref<512x128xf32, #tpu.memory_space<vmem>>) attributes {dimension_semantics = [#tpu.dimension_semantics<parallel>], iteration_bounds = array<i64: 1>, scalar_prefetch = 0 : i64, scratch_operands = 0 : i64, tpu.core_type = #tpu.core_type<tc>, window_params = [{transform_indices = @transform_0, window_bounds = array<i64: 512, 128>}, {pipeline_mode = #tpu.pipeline_mode<synchronous>, transform_indices = @transform_1, window_bounds = array<i64: 1, 128>}, {pipeline_mode = #tpu.pipeline_mode<synchronous>, transform_indices = @transform_2, window_bounds = array<i64: 1, 128>}, {transform_indices = @transform_3, window_bounds = array<i64: 512, 128>}, {pipeline_mode = #tpu.pipeline_mode<synchronous>, transform_indices = @transform_4, window_bounds = array<i64: 1, 128>}, {pipeline_mode = #tpu.pipeline_mode<synchronous>, transform_indices = @transform_5, window_bounds = array<i64: 1, 128>}, {transform_indices = @transform_6, window_bounds = array<i64: 512, 128>}]} {
    %c0 = arith.constant 0 : index
    %c0_0 = arith.constant 0 : index
    %0 = vector.load %arg1[%c0, %c0_0] : memref<512x128xf32, #tpu.memory_space<vmem>>, vector<512x128xf32>
    %c0_1 = arith.constant 0 : index
    %c0_2 = arith.constant 0 : index
    %1 = vector.load %arg2[%c0_1, %c0_2] : memref<1x128xf32, #tpu.memory_space<vmem>>, vector<1x128xf32>
    %2 = vector.broadcast %1 : vector<1x128xf32> to vector<512x128xf32>
    %3 = arith.mulf %0, %2 : vector<512x128xf32>
    %c0_3 = arith.constant 0 : index
    %c0_4 = arith.constant 0 : index
    %4 = vector.load %arg3[%c0_3, %c0_4] : memref<1x128xf32, #tpu.memory_space<vmem>>, vector<1x128xf32>
    %5 = vector.broadcast %4 : vector<1x128xf32> to vector<512x128xf32>
    %6 = arith.addf %3, %5 : vector<512x128xf32>
    %c0_5 = arith.constant 0 : index
    %c0_6 = arith.constant 0 : index
    %7 = vector.load %arg4[%c0_5, %c0_6] : memref<512x128xf32, #tpu.memory_space<vmem>>, vector<512x128xf32>
    %c0_7 = arith.constant 0 : index
    %c0_8 = arith.constant 0 : index
    %8 = vector.load %arg5[%c0_7, %c0_8] : memref<1x128xf32, #tpu.memory_space<vmem>>, vector<1x128xf32>
    %9 = vector.broadcast %8 : vector<1x128xf32> to vector<512x128xf32>
    %10 = arith.mulf %7, %9 : vector<512x128xf32>
    %11 = arith.addf %6, %10 : vector<512x128xf32>
    %c0_9 = arith.constant 0 : index
    %c0_10 = arith.constant 0 : index
    %12 = vector.load %arg6[%c0_9, %c0_10] : memref<1x128xf32, #tpu.memory_space<vmem>>, vector<1x128xf32>
    %13 = vector.broadcast %12 : vector<1x128xf32> to vector<512x128xf32>
    %14 = arith.addf %11, %13 : vector<512x128xf32>
    %cst = arith.constant 0.000000e+00 : f32
    %15 = vector.broadcast %cst : f32 to vector<512x128xf32>
    %16 = arith.maximumf %14, %15 : vector<512x128xf32>
    %c0_11 = arith.constant 0 : index
    %c0_12 = arith.constant 0 : index
    %17 = vector.load %arg7[%c0_11, %c0_12] : memref<512x128xf32, #tpu.memory_space<vmem>>, vector<512x128xf32>
    tpu.vector_store %arg7[%c0_11, %c0_12], %16 {strides = array<i32>} : memref<512x128xf32, #tpu.memory_space<vmem>>, vector<512x128xf32>,
    return
  }
  func.func @transform_0(%arg0: i32) -> (i32, i32) {
    %c0_i32 = arith.constant 0 : i32
    %c0_i32_0 = arith.constant 0 : i32
    return %arg0, %c0_i32 : i32, i32
  }
  func.func @transform_1(%arg0: i32) -> (i32, i32) {
    %c0_i32 = arith.constant 0 : i32
    %c0_i32_0 = arith.constant 0 : i32
    %c0_i32_1 = arith.constant 0 : i32
    return %c0_i32, %c0_i32_0 : i32, i32
  }
  func.func @transform_2(%arg0: i32) -> (i32, i32) {
    %c0_i32 = arith.constant 0 : i32
    %c0_i32_0 = arith.constant 0 : i32
    %c0_i32_1 = arith.constant 0 : i32
    return %c0_i32, %c0_i32_0 : i32, i32
  }
  func.func @transform_3(%arg0: i32) -> (i32, i32) {
    %c0_i32 = arith.constant 0 : i32
    %c0_i32_0 = arith.constant 0 : i32
    return %arg0, %c0_i32 : i32, i32
  }
  func.func @transform_4(%arg0: i32) -> (i32, i32) {
    %c0_i32 = arith.constant 0 : i32
    %c0_i32_0 = arith.constant 0 : i32
    %c0_i32_1 = arith.constant 0 : i32
    return %c0_i32, %c0_i32_0 : i32, i32
  }
  func.func @transform_5(%arg0: i32) -> (i32, i32) {
    %c0_i32 = arith.constant 0 : i32
    %c0_i32_0 = arith.constant 0 : i32
    %c0_i32_1 = arith.constant 0 : i32
    return %c0_i32, %c0_i32_0 : i32, i32
  }
  func.func @transform_6(%arg0: i32) -> (i32, i32) {
    %c0_i32 = arith.constant 0 : i32
    %c0_i32_0 = arith.constant 0 : i32
    return %arg0, %c0_i32 : i32, i32
  }
}

</mosaic_0001>

<bundles_post_ra>
// kernel: basic_block_forward.6
= control target key start
LH: loop header
LB: loop body
LE: loop exit
PB: predicated region body
PF: predicated region fallthrough
CT: control target
= control target key end

     0   :  { %s860_s12 = smov 0   ;;  %s862_s13 = smov 0   ;;  %s1020_s0 = inlined_call_operand.vmem [shape: f32[2,16,16,128], index: 0, kind: input, shape index: {}]   ;;  %s1021_s1 = inlined_call_operand.vmem [shape: bf16[1,128,128], index: 1, kind: input, shape index: {}]   ;;  %s1022_s2 = inlined_call_operand.vmem [shape: f32[2,256,128], index: 2, kind: output, shape index: {0}]   ;;  %s1023_s3 = inlined_call_operand.vmem [shape: f32[2,8,128], index: 3, kind: output, shape index: {1}]  }
   0x1   :  { %s864_s14 = smov 0   ;;  %s866_s15 = smov 0  }
   0x2   :  { %s868_s16 = smov 0  }
   0x3 LB: > { %s23_s17 = sadd.s32 1, %s829_s14  ;;  %s26_s18 = sadd.s32 1, %s833_s15  ;;  %s837_s16 = sphi %s868_s16, %s14_s16   ;;  %s833_s15 = sphi %s866_s15, %s1027_s15   ;;  %s829_s14 = sphi %s864_s14, %s1026_s14   ;;  %s825_s13 = sphi %s862_s13, %s1025_s13   ;;  %s821_s12 = sphi %s860_s12, %s1024_s12  }
   0x4   : > { %p24_p0 = scmp.ge.s32.totalorder %s23_s17, 2  ;;  %p664_p1 = scmp.ge.s32.totalorder %s837_s16, 1 }
   0x5   : > { %p154_p2 = scmp.lt.s32.totalorder %s837_s16, 5 }
   0x6   : > { %s1029_s17 = smov (%p24_p0, %s23_s17), 0  ;;  %s1031_s18 = smov (!%p24_p0, %s26_s18), %s833_s15 }
   0x7   : > { %p155_p3 = pnand %p664_p1, %p154_p2  ;;  %p28_p4 = scmp.ge.s32.totalorder %s1031_s18, 2 }
   0x8   : > { %p186_p5 = scmp.lt.s32.totalorder (!%p155_p3), %s825_s13, 1  ;;  %s667_s19 = sshll.u32 (!%p155_p3), %s821_s12, 4 }
   0x9   : > { %s1033_s18 = smov (%p28_p4, %s1031_s18), 0  ;;  %158 = sbr.rel (%p155_p3) target bundleno = 332 (0x14c), region = 28 }
   0xa   : > { %p194_p6 = scmp.lt.s32.totalorder (!%p155_p3), %s667_s19, 31  ;;  %p671_p7 = scmp.ne.s32.totalorder (!%p155_p3), %s821_s12, 0 }
  0x10   : > { %s1035_s13 = smov (!%p186_p5, %s825_s13), 1  ;;  %s1037_s19 = smov (!%p194_p6, %s667_s19), 31 }
  0x11   : > { %s684_s20 = sshll.u32 %s1035_s13, 8  ;;  %s668_s21 = sshll.u32 %s1035_s13, 5  ;;  %v839_v6 = vmov (!%p671_p7), 0.0  }
  0x12   : > { %s896_s24 = scalar_lea.vmem %s1020_s0, %s684_s20  ;;  %s197_s25 = sadd.s32 %s668_s21, %s1037_s19 }
  0x13   : > { %s669_s26 = sshll.u32 %s197_s25, 3  ;;  %s670_s27 = sshll.u32 %s1035_s13, 3  ;;  %v210_v0 = vld [vmem:[%s896_s24] sm:$0xff] (!%p671_p7)  ;;  %v211_v1 = vld [vmem:[%s896_s24 + $0x8] sm:$0xff] (!%p671_p7)  ;;  %v212_v2 = vld [vmem:[%s896_s24 + $0x10] sm:$0xff] (!%p671_p7) }
  0x14   : > { %s901_s30 = scalar_lea.vmem %s1022_s2, %s669_s26  ;;  %s906_s6 = scalar_lea.vmem %s1023_s3, %s670_s27  ;;  %242 = vst [vmem:[#allocation2] sm:$0xff] (!%p671_p7), %v210_v0  ;;  %243 = vst [vmem:[#allocation2 + $0x8] sm:$0xff] (!%p671_p7), %v211_v1  ;;  %v213_v3 = vld [vmem:[%s896_s24 + $0x18] sm:$0xff] (!%p671_p7)  ;;  %v214_v4 = vld [vmem:[%s896_s24 + $0x20] sm:$0xff] (!%p671_p7) }
  0x15   : > { %209 = sbr.rel (%p671_p7) target bundleno = 37 (0x25), region = 32  ;;  %244 = vst [vmem:[#allocation2 + $0x10] sm:$0xff] (!%p671_p7), %v212_v2  ;;  %v215_v5 = vld [vmem:[%s896_s24 + $0x28] sm:$0xff] (!%p671_p7)  ;;  %274 = vst [vmem:[%s906_s6] sm:$0xff] (!%p671_p7), %v839_v6  ;;  %v216_v7 = vld [vmem:[%s896_s24 + $0x30] sm:$0xff] (!%p671_p7) }
  0x16   : > { %245 = vst [vmem:[#allocation2 + $0x18] sm:$0xff] (!%p671_p7), %v213_v3  ;;  %246 = vst [vmem:[#allocation2 + $0x20] sm:$0xff] (!%p671_p7), %v214_v4  ;;  %v217_v8 = vld [vmem:[%s896_s24 + $0x38] sm:$0xff] (!%p671_p7)  ;;  %v218_v9 = vld [vmem:[%s896_s24 + $0x40] sm:$0xff] (!%p671_p7) }
  0x17   : > { %247 = vst [vmem:[#allocation2 + $0x28] sm:$0xff] (!%p671_p7), %v215_v5  ;;  %248 = vst [vmem:[#allocation2 + $0x30] sm:$0xff] (!%p671_p7), %v216_v7  ;;  %v219_v10 = vld [vmem:[%s896_s24 + $0x48] sm:$0xff] (!%p671_p7)  ;;  %v220_v11 = vld [vmem:[%s896_s24 + $0x50] sm:$0xff] (!%p671_p7) }
  0x18   : > { %249 = vst [vmem:[#allocation2 + $0x38] sm:$0xff] (!%p671_p7), %v217_v8  ;;  %250 = vst [vmem:[#allocation2 + $0x40] sm:$0xff] (!%p671_p7), %v218_v9  ;;  %v221_v12 = vld [vmem:[%s896_s24 + $0x58] sm:$0xff] (!%p671_p7)  ;;  %v222_v13 = vld [vmem:[%s896_s24 + $0x60] sm:$0xff] (!%p671_p7) }
  0x19   : > { %251 = vst [vmem:[#allocation2 + $0x48] sm:$0xff] (!%p671_p7), %v219_v10  ;;  %252 = vst [vmem:[#allocation2 + $0x50] sm:$0xff] (!%p671_p7), %v220_v11  ;;  %v223_v14 = vld [vmem:[%s896_s24 + $0x68] sm:$0xff] (!%p671_p7)  ;;  %v224_v15 = vld [vmem:[%s896_s24 + $0x70] sm:$0xff] (!%p671_p7) }
  0x1a   : > { %253 = vst [vmem:[#allocation2 + $0x58] sm:$0xff] (!%p671_p7), %v221_v12  ;;  %254 = vst [vmem:[#allocation2 + $0x60] sm:$0xff] (!%p671_p7), %v222_v13  ;;  %v225_v16 = vld [vmem:[%s896_s24 + $0x78] sm:$0xff] (!%p671_p7)  ;;  %v226_v17 = vld [vmem:[%s896_s24 + $0x80] sm:$0xff] (!%p671_p7) }
  0x1b   : > { %255 = vst [vmem:[#allocation2 + $0x68] sm:$0xff] (!%p671_p7), %v223_v14  ;;  %256 = vst [vmem:[#allocation2 + $0x70] sm:$0xff] (!%p671_p7), %v224_v15  ;;  %v227_v18 = vld [vmem:[%s896_s24 + $0x88] sm:$0xff] (!%p671_p7)  ;;  %v228_v19 = vld [vmem:[%s896_s24 + $0x90] sm:$0xff] (!%p671_p7) }
  0x1c   : > { %257 = vst [vmem:[#allocation2 + $0x78] sm:$0xff] %v225_v16  ;;  %258 = vst [vmem:[#allocation2 + $0x80] sm:$0xff] %v226_v17  ;;  %v229_v20 = vld [vmem:[%s896_s24 + $0x98] sm:$0xff]  ;;  %v230_v21 = vld [vmem:[%s896_s24 + $0xa0] sm:$0xff] }
  0x1d   : > { %259 = vst [vmem:[#allocation2 + $0x88] sm:$0xff] %v227_v18  ;;  %260 = vst [vmem:[#allocation2 + $0x90] sm:$0xff] %v228_v19  ;;  %v231_v22 = vld [vmem:[%s896_s24 + $0xa8] sm:$0xff]  ;;  %v232_v23 = vld [vmem:[%s896_s24 + $0xb0] sm:$0xff] }
  0x1e   : > { %261 = vst [vmem:[#allocation2 + $0x98] sm:$0xff] %v229_v20  ;;  %262 = vst [vmem:[#allocation2 + $0xa0] sm:$0xff] %v230_v21  ;;  %v233_v24 = vld [vmem:[%s896_s24 + $0xb8] sm:$0xff]  ;;  %v234_v25 = vld [vmem:[%s896_s24 + $0xc0] sm:$0xff] }
  0x1f   : > { %263 = vst [vmem:[#allocation2 + $0xa8] sm:$0xff] %v231_v22  ;;  %264 = vst [vmem:[#allocation2 + $0xb0] sm:$0xff] %v232_v23  ;;  %v235_v26 = vld [vmem:[%s896_s24 + $0xc8] sm:$0xff]  ;;  %v236_v27 = vld [vmem:[%s896_s24 + $0xd0] sm:$0xff] }
  0x20   : > { %265 = vst [vmem:[#allocation2 + $0xb8] sm:$0xff] %v233_v24  ;;  %266 = vst [vmem:[#allocation2 + $0xc0] sm:$0xff] %v234_v25  ;;  %v237_v28 = vld [vmem:[%s896_s24 + $0xd8] sm:$0xff]  ;;  %v238_v29 = vld [vmem:[%s896_s24 + $0xe0] sm:$0xff] }
  0x21   : > { %267 = vst [vmem:[#allocation2 + $0xc8] sm:$0xff] %v235_v26  ;;  %268 = vst [vmem:[#allocation2 + $0xd0] sm:$0xff] %v236_v27  ;;  %v239_v30 = vld [vmem:[%s896_s24 + $0xe8] sm:$0xff]  ;;  %v240_v31 = vld [vmem:[%s896_s24 + $0xf0] sm:$0xff] }
  0x22   : > { %269 = vst [vmem:[#allocation2 + $0xd8] sm:$0xff] %v237_v28  ;;  %270 = vst [vmem:[#allocation2 + $0xe0] sm:$0xff] %v238_v29  ;;  %v241_v32 = vld [vmem:[%s896_s24 + $0xf8] sm:$0xff] }
  0x23   : > { %271 = vst [vmem:[#allocation2 + $0xe8] sm:$0xff] %v239_v30  ;;  %272 = vst [vmem:[#allocation2 + $0xf0] sm:$0xff] %v240_v31 }
  0x24   : > { %273 = vst [vmem:[#allocation2 + $0xf8] sm:$0xff] %v241_v32 }
  0x25 PF: > { %v791_v33 = vld [vmem:[%s1021_s1] sm:$0xff]   ;;  %v792_v34 = vld [vmem:[%s1021_s1 + $0x8] sm:$0xff]   ;;  %s685_s11 = sshll.u32 %s821_s12, 7  ;;  %v793_v35 = vld [vmem:[%s1021_s1 + $0x10] sm:$0xff]  }
  0x26   : > { %702 = vmatprep.subr.bf16.mxu0 %v791_v33  ;;  %734 = vmatprep.subr.bf16.mxu1 %v791_v33  ;;  %v794_v36 = vld [vmem:[%s1021_s1 + $0x18] sm:$0xff]   ;;  %s955_s22 = scalar_lea.vmem [#allocation2], %s685_s11  ;;  %v795_v42 = vld [vmem:[%s1021_s1 + $0x20] sm:$0xff]   ;;  %v796_v44 = vld [vmem:[%s1021_s1 + $0x28] sm:$0xff]  }
  0x27   : > { %703 = vmatpush3.bf16.msra.mxu0 %v791_v33  ;;  %742 = vmatpush3.bf16.msra.mxu1 %v791_v33  ;;  %v797_v45 = vld [vmem:[%s1021_s1 + $0x30] sm:$0xff]   ;;  %v798_v46 = vld [vmem:[%s1021_s1 + $0x38] sm:$0xff]  }
  0x28   : > { %704 = vmatprep.subr.bf16.mxu0 %v792_v34  ;;  %735 = vmatprep.subr.bf16.mxu1 %v792_v34 }
  0x2b   : > { %705 = vmatpush3.bf16.msra.mxu0 %v792_v34  ;;  %743 = vmatpush3.bf16.msra.mxu1 %v792_v34  ;;  %v278_v37 = vld [vmem:[%s955_s22] sm:$0xff]  ;;  %v279_v38 = vld [vmem:[%s955_s22 + $0x8] sm:$0xff]  ;;  %v280_v47 = vld [vmem:[%s955_s22 + $0x10] sm:$0xff] }
  0x2c   : > { %706 = vmatprep.subr.bf16.mxu0 %v793_v35  ;;  %736 = vmatprep.subr.bf16.mxu1 %v793_v35  ;;  %v294_v39 = vpack.c.bf16 %v279_v38, %v278_v37  ;;  %v286_v40 = vld [vmem:[%s955_s22 + $0x40] sm:$0xff]  ;;  %v287_v41 = vld [vmem:[%s955_s22 + $0x48] sm:$0xff]  ;;  %v281_v48 = vld [vmem:[%s955_s22 + $0x18] sm:$0xff] }
  0x2d   : > { %v298_v43 = vpack.c.bf16 %v287_v41, %v286_v40  ;;  %v282_v49 = vld [vmem:[%s955_s22 + $0x20] sm:$0xff]  ;;  %v288_v50 = vld [vmem:[%s955_s22 + $0x50] sm:$0xff]  ;;  %v289_v51 = vld [vmem:[%s955_s22 + $0x58] sm:$0xff]  ;;  %v295_v55 = vpack.c.bf16 %v281_v48, %v280_v47 }
  0x2e   : > { %718 = vmatprep.mubr.bf16.mxu0 %v294_v39  ;;  %v283_v52 = vld [vmem:[%s955_s22 + $0x28] sm:$0xff]  ;;  %v290_v53 = vld [vmem:[%s955_s22 + $0x60] sm:$0xff]  ;;  %v299_v56 = vpack.c.bf16 %v289_v51, %v288_v50  ;;  %v284_v59 = vld [vmem:[%s955_s22 + $0x30] sm:$0xff] }
  0x2f   : > { %707 = vmatpush3.bf16.msra.mxu0 %v793_v35  ;;  %744 = vmatpush3.bf16.msra.mxu1 %v793_v35  ;;  %v291_v54 = vld [vmem:[%s955_s22 + $0x68] sm:$0xff]  ;;  %v296_v57 = vpack.c.bf16 %v283_v52, %v282_v49  ;;  %v285_v60 = vld [vmem:[%s955_s22 + $0x38] sm:$0xff]  ;;  %v292_v61 = vld [vmem:[%s955_s22 + $0x70] sm:$0xff] }
  0x30   : > { %708 = vmatprep.subr.bf16.mxu0 %v794_v36  ;;  %737 = vmatprep.subr.bf16.mxu1 %v794_v36  ;;  %v300_v58 = vpack.c.bf16 %v291_v54, %v290_v53  ;;  %v293_v62 = vld [vmem:[%s955_s22 + $0x78] sm:$0xff]  ;;  %v297_v63 = vpack.c.bf16 %v285_v60, %v284_v59 }
  0x31   : > { %726 = vmatprep.mubr.bf16.mxu1 %v298_v43  ;;  %v301_v0 = vpack.c.bf16 %v293_v62, %v292_v61 }
  0x33   : > { %709 = vmatpush3.bf16.msra.mxu0 %v794_v36  ;;  %745 = vmatpush3.bf16.msra.mxu1 %v794_v36 }
  0x34   : > { %710 = vmatprep.subr.bf16.mxu0 %v795_v42  ;;  %738 = vmatprep.subr.bf16.mxu1 %v795_v42 }
  0x37   : > { %711 = vmatpush3.bf16.msra.mxu0 %v795_v42  ;;  %746 = vmatpush3.bf16.msra.mxu1 %v795_v42 }
  0x38   : > { %712 = vmatprep.subr.bf16.mxu0 %v796_v44  ;;  %739 = vmatprep.subr.bf16.mxu1 %v796_v44 }
  0x3b   : > { %713 = vmatpush3.bf16.msra.mxu0 %v796_v44  ;;  %747 = vmatpush3.bf16.msra.mxu1 %v796_v44 }
  0x3c   : > { %714 = vmatprep.subr.bf16.mxu0 %v797_v45  ;;  %740 = vmatprep.subr.bf16.mxu1 %v797_v45 }
  0x3f   : > { %715 = vmatpush3.bf16.msra.mxu0 %v797_v45  ;;  %748 = vmatpush3.bf16.msra.mxu1 %v797_v45 }
  0x40   : > { %716 = vmatprep.subr.bf16.mxu0 %v798_v46  ;;  %741 = vmatprep.subr.bf16.mxu1 %v798_v46 }
  0x43   : > { %717 = vmatpush3.bf16.msra.mxu0 %v798_v46  ;;  %749 = vmatpush3.bf16.msra.mxu1 %v798_v46 }
  0x46   : > { %719 = vmatmul.mubr.bf16.vlgmr.msra.gmra.mrb[0].mxu0 %v295_v55  ;;  %727 = vmatmul.mubr.bf16.vlgmr.msra.gmra.mrb[0].mxu1 %v299_v56 }
  0x47   : > { %722 = vmatprep.mubr.bf16.mxu0 %v296_v57  ;;  %730 = vmatprep.mubr.bf16.mxu1 %v300_v58 }
  0x4e   : > { %723 = vmatmul.mubr.bf16.gmra.mrb[4].mxu0 %v297_v63  ;;  %731 = vmatmul.mubr.bf16.gmra.mrb[4].mxu1 %v301_v0 }
 0x119   : > { %v720_v1 = vpop.f32.mrb[0].mxu0  ;;  %v728_v2 = vpop.f32.mrb[0].mxu1 }
 0x11a   : > { %465 = vst [vmem:[%s901_s30 + $0x10] sm:$0xff] %v720_v1  ;;  %v400_v3 = vpop.f32.mrb[1].mxu0  ;;  %473 = vst [vmem:[%s901_s30 + $0x50] sm:$0xff] %v728_v2  ;;  %v432_v4 = vpop.f32.mrb[1].mxu1  ;;  %v506_v12 = vmul.f32 %v720_v1, %v720_v1  ;;  %v514_v44 = vmul.f32 %v728_v2, %v728_v2 }
 0x11b   : > { %463 = vst [vmem:[%s901_s30] sm:$0xff] %v400_v3  ;;  %v721_v5 = vpop.f32.mrb[2].mxu0  ;;  %471 = vst [vmem:[%s901_s30 + $0x40] sm:$0xff] %v432_v4  ;;  %v729_v6 = vpop.f32.mrb[2].mxu1  ;;  %v504_v9 = vmul.f32 %v400_v3, %v400_v3  ;;  %v512_v38 = vmul.f32 %v432_v4, %v432_v4 }
 0x11c   : > { %466 = vst [vmem:[%s901_s30 + $0x18] sm:$0xff] %v721_v5  ;;  %v403_v7 = vpop.f32.mrb[3].mxu0  ;;  %474 = vst [vmem:[%s901_s30 + $0x58] sm:$0xff] %v729_v6  ;;  %v435_v8 = vpop.f32.mrb[3].mxu1  ;;  %v507_v15 = vmul.f32 %v721_v5, %v721_v5  ;;  %v515_v47 = vmul.f32 %v729_v6, %v729_v6 }
 0x11d   : > { %464 = vst [vmem:[%s901_s30 + $0x8] sm:$0xff] %v403_v7  ;;  %v480_v10 = vadd.f32 %v403_v7, %v400_v3  ;;  %v505_v11 = vmul.f32 %v403_v7, %v403_v7  ;;  %472 = vst [vmem:[%s901_s30 + $0x48] sm:$0xff] %v435_v8  ;;  %v513_v43 = vmul.f32 %v435_v8, %v435_v8 }
 0x11f   : > { %v481_v13 = vadd.f32 %v720_v1, %v480_v10  ;;  %v520_v14 = vadd.f32 %v505_v11, %v504_v9  ;;  %v503_v11 = vld [vmem:[%s906_s6 + $0x1] sm:$0x1] }
 0x121   : > { %v521_v16 = vadd.f32 %v520_v14, %v506_v12  ;;  %v724_v17 = vpop.f32.mrb[4].mxu0  ;;  %v482_v18 = vadd.f32 %v721_v5, %v481_v13  ;;  %v732_v19 = vpop.f32.mrb[4].mxu1 }
 0x122   : > { %469 = vst [vmem:[%s901_s30 + $0x30] sm:$0xff] %v724_v17  ;;  %v416_v20 = vpop.f32.mrb[5].mxu0  ;;  %477 = vst [vmem:[%s901_s30 + $0x70] sm:$0xff] %v732_v19  ;;  %v448_v21 = vpop.f32.mrb[5].mxu1  ;;  %v510_v32 = vmul.f32 %v724_v17, %v724_v17  ;;  %v518_v56 = vmul.f32 %v732_v19, %v732_v19 }
 0x123   : > { %467 = vst [vmem:[%s901_s30 + $0x20] sm:$0xff] %v416_v20  ;;  %v483_v22 = vadd.f32 %v482_v18, %v416_v20  ;;  %v508_v23 = vmul.f32 %v416_v20, %v416_v20  ;;  %v522_v24 = vadd.f32 %v521_v16, %v507_v15  ;;  %v725_v25 = vpop.f32.mrb[6].mxu0  ;;  %475 = vst [vmem:[%s901_s30 + $0x60] sm:$0xff] %v448_v21  ;;  %v733_v26 = vpop.f32.mrb[6].mxu1 }
 0x124   : > { %470 = vst [vmem:[%s901_s30 + $0x38] sm:$0xff] %v725_v25  ;;  %v419_v27 = vpop.f32.mrb[7].mxu0  ;;  %478 = vst [vmem:[%s901_s30 + $0x78] sm:$0xff] %v733_v26  ;;  %v451_v28 = vpop.f32.mrb[7].mxu1  ;;  %v511_v35 = vmul.f32 %v725_v25, %v725_v25  ;;  %v516_v50 = vmul.f32 %v448_v21, %v448_v21  ;;  %v519_v59 = vmul.f32 %v733_v26, %v733_v26 }
 0x125   : > { %v523_v29 = vadd.f32 %v522_v24, %v508_v23  ;;  %468 = vst [vmem:[%s901_s30 + $0x28] sm:$0xff] %v419_v27  ;;  %v484_v30 = vadd.f32 %v483_v22, %v419_v27  ;;  %v509_v31 = vmul.f32 %v419_v27, %v419_v27  ;;  %476 = vst [vmem:[%s901_s30 + $0x68] sm:$0xff] %v451_v28 }
 0x126   : > { %v517_v55 = vmul.f32 %v451_v28, %v451_v28 }
 0x127   : > { %v485_v33 = vadd.f32 %v724_v17, %v484_v30  ;;  %v524_v34 = vadd.f32 %v523_v29, %v509_v31 }
 0x129   : > { %v525_v36 = vadd.f32 %v524_v34, %v510_v32  ;;  %v486_v37 = vadd.f32 %v725_v25, %v485_v33 }
 0x12b   : > { %v487_v39 = vadd.f32 %v486_v37, %v432_v4  ;;  %v526_v40 = vadd.f32 %v525_v36, %v511_v35 }
 0x12d   : > { %v527_v41 = vadd.f32 %v526_v40, %v512_v38  ;;  %v488_v42 = vadd.f32 %v487_v39, %v435_v8  ;;  %v479_v8 = vld [vmem:[%s906_s6] sm:$0x1] }
 0x12f   : > { %v489_v45 = vadd.f32 %v728_v2, %v488_v42  ;;  %v528_v46 = vadd.f32 %v527_v41, %v513_v43 }
 0x131   : > { %v529_v48 = vadd.f32 %v528_v46, %v514_v44  ;;  %v490_v49 = vadd.f32 %v729_v6, %v489_v45 }
 0x133   : > { %v491_v51 = vadd.f32 %v490_v49, %v448_v21  ;;  %v530_v52 = vadd.f32 %v529_v48, %v515_v47 }
 0x135   : > { %v531_v53 = vadd.f32 %v530_v52, %v516_v50  ;;  %v492_v54 = vadd.f32 %v491_v51, %v451_v28 }
 0x137   : > { %v493_v57 = vadd.f32 %v732_v19, %v492_v54  ;;  %v532_v58 = vadd.f32 %v531_v53, %v517_v55 }
 0x139   : > { %v494_v60 = vadd.f32 %v733_v26, %v493_v57  ;;  %v533_v61 = vadd.f32 %v532_v58, %v518_v56 }
 0x13b   : > { %v495_v62 = vrot.slane %v494_v60, 4  ;;  %v534_v63 = vadd.f32 %v533_v61, %v519_v59 }
 0x13d   : > { %v496_v0 = vadd.f32 %v495_v62, %v494_v60  ;;  %v535_v1 = vrot.slane %v534_v63, 4 }
 0x13f   : > { %v497_v2 = vrot.slane %v496_v0, 2  ;;  %v536_v3 = vadd.f32 %v535_v1, %v534_v63 }
 0x141   : > { %v498_v4 = vadd.f32 %v497_v2, %v496_v0  ;;  %v537_v5 = vrot.slane %v536_v3, 2 }
 0x143   : > { %v499_v6 = vrot.slane %v498_v4, 1  ;;  %v538_v7 = vadd.f32 %v537_v5, %v536_v3 }
 0x145   : > { %v500_v9 = vadd.f32 %v499_v6, %v498_v4  ;;  %v539_v10 = vrot.slane %v538_v7, 1 }
 0x147   : > { %v501_v12 = vadd.f32 %v500_v9, %v479_v8  ;;  %v540_v13 = vadd.f32 %v539_v10, %v538_v7 }
 0x149   : > { %502 = vst [vmem:[%s906_s6] sm:$0x1] %v501_v12  ;;  %v541_v14 = vadd.f32 %v540_v13, %v503_v11 }
 0x14b   : > { %542 = vst [vmem:[%s906_s6 + $0x1] sm:$0x1] %v541_v14 }
 0x14c PF: > { %s14_s16 = sadd.s32 1, %s837_s16   ;;  %s1024_s12 = smov %s829_s14 }
 0x14d   : > { %p11_p8 = scmp.ge.s32.totalorder %s14_s16, 6   ;;  %s1025_s13 = smov %s833_s15 }
 0x14e   : > { %s1026_s14 = smov %s1029_s17  ;;  %s1027_s15 = smov %s1033_s18 }
 0x14f   :  { %13 = sbr.rel (!%p11_p8) target bundleno = 3 (0x3), region = 75 }

// kernel: basic_block_forward.7
= control target key start
LH: loop header
LB: loop body
LE: loop exit
PB: predicated region body
PF: predicated region fallthrough
CT: control target
= control target key end

     0   :  { %s1510_s0 = inlined_call_operand.vmem [shape: f32[512,128], index: 0, kind: input, shape index: {}]   ;;  %s1511_s1 = inlined_call_operand.vmem [shape: f32[1,128], index: 1, kind: input, shape index: {}]   ;;  %s1512_s2 = inlined_call_operand.vmem [shape: f32[1,128], index: 2, kind: input, shape index: {}]   ;;  %s1513_s3 = inlined_call_operand.vmem [shape: f32[512,128], index: 3, kind: input, shape index: {}]   ;;  %s1514_s4 = inlined_call_operand.vmem [shape: f32[1,128], index: 4, kind: input, shape index: {}]   ;;  %s1515_s5 = inlined_call_operand.vmem [shape: f32[1,128], index: 5, kind: input, shape index: {}]   ;;  %s1516_s6 = inlined_call_operand.vmem [shape: f32[512,128], index: 6, kind: output, shape index: {}]  }
   0x1   :  { %v23_v0 = vld [vmem:[%s1510_s0] sm:$0xff]  ;;  %v24_v8 = vld [vmem:[%s1510_s0 + $0x8] sm:$0xff]  ;;  %v25_v10 = vld [vmem:[%s1510_s0 + $0x10] sm:$0xff] }
   0x2   :  { %v680_v1 = vld [vmem:[%s1511_s1] ss:$0 sm:$0xff]  ;;  %v230_v9 = vld [vmem:[%s1513_s3 + $0x8] sm:$0xff]  ;;  %v231_v15 = vld [vmem:[%s1513_s3 + $0x10] sm:$0xff] }
   0x3   :  { %v685_v2 = vld [vmem:[%s1512_s2] ss:$0 sm:$0xff]  ;;  %v94_v3 = vmul.f32 %v680_v1, %v23_v0  ;;  %v95_v12 = vmul.f32 %v680_v1, %v24_v8  ;;  %v96_v14 = vmul.f32 %v680_v1, %v25_v10  ;;  %v26_v16 = vld [vmem:[%s1510_s0 + $0x18] sm:$0xff]  ;;  %v28_v23 = vld [vmem:[%s1510_s0 + $0x28] sm:$0xff] }
   0x4   :  { %v229_v4 = vld [vmem:[%s1513_s3] sm:$0xff]  ;;  %v232_v17 = vld [vmem:[%s1513_s3 + $0x18] sm:$0xff]  ;;  %v97_v19 = vmul.f32 %v680_v1, %v26_v16  ;;  %v234_v28 = vld [vmem:[%s1513_s3 + $0x28] sm:$0xff]  ;;  %v99_v33 = vmul.f32 %v680_v1, %v28_v23 }
   0x5   :  { %v694_v5 = vld [vmem:[%s1514_s4] ss:$0 sm:$0xff]  ;;  %v165_v11 = vadd.f32 %v685_v2, %v94_v3  ;;  %v166_v25 = vadd.f32 %v685_v2, %v95_v12  ;;  %v167_v26 = vadd.f32 %v685_v2, %v96_v14  ;;  %v29_v29 = vld [vmem:[%s1510_s0 + $0x30] sm:$0xff]  ;;  %v30_v39 = vld [vmem:[%s1510_s0 + $0x38] sm:$0xff] }
   0x6   :  { %v300_v6 = vmul.f32 %v694_v5, %v229_v4  ;;  %v700_v7 = vld [vmem:[%s1515_s5] ss:$0 sm:$0xff]  ;;  %v301_v13 = vmul.f32 %v694_v5, %v230_v9  ;;  %v302_v18 = vmul.f32 %v694_v5, %v231_v15  ;;  %v303_v20 = vmul.f32 %v694_v5, %v232_v17  ;;  %v235_v30 = vld [vmem:[%s1513_s3 + $0x30] sm:$0xff]  ;;  %v236_v44 = vld [vmem:[%s1513_s3 + $0x38] sm:$0xff] }
   0x7   :  { %v27_v21 = vld [vmem:[%s1510_s0 + $0x20] sm:$0xff]  ;;  %v168_v31 = vadd.f32 %v685_v2, %v97_v19  ;;  %v305_v34 = vmul.f32 %v694_v5, %v234_v28  ;;  %v170_v41 = vadd.f32 %v685_v2, %v99_v33  ;;  %v100_v42 = vmul.f32 %v680_v1, %v29_v29  ;;  %v32_v55 = vld [vmem:[%s1510_s0 + $0x48] sm:$0xff]  ;;  %v33_v3 = vld [vmem:[%s1510_s0 + $0x50] sm:$0xff] }
   0x8   :  { %v233_v22 = vld [vmem:[%s1513_s3 + $0x20] sm:$0xff]  ;;  %v364_v24 = vadd.f32 %v300_v6, %v165_v11  ;;  %v98_v27 = vmul.f32 %v680_v1, %v27_v21  ;;  %v365_v36 = vadd.f32 %v301_v13, %v166_v25  ;;  %v366_v37 = vadd.f32 %v302_v18, %v167_v26  ;;  %v238_v60 = vld [vmem:[%s1513_s3 + $0x48] sm:$0xff]  ;;  %v239_v4 = vld [vmem:[%s1513_s3 + $0x50] sm:$0xff] }
   0x9   :  { %v304_v32 = vmul.f32 %v694_v5, %v233_v22  ;;  %v367_v40 = vadd.f32 %v303_v20, %v168_v31  ;;  %v306_v43 = vmul.f32 %v694_v5, %v235_v30  ;;  %v369_v50 = vadd.f32 %v305_v34, %v170_v41  ;;  %v31_v53 = vld [vmem:[%s1510_s0 + $0x40] sm:$0xff]  ;;  %v34_v11 = vld [vmem:[%s1510_s0 + $0x58] sm:$0xff]  ;;  %v36_v23 = vld [vmem:[%s1510_s0 + $0x68] sm:$0xff] }
   0xa   :  { %v435_v35 = vadd.f32 %v700_v7, %v364_v24  ;;  %v169_v38 = vadd.f32 %v685_v2, %v98_v27  ;;  %v436_v46 = vadd.f32 %v700_v7, %v365_v36  ;;  %v437_v47 = vadd.f32 %v700_v7, %v366_v37  ;;  %v237_v54 = vld [vmem:[%s1513_s3 + $0x40] sm:$0xff]  ;;  %v240_v12 = vld [vmem:[%s1513_s3 + $0x58] sm:$0xff]  ;;  %v37_v33 = vld [vmem:[%s1510_s0 + $0x70] sm:$0xff] }
   0xb   :  { %v438_v49 = vadd.f32 %v700_v7, %v367_v40  ;;  %v171_v51 = vadd.f32 %v685_v2, %v100_v42  ;;  %v101_v52 = vmul.f32 %v680_v1, %v30_v39  ;;  %v307_v59 = vmul.f32 %v694_v5, %v236_v44  ;;  %v35_v17 = vld [vmem:[%s1510_s0 + $0x60] sm:$0xff]  ;;  %v243_v42 = vld [vmem:[%s1513_s3 + $0x70] sm:$0xff] }
   0xc   :  { %v499_v45 = vmax.f32 %v435_v35, 0.0  ;;  %v368_v48 = vadd.f32 %v304_v32, %v169_v38  ;;  %v500_v56 = vmax.f32 %v436_v46, 0.0  ;;  %v501_v57 = vmax.f32 %v437_v47, 0.0  ;;  %v241_v22 = vld [vmem:[%s1513_s3 + $0x60] sm:$0xff]  ;;  %v242_v32 = vld [vmem:[%s1513_s3 + $0x68] sm:$0xff]  ;;  %v38_v47 = vld [vmem:[%s1510_s0 + $0x78] sm:$0xff] }
   0xd   :  { %v502_v61 = vmax.f32 %v438_v49, 0.0  ;;  %v440_v62 = vadd.f32 %v700_v7, %v369_v50  ;;  %v370_v63 = vadd.f32 %v306_v43, %v171_v51  ;;  %v172_v0 = vadd.f32 %v685_v2, %v101_v52 }
   0xe   :  { %563 = vst [vmem:[%s1516_s6] sm:$0xff] %v499_v45  ;;  %v439_v58 = vadd.f32 %v700_v7, %v368_v48  ;;  %564 = vst [vmem:[%s1516_s6 + $0x8] sm:$0xff] %v500_v56  ;;  %v102_v8 = vmul.f32 %v680_v1, %v31_v53  ;;  %v308_v9 = vmul.f32 %v694_v5, %v237_v54  ;;  %v244_v48 = vld [vmem:[%s1513_s3 + $0x78] sm:$0xff]  ;;  %v39_v53 = vld [vmem:[%s1510_s0 + $0x80] sm:$0xff] }
   0xf   :  { %565 = vst [vmem:[%s1516_s6 + $0x10] sm:$0xff] %v501_v57  ;;  %v103_v10 = vmul.f32 %v680_v1, %v32_v55  ;;  %566 = vst [vmem:[%s1516_s6 + $0x18] sm:$0xff] %v502_v61  ;;  %v504_v13 = vmax.f32 %v440_v62, 0.0  ;;  %v441_v14 = vadd.f32 %v700_v7, %v370_v63  ;;  %v371_v15 = vadd.f32 %v307_v59, %v172_v0  ;;  %v40_v59 = vld [vmem:[%s1510_s0 + $0x88] sm:$0xff] }
  0x10   :  { %v503_v6 = vmax.f32 %v439_v58, 0.0  ;;  %v309_v16 = vmul.f32 %v694_v5, %v238_v60  ;;  %v173_v18 = vadd.f32 %v685_v2, %v102_v8  ;;  %v104_v20 = vmul.f32 %v680_v1, %v33_v3  ;;  %v245_v58 = vld [vmem:[%s1513_s3 + $0x80] sm:$0xff]  ;;  %v246_v0 = vld [vmem:[%s1513_s3 + $0x88] sm:$0xff] }
  0x11   :  { %v174_v19 = vadd.f32 %v685_v2, %v103_v10  ;;  %v310_v21 = vmul.f32 %v694_v5, %v239_v4  ;;  %568 = vst [vmem:[%s1516_s6 + $0x28] sm:$0xff] %v504_v13  ;;  %v505_v24 = vmax.f32 %v441_v14, 0.0  ;;  %v442_v25 = vadd.f32 %v700_v7, %v371_v15  ;;  %v247_v10 = vld [vmem:[%s1513_s3 + $0x90] sm:$0xff]  ;;  %v42_v15 = vld [vmem:[%s1510_s0 + $0x98] sm:$0xff] }
  0x12   :  { %567 = vst [vmem:[%s1516_s6 + $0x20] sm:$0xff] %v503_v6  ;;  %v105_v26 = vmul.f32 %v680_v1, %v34_v11  ;;  %v311_v27 = vmul.f32 %v694_v5, %v240_v12  ;;  %v372_v28 = vadd.f32 %v308_v9, %v173_v18  ;;  %v175_v30 = vadd.f32 %v685_v2, %v104_v20  ;;  %v41_v9 = vld [vmem:[%s1510_s0 + $0x90] sm:$0xff] }
  0x13   :  { %v373_v29 = vadd.f32 %v309_v16, %v174_v19  ;;  %v106_v31 = vmul.f32 %v680_v1, %v35_v17  ;;  %569 = vst [vmem:[%s1516_s6 + $0x30] sm:$0xff] %v505_v24  ;;  %v506_v34 = vmax.f32 %v442_v25, 0.0  ;;  %v312_v36 = vmul.f32 %v694_v5, %v241_v22  ;;  %v248_v16 = vld [vmem:[%s1513_s3 + $0x98] sm:$0xff] }
  0x14   :  { %v176_v35 = vadd.f32 %v685_v2, %v105_v26  ;;  %v107_v37 = vmul.f32 %v680_v1, %v36_v23  ;;  %v443_v38 = vadd.f32 %v700_v7, %v372_v28  ;;  %v374_v40 = vadd.f32 %v310_v21, %v175_v30  ;;  %v43_v21 = vld [vmem:[%s1510_s0 + $0xa0] sm:$0xff] }
  0x15   :  { %v444_v39 = vadd.f32 %v700_v7, %v373_v29  ;;  %v177_v41 = vadd.f32 %v685_v2, %v106_v31  ;;  %570 = vst [vmem:[%s1516_s6 + $0x38] sm:$0xff] %v506_v34  ;;  %v313_v45 = vmul.f32 %v694_v5, %v242_v32  ;;  %v108_v46 = vmul.f32 %v680_v1, %v37_v33  ;;  %v249_v26 = vld [vmem:[%s1513_s3 + $0xa0] sm:$0xff] }
  0x16   :  { %v375_v43 = vadd.f32 %v311_v27, %v176_v35  ;;  %v178_v44 = vadd.f32 %v685_v2, %v107_v37  ;;  %v507_v49 = vmax.f32 %v443_v38, 0.0  ;;  %v445_v51 = vadd.f32 %v700_v7, %v374_v40  ;;  %v44_v27 = vld [vmem:[%s1510_s0 + $0xa8] sm:$0xff] }
  0x17   :  { %v508_v50 = vmax.f32 %v444_v39, 0.0  ;;  %v376_v52 = vadd.f32 %v312_v36, %v177_v41  ;;  %v179_v56 = vadd.f32 %v685_v2, %v108_v46  ;;  %v314_v57 = vmul.f32 %v694_v5, %v243_v42  ;;  %v250_v36 = vld [vmem:[%s1513_s3 + $0xa8] sm:$0xff]  ;;  %v45_v41 = vld [vmem:[%s1510_s0 + $0xb0] sm:$0xff] }
  0x18   :  { %v446_v54 = vadd.f32 %v700_v7, %v375_v43  ;;  %v377_v55 = vadd.f32 %v313_v45, %v178_v44  ;;  %571 = vst [vmem:[%s1516_s6 + $0x40] sm:$0xff] %v507_v49  ;;  %v509_v60 = vmax.f32 %v445_v51, 0.0  ;;  %v109_v62 = vmul.f32 %v680_v1, %v38_v47  ;;  %v251_v46 = vld [vmem:[%s1513_s3 + $0xb0] sm:$0xff]  ;;  %v46_v47 = vld [vmem:[%s1510_s0 + $0xb8] sm:$0xff] }
  0x19   :  { %572 = vst [vmem:[%s1516_s6 + $0x48] sm:$0xff] %v508_v50  ;;  %v447_v61 = vadd.f32 %v700_v7, %v376_v52  ;;  %v315_v63 = vmul.f32 %v694_v5, %v244_v48  ;;  %v378_v6 = vadd.f32 %v314_v57, %v179_v56  ;;  %v110_v8 = vmul.f32 %v680_v1, %v39_v53  ;;  %v252_v52 = vld [vmem:[%s1513_s3 + $0xb8] sm:$0xff]  ;;  %v47_v57 = vld [vmem:[%s1510_s0 + $0xc0] sm:$0xff] }
  0x1a   :  { %v510_v3 = vmax.f32 %v446_v54, 0.0  ;;  %v448_v4 = vadd.f32 %v700_v7, %v377_v55  ;;  %573 = vst [vmem:[%s1516_s6 + $0x50] sm:$0xff] %v509_v60  ;;  %v180_v12 = vadd.f32 %v685_v2, %v109_v62  ;;  %v316_v13 = vmul.f32 %v694_v5, %v245_v58  ;;  %v253_v62 = vld [vmem:[%s1513_s3 + $0xc0] sm:$0xff] }
  0x1b   :  { %v511_v11 = vmax.f32 %v447_v61, 0.0  ;;  %v111_v14 = vmul.f32 %v680_v1, %v40_v59  ;;  %v449_v18 = vadd.f32 %v700_v7, %v378_v6  ;;  %v181_v19 = vadd.f32 %v685_v2, %v110_v8  ;;  %v254_v8 = vld [vmem:[%s1513_s3 + $0xc8] sm:$0xff] }
  0x1c   :  { %574 = vst [vmem:[%s1516_s6 + $0x58] sm:$0xff] %v510_v3  ;;  %v512_v17 = vmax.f32 %v448_v4, 0.0  ;;  %v317_v20 = vmul.f32 %v694_v5, %v246_v0  ;;  %v379_v22 = vadd.f32 %v315_v63, %v180_v12  ;;  %v112_v24 = vmul.f32 %v680_v1, %v41_v9  ;;  %v48_v63 = vld [vmem:[%s1510_s0 + $0xc8] sm:$0xff] }
  0x1d   :  { %575 = vst [vmem:[%s1516_s6 + $0x60] sm:$0xff] %v511_v11  ;;  %v182_v23 = vadd.f32 %v685_v2, %v111_v14  ;;  %v318_v25 = vmul.f32 %v694_v5, %v247_v10  ;;  %v513_v28 = vmax.f32 %v449_v18, 0.0  ;;  %v380_v29 = vadd.f32 %v316_v13, %v181_v19  ;;  %v49_v13 = vld [vmem:[%s1510_s0 + $0xd0] sm:$0xff]  ;;  %v50_v19 = vld [vmem:[%s1510_s0 + $0xd8] sm:$0xff] }
  0x1e   :  { %576 = vst [vmem:[%s1516_s6 + $0x68] sm:$0xff] %v512_v17  ;;  %v113_v30 = vmul.f32 %v680_v1, %v42_v15  ;;  %v319_v31 = vmul.f32 %v694_v5, %v248_v16  ;;  %v450_v32 = vadd.f32 %v700_v7, %v379_v22  ;;  %v183_v34 = vadd.f32 %v685_v2, %v112_v24  ;;  %v255_v14 = vld [vmem:[%s1513_s3 + $0xd0] sm:$0xff] }
  0x1f   :  { %v381_v33 = vadd.f32 %v317_v20, %v182_v23  ;;  %v114_v35 = vmul.f32 %v680_v1, %v43_v21  ;;  %577 = vst [vmem:[%s1516_s6 + $0x70] sm:$0xff] %v513_v28  ;;  %v451_v37 = vadd.f32 %v700_v7, %v380_v29  ;;  %v320_v39 = vmul.f32 %v694_v5, %v249_v26  ;;  %v256_v20 = vld [vmem:[%s1513_s3 + $0xd8] sm:$0xff] }
  0x20   :  { %v184_v38 = vadd.f32 %v685_v2, %v113_v30  ;;  %v115_v40 = vmul.f32 %v680_v1, %v44_v27  ;;  %v514_v42 = vmax.f32 %v450_v32, 0.0  ;;  %v382_v44 = vadd.f32 %v318_v25, %v183_v34  ;;  %v51_v25 = vld [vmem:[%s1510_s0 + $0xe0] sm:$0xff] }
  0x21   :  { %v452_v43 = vadd.f32 %v700_v7, %v381_v33  ;;  %v185_v45 = vadd.f32 %v685_v2, %v114_v35  ;;  %v515_v48 = vmax.f32 %v451_v37, 0.0  ;;  %v321_v51 = vmul.f32 %v694_v5, %v250_v36  ;;  %v257_v30 = vld [vmem:[%s1513_s3 + $0xe0] sm:$0xff]  ;;  %v52_v35 = vld [vmem:[%s1510_s0 + $0xe8] sm:$0xff] }
  0x22   :  { %v383_v49 = vadd.f32 %v319_v31, %v184_v38  ;;  %v186_v50 = vadd.f32 %v685_v2, %v115_v40  ;;  %578 = vst [vmem:[%s1516_s6 + $0x78] sm:$0xff] %v514_v42  ;;  %v453_v54 = vadd.f32 %v700_v7, %v382_v44  ;;  %v116_v56 = vmul.f32 %v680_v1, %v45_v41  ;;  %v258_v40 = vld [vmem:[%s1513_s3 + $0xe8] sm:$0xff]  ;;  %v53_v41 = vld [vmem:[%s1510_s0 + $0xf0] sm:$0xff] }
  0x23   :  { %v516_v53 = vmax.f32 %v452_v43, 0.0  ;;  %v384_v55 = vadd.f32 %v320_v39, %v185_v45  ;;  %579 = vst [vmem:[%s1516_s6 + $0x80] sm:$0xff] %v515_v48  ;;  %v322_v60 = vmul.f32 %v694_v5, %v251_v46  ;;  %v117_v61 = vmul.f32 %v680_v1, %v46_v47 }
  0x24   :  { %v454_v58 = vadd.f32 %v700_v7, %v383_v49  ;;  %v385_v59 = vadd.f32 %v321_v51, %v186_v50  ;;  %v517_v0 = vmax.f32 %v453_v54, 0.0  ;;  %v187_v4 = vadd.f32 %v685_v2, %v116_v56  ;;  %v259_v50 = vld [vmem:[%s1513_s3 + $0xf0] sm:$0xff]  ;;  %v54_v51 = vld [vmem:[%s1510_s0 + $0xf8] sm:$0xff] }
  0x25   :  { %580 = vst [vmem:[%s1516_s6 + $0x88] sm:$0xff] %v516_v53  ;;  %v455_v3 = vadd.f32 %v700_v7, %v384_v55  ;;  %v323_v6 = vmul.f32 %v694_v5, %v252_v52  ;;  %v188_v11 = vadd.f32 %v685_v2, %v117_v61  ;;  %v118_v12 = vmul.f32 %v680_v1, %v47_v57  ;;  %v260_v56 = vld [vmem:[%s1513_s3 + $0xf8] sm:$0xff]  ;;  %v55_v61 = vld [vmem:[%s1510_s0 + $0x100] sm:$0xff] }
  0x26   :  { %v518_v9 = vmax.f32 %v454_v58, 0.0  ;;  %v456_v10 = vadd.f32 %v700_v7, %v385_v59  ;;  %581 = vst [vmem:[%s1516_s6 + $0x90] sm:$0xff] %v517_v0  ;;  %v386_v16 = vadd.f32 %v322_v60, %v187_v4  ;;  %v324_v17 = vmul.f32 %v694_v5, %v253_v62  ;;  %v261_v4 = vld [vmem:[%s1513_s3 + $0x100] sm:$0xff] }
  0x27   :  { %v519_v15 = vmax.f32 %v455_v3, 0.0  ;;  %v119_v18 = vmul.f32 %v680_v1, %v48_v63  ;;  %v387_v22 = vadd.f32 %v323_v6, %v188_v11  ;;  %v189_v23 = vadd.f32 %v685_v2, %v118_v12  ;;  %v56_v6 = vld [vmem:[%s1510_s0 + $0x108] sm:$0xff] }
  0x28   :  { %582 = vst [vmem:[%s1516_s6 + $0x98] sm:$0xff] %v518_v9  ;;  %v520_v21 = vmax.f32 %v456_v10, 0.0  ;;  %v325_v24 = vmul.f32 %v694_v5, %v254_v8  ;;  %v457_v26 = vadd.f32 %v700_v7, %v386_v16  ;;  %v120_v28 = vmul.f32 %v680_v1, %v49_v13  ;;  %v262_v12 = vld [vmem:[%s1513_s3 + $0x108] sm:$0xff] }
  0x29   :  { %583 = vst [vmem:[%s1516_s6 + $0xa0] sm:$0xff] %v519_v15  ;;  %v190_v27 = vadd.f32 %v685_v2, %v119_v18  ;;  %v326_v29 = vmul.f32 %v694_v5, %v255_v14  ;;  %v458_v31 = vadd.f32 %v700_v7, %v387_v22  ;;  %v388_v32 = vadd.f32 %v324_v17, %v189_v23  ;;  %v57_v17 = vld [vmem:[%s1510_s0 + $0x110] sm:$0xff]  ;;  %v58_v23 = vld [vmem:[%s1510_s0 + $0x118] sm:$0xff] }
  0x2a   :  { %584 = vst [vmem:[%s1516_s6 + $0xa8] sm:$0xff] %v520_v21  ;;  %v121_v33 = vmul.f32 %v680_v1, %v50_v19  ;;  %v327_v34 = vmul.f32 %v694_v5, %v256_v20  ;;  %v521_v36 = vmax.f32 %v457_v26, 0.0  ;;  %v191_v38 = vadd.f32 %v685_v2, %v120_v28  ;;  %v263_v18 = vld [vmem:[%s1513_s3 + $0x110] sm:$0xff]  ;;  %v264_v28 = vld [vmem:[%s1513_s3 + $0x118] sm:$0xff] }
  0x2b   :  { %v389_v37 = vadd.f32 %v325_v24, %v190_v27  ;;  %v122_v39 = vmul.f32 %v680_v1, %v51_v25  ;;  %v522_v42 = vmax.f32 %v458_v31, 0.0  ;;  %v459_v43 = vadd.f32 %v700_v7, %v388_v32 }
  0x2c   :  { %v192_v44 = vadd.f32 %v685_v2, %v121_v33  ;;  %v328_v45 = vmul.f32 %v694_v5, %v257_v30  ;;  %585 = vst [vmem:[%s1516_s6 + $0xb0] sm:$0xff] %v521_v36  ;;  %v390_v47 = vadd.f32 %v326_v29, %v191_v38  ;;  %v123_v49 = vmul.f32 %v680_v1, %v52_v35  ;;  %v59_v29 = vld [vmem:[%s1510_s0 + $0x120] sm:$0xff] }
  0x2d   :  { %v460_v46 = vadd.f32 %v700_v7, %v389_v37  ;;  %v193_v48 = vadd.f32 %v685_v2, %v122_v39  ;;  %586 = vst [vmem:[%s1516_s6 + $0xb8] sm:$0xff] %v522_v42  ;;  %v523_v52 = vmax.f32 %v459_v43, 0.0  ;;  %v329_v54 = vmul.f32 %v694_v5, %v258_v40  ;;  %v60_v39 = vld [vmem:[%s1510_s0 + $0x128] sm:$0xff] }
  0x2e   :  { %v391_v53 = vadd.f32 %v327_v34, %v192_v44  ;;  %v124_v55 = vmul.f32 %v680_v1, %v53_v41  ;;  %v461_v58 = vadd.f32 %v700_v7, %v390_v47  ;;  %v194_v60 = vadd.f32 %v685_v2, %v123_v49  ;;  %v265_v34 = vld [vmem:[%s1513_s3 + $0x120] sm:$0xff]  ;;  %v266_v44 = vld [vmem:[%s1513_s3 + $0x128] sm:$0xff] }
  0x2f   :  { %v524_v57 = vmax.f32 %v460_v46, 0.0  ;;  %v392_v59 = vadd.f32 %v328_v45, %v193_v48  ;;  %587 = vst [vmem:[%s1516_s6 + $0xc0] sm:$0xff] %v523_v52  ;;  %v330_v0 = vmul.f32 %v694_v5, %v259_v50  ;;  %v125_v3 = vmul.f32 %v680_v1, %v54_v51  ;;  %v61_v45 = vld [vmem:[%s1510_s0 + $0x130] sm:$0xff] }
  0x30   :  { %v462_v62 = vadd.f32 %v700_v7, %v391_v53  ;;  %v195_v63 = vadd.f32 %v685_v2, %v124_v55  ;;  %v525_v8 = vmax.f32 %v461_v58, 0.0  ;;  %v393_v10 = vadd.f32 %v329_v54, %v194_v60  ;;  %v267_v54 = vld [vmem:[%s1513_s3 + $0x130] sm:$0xff]  ;;  %v62_v55 = vld [vmem:[%s1510_s0 + $0x138] sm:$0xff] }
  0x31   :  { %588 = vst [vmem:[%s1516_s6 + $0xc8] sm:$0xff] %v524_v57  ;;  %v463_v9 = vadd.f32 %v700_v7, %v392_v59  ;;  %v331_v11 = vmul.f32 %v694_v5, %v260_v56  ;;  %v196_v15 = vadd.f32 %v685_v2, %v125_v3  ;;  %v126_v16 = vmul.f32 %v680_v1, %v55_v61  ;;  %v268_v60 = vld [vmem:[%s1513_s3 + $0x138] sm:$0xff]  ;;  %v63_v3 = vld [vmem:[%s1510_s0 + $0x140] sm:$0xff] }
  0x32   :  { %v526_v13 = vmax.f32 %v462_v62, 0.0  ;;  %v394_v14 = vadd.f32 %v330_v0, %v195_v63  ;;  %589 = vst [vmem:[%s1516_s6 + $0xd0] sm:$0xff] %v525_v8  ;;  %v464_v20 = vadd.f32 %v700_v7, %v393_v10  ;;  %v332_v21 = vmul.f32 %v694_v5, %v261_v4  ;;  %v269_v10 = vld [vmem:[%s1513_s3 + $0x140] sm:$0xff] }
  0x33   :  { %v527_v19 = vmax.f32 %v463_v9, 0.0  ;;  %v127_v22 = vmul.f32 %v680_v1, %v56_v6  ;;  %v395_v25 = vadd.f32 %v331_v11, %v196_v15  ;;  %v197_v26 = vadd.f32 %v685_v2, %v126_v16  ;;  %v64_v11 = vld [vmem:[%s1510_s0 + $0x148] sm:$0xff] }
  0x34   :  { %590 = vst [vmem:[%s1516_s6 + $0xd8] sm:$0xff] %v526_v13  ;;  %v465_v24 = vadd.f32 %v700_v7, %v394_v14  ;;  %v333_v27 = vmul.f32 %v694_v5, %v262_v12  ;;  %v528_v30 = vmax.f32 %v464_v20, 0.0  ;;  %v128_v32 = vmul.f32 %v680_v1, %v57_v17  ;;  %v270_v16 = vld [vmem:[%s1513_s3 + $0x148] sm:$0xff] }
  0x35   :  { %591 = vst [vmem:[%s1516_s6 + $0xe0] sm:$0xff] %v527_v19  ;;  %v198_v31 = vadd.f32 %v685_v2, %v127_v22  ;;  %v334_v33 = vmul.f32 %v694_v5, %v263_v18  ;;  %v466_v36 = vadd.f32 %v700_v7, %v395_v25  ;;  %v396_v37 = vadd.f32 %v332_v21, %v197_v26  ;;  %v65_v21 = vld [vmem:[%s1510_s0 + $0x150] sm:$0xff] }
  0x36   :  { %v529_v35 = vmax.f32 %v465_v24, 0.0  ;;  %v129_v38 = vmul.f32 %v680_v1, %v58_v23  ;;  %592 = vst [vmem:[%s1516_s6 + $0xe8] sm:$0xff] %v528_v30  ;;  %v199_v41 = vadd.f32 %v685_v2, %v128_v32  ;;  %v335_v42 = vmul.f32 %v694_v5, %v264_v28  ;;  %v271_v22 = vld [vmem:[%s1513_s3 + $0x150] sm:$0xff]  ;;  %v272_v32 = vld [vmem:[%s1513_s3 + $0x158] sm:$0xff] }
  0x37   :  { %v397_v40 = vadd.f32 %v333_v27, %v198_v31  ;;  %v130_v43 = vmul.f32 %v680_v1, %v59_v29  ;;  %v530_v46 = vmax.f32 %v466_v36, 0.0  ;;  %v467_v47 = vadd.f32 %v700_v7, %v396_v37  ;;  %v66_v27 = vld [vmem:[%s1510_s0 + $0x158] sm:$0xff] }
  0x38   :  { %593 = vst [vmem:[%s1516_s6 + $0xf0] sm:$0xff] %v529_v35  ;;  %v200_v48 = vadd.f32 %v685_v2, %v129_v38  ;;  %v336_v49 = vmul.f32 %v694_v5, %v265_v34  ;;  %v398_v51 = vadd.f32 %v334_v33, %v199_v41  ;;  %v131_v53 = vmul.f32 %v680_v1, %v60_v39  ;;  %v67_v33 = vld [vmem:[%s1510_s0 + $0x160] sm:$0xff] }
  0x39   :  { %v468_v50 = vadd.f32 %v700_v7, %v397_v40  ;;  %v201_v52 = vadd.f32 %v685_v2, %v130_v43  ;;  %594 = vst [vmem:[%s1516_s6 + $0xf8] sm:$0xff] %v530_v46  ;;  %v531_v56 = vmax.f32 %v467_v47, 0.0  ;;  %v337_v58 = vmul.f32 %v694_v5, %v266_v44  ;;  %v273_v38 = vld [vmem:[%s1513_s3 + $0x160] sm:$0xff]  ;;  %v68_v43 = vld [vmem:[%s1510_s0 + $0x168] sm:$0xff] }
  0x3a   :  { %v399_v57 = vadd.f32 %v335_v42, %v200_v48  ;;  %v132_v59 = vmul.f32 %v680_v1, %v61_v45  ;;  %v469_v62 = vadd.f32 %v700_v7, %v398_v51  ;;  %v202_v0 = vadd.f32 %v685_v2, %v131_v53  ;;  %v274_v48 = vld [vmem:[%s1513_s3 + $0x168] sm:$0xff] }
  0x3b   :  { %v532_v61 = vmax.f32 %v468_v50, 0.0  ;;  %v400_v63 = vadd.f32 %v336_v49, %v201_v52  ;;  %595 = vst [vmem:[%s1516_s6 + $0x100] sm:$0xff] %v531_v56  ;;  %v338_v8 = vmul.f32 %v694_v5, %v267_v54  ;;  %v133_v9 = vmul.f32 %v680_v1, %v62_v55  ;;  %v69_v49 = vld [vmem:[%s1510_s0 + $0x170] sm:$0xff] }
  0x3c   :  { %v470_v4 = vadd.f32 %v700_v7, %v399_v57  ;;  %v203_v6 = vadd.f32 %v685_v2, %v132_v59  ;;  %v533_v12 = vmax.f32 %v469_v62, 0.0  ;;  %v401_v14 = vadd.f32 %v337_v58, %v202_v0  ;;  %v275_v58 = vld [vmem:[%s1513_s3 + $0x170] sm:$0xff]  ;;  %v70_v59 = vld [vmem:[%s1510_s0 + $0x178] sm:$0xff] }
  0x3d   :  { %596 = vst [vmem:[%s1516_s6 + $0x108] sm:$0xff] %v532_v61  ;;  %v471_v13 = vadd.f32 %v700_v7, %v400_v63  ;;  %v339_v15 = vmul.f32 %v694_v5, %v268_v60  ;;  %v204_v19 = vadd.f32 %v685_v2, %v133_v9  ;;  %v134_v20 = vmul.f32 %v680_v1, %v63_v3  ;;  %v276_v0 = vld [vmem:[%s1513_s3 + $0x178] sm:$0xff]  ;;  %v71_v9 = vld [vmem:[%s1510_s0 + $0x180] sm:$0xff] }
  0x3e   :  { %v534_v17 = vmax.f32 %v470_v4, 0.0  ;;  %v402_v18 = vadd.f32 %v338_v8, %v203_v6  ;;  %597 = vst [vmem:[%s1516_s6 + $0x110] sm:$0xff] %v533_v12  ;;  %v472_v24 = vadd.f32 %v700_v7, %v401_v14  ;;  %v340_v25 = vmul.f32 %v694_v5, %v269_v10  ;;  %v277_v14 = vld [vmem:[%s1513_s3 + $0x180] sm:$0xff] }
  0x3f   :  { %v535_v23 = vmax.f32 %v471_v13, 0.0  ;;  %v135_v26 = vmul.f32 %v680_v1, %v64_v11  ;;  %v403_v29 = vadd.f32 %v339_v15, %v204_v19  ;;  %v205_v30 = vadd.f32 %v685_v2, %v134_v20  ;;  %v72_v15 = vld [vmem:[%s1510_s0 + $0x188] sm:$0xff] }
  0x40   :  { %598 = vst [vmem:[%s1516_s6 + $0x118] sm:$0xff] %v534_v17  ;;  %v473_v28 = vadd.f32 %v700_v7, %v402_v18  ;;  %v341_v31 = vmul.f32 %v694_v5, %v270_v16  ;;  %v536_v34 = vmax.f32 %v472_v24, 0.0  ;;  %v136_v36 = vmul.f32 %v680_v1, %v65_v21  ;;  %v278_v20 = vld [vmem:[%s1513_s3 + $0x188] sm:$0xff] }
  0x41   :  { %599 = vst [vmem:[%s1516_s6 + $0x120] sm:$0xff] %v535_v23  ;;  %v206_v35 = vadd.f32 %v685_v2, %v135_v26  ;;  %v342_v37 = vmul.f32 %v694_v5, %v271_v22  ;;  %v474_v40 = vadd.f32 %v700_v7, %v403_v29  ;;  %v404_v41 = vadd.f32 %v340_v25, %v205_v30  ;;  %v73_v25 = vld [vmem:[%s1510_s0 + $0x190] sm:$0xff] }
  0x42   :  { %v537_v39 = vmax.f32 %v473_v28, 0.0  ;;  %v137_v42 = vmul.f32 %v680_v1, %v66_v27  ;;  %600 = vst [vmem:[%s1516_s6 + $0x128] sm:$0xff] %v536_v34  ;;  %v207_v45 = vadd.f32 %v685_v2, %v136_v36  ;;  %v343_v46 = vmul.f32 %v694_v5, %v272_v32  ;;  %v279_v26 = vld [vmem:[%s1513_s3 + $0x190] sm:$0xff]  ;;  %v280_v36 = vld [vmem:[%s1513_s3 + $0x198] sm:$0xff] }
  0x43   :  { %v405_v44 = vadd.f32 %v341_v31, %v206_v35  ;;  %v138_v47 = vmul.f32 %v680_v1, %v67_v33  ;;  %v538_v50 = vmax.f32 %v474_v40, 0.0  ;;  %v475_v51 = vadd.f32 %v700_v7, %v404_v41  ;;  %v74_v31 = vld [vmem:[%s1510_s0 + $0x198] sm:$0xff] }
  0x44   :  { %601 = vst [vmem:[%s1516_s6 + $0x130] sm:$0xff] %v537_v39  ;;  %v208_v52 = vadd.f32 %v685_v2, %v137_v42  ;;  %v344_v53 = vmul.f32 %v694_v5, %v273_v38  ;;  %v406_v55 = vadd.f32 %v342_v37, %v207_v45  ;;  %v139_v57 = vmul.f32 %v680_v1, %v68_v43  ;;  %v75_v37 = vld [vmem:[%s1510_s0 + $0x1a0] sm:$0xff] }
  0x45   :  { %v476_v54 = vadd.f32 %v700_v7, %v405_v44  ;;  %v209_v56 = vadd.f32 %v685_v2, %v138_v47  ;;  %602 = vst [vmem:[%s1516_s6 + $0x138] sm:$0xff] %v538_v50  ;;  %v539_v60 = vmax.f32 %v475_v51, 0.0  ;;  %v345_v62 = vmul.f32 %v694_v5, %v274_v48  ;;  %v281_v42 = vld [vmem:[%s1513_s3 + $0x1a0] sm:$0xff]  ;;  %v76_v47 = vld [vmem:[%s1510_s0 + $0x1a8] sm:$0xff] }
  0x46   :  { %v407_v61 = vadd.f32 %v343_v46, %v208_v52  ;;  %v140_v63 = vmul.f32 %v680_v1, %v69_v49  ;;  %v477_v4 = vadd.f32 %v700_v7, %v406_v55  ;;  %v210_v8 = vadd.f32 %v685_v2, %v139_v57  ;;  %v282_v52 = vld [vmem:[%s1513_s3 + $0x1a8] sm:$0xff] }
  0x47   :  { %v540_v3 = vmax.f32 %v476_v54, 0.0  ;;  %v408_v6 = vadd.f32 %v344_v53, %v209_v56  ;;  %603 = vst [vmem:[%s1516_s6 + $0x140] sm:$0xff] %v539_v60  ;;  %v346_v12 = vmul.f32 %v694_v5, %v275_v58  ;;  %v141_v13 = vmul.f32 %v680_v1, %v70_v59  ;;  %v77_v53 = vld [vmem:[%s1510_s0 + $0x1b0] sm:$0xff] }
  0x48   :  { %v478_v10 = vadd.f32 %v700_v7, %v407_v61  ;;  %v211_v11 = vadd.f32 %v685_v2, %v140_v63  ;;  %v541_v16 = vmax.f32 %v477_v4, 0.0  ;;  %v409_v18 = vadd.f32 %v345_v62, %v210_v8  ;;  %v283_v62 = vld [vmem:[%s1513_s3 + $0x1b0] sm:$0xff]  ;;  %v78_v63 = vld [vmem:[%s1510_s0 + $0x1b8] sm:$0xff] }
  0x49   :  { %604 = vst [vmem:[%s1516_s6 + $0x148] sm:$0xff] %v540_v3  ;;  %v479_v17 = vadd.f32 %v700_v7, %v408_v6  ;;  %v347_v19 = vmul.f32 %v694_v5, %v276_v0  ;;  %v212_v23 = vadd.f32 %v685_v2, %v141_v13  ;;  %v142_v24 = vmul.f32 %v680_v1, %v71_v9  ;;  %v284_v8 = vld [vmem:[%s1513_s3 + $0x1b8] sm:$0xff]  ;;  %v79_v13 = vld [vmem:[%s1510_s0 + $0x1c0] sm:$0xff] }
  0x4a   :  { %v542_v21 = vmax.f32 %v478_v10, 0.0  ;;  %v410_v22 = vadd.f32 %v346_v12, %v211_v11  ;;  %605 = vst [vmem:[%s1516_s6 + $0x150] sm:$0xff] %v541_v16  ;;  %v480_v28 = vadd.f32 %v700_v7, %v409_v18  ;;  %v348_v29 = vmul.f32 %v694_v5, %v277_v14  ;;  %v285_v18 = vld [vmem:[%s1513_s3 + $0x1c0] sm:$0xff] }
  0x4b   :  { %v543_v27 = vmax.f32 %v479_v17, 0.0  ;;  %v143_v30 = vmul.f32 %v680_v1, %v72_v15  ;;  %v411_v33 = vadd.f32 %v347_v19, %v212_v23  ;;  %v213_v34 = vadd.f32 %v685_v2, %v142_v24  ;;  %v80_v19 = vld [vmem:[%s1510_s0 + $0x1c8] sm:$0xff] }
  0x4c   :  { %606 = vst [vmem:[%s1516_s6 + $0x158] sm:$0xff] %v542_v21  ;;  %v481_v32 = vadd.f32 %v700_v7, %v410_v22  ;;  %v349_v35 = vmul.f32 %v694_v5, %v278_v20  ;;  %v544_v38 = vmax.f32 %v480_v28, 0.0  ;;  %v144_v40 = vmul.f32 %v680_v1, %v73_v25  ;;  %v286_v24 = vld [vmem:[%s1513_s3 + $0x1c8] sm:$0xff] }
  0x4d   :  { %607 = vst [vmem:[%s1516_s6 + $0x160] sm:$0xff] %v543_v27  ;;  %v214_v39 = vadd.f32 %v685_v2, %v143_v30  ;;  %v350_v41 = vmul.f32 %v694_v5, %v279_v26  ;;  %v482_v44 = vadd.f32 %v700_v7, %v411_v33  ;;  %v412_v45 = vadd.f32 %v348_v29, %v213_v34  ;;  %v81_v29 = vld [vmem:[%s1510_s0 + $0x1d0] sm:$0xff] }
  0x4e   :  { %v545_v43 = vmax.f32 %v481_v32, 0.0  ;;  %v145_v46 = vmul.f32 %v680_v1, %v74_v31  ;;  %608 = vst [vmem:[%s1516_s6 + $0x168] sm:$0xff] %v544_v38  ;;  %v215_v49 = vadd.f32 %v685_v2, %v144_v40  ;;  %v351_v50 = vmul.f32 %v694_v5, %v280_v36  ;;  %v287_v30 = vld [vmem:[%s1513_s3 + $0x1d0] sm:$0xff]  ;;  %v288_v40 = vld [vmem:[%s1513_s3 + $0x1d8] sm:$0xff] }
  0x4f   :  { %v413_v48 = vadd.f32 %v349_v35, %v214_v39  ;;  %v146_v51 = vmul.f32 %v680_v1, %v75_v37  ;;  %v546_v54 = vmax.f32 %v482_v44, 0.0  ;;  %v483_v55 = vadd.f32 %v700_v7, %v412_v45  ;;  %v82_v35 = vld [vmem:[%s1510_s0 + $0x1d8] sm:$0xff]  ;;  %v289_v45 = vld [vmem:[%s1513_s3 + $0x1e0] sm:$0xff] }
  0x50   :  { %609 = vst [vmem:[%s1516_s6 + $0x170] sm:$0xff] %v545_v43  ;;  %v216_v56 = vadd.f32 %v685_v2, %v145_v46  ;;  %v352_v57 = vmul.f32 %v694_v5, %v281_v42  ;;  %v414_v59 = vadd.f32 %v350_v41, %v215_v49  ;;  %v147_v61 = vmul.f32 %v680_v1, %v76_v47  ;;  %v637_v43 = vld [vmem:[%s1514_s4] ss:$0 sm:$0xff] }
  0x51   :  { %v484_v58 = vadd.f32 %v700_v7, %v413_v48  ;;  %v217_v60 = vadd.f32 %v685_v2, %v146_v51  ;;  %610 = vst [vmem:[%s1516_s6 + $0x178] sm:$0xff] %v546_v54  ;;  %v547_v0 = vmax.f32 %v483_v55, 0.0  ;;  %v353_v4 = vmul.f32 %v694_v5, %v282_v52  ;;  %v638_v47 = vld [vmem:[%s1515_s5] ss:$0 sm:$0xff]  ;;  %v84_v51 = vld [vmem:[%s1510_s0 + $0x1e8] sm:$0xff] }
  0x52   :  { %v415_v3 = vadd.f32 %v351_v50, %v216_v56  ;;  %v148_v6 = vmul.f32 %v680_v1, %v77_v53  ;;  %v485_v10 = vadd.f32 %v700_v7, %v414_v59  ;;  %v218_v12 = vadd.f32 %v685_v2, %v147_v61  ;;  %v290_v56 = vld [vmem:[%s1513_s3 + $0x1e8] sm:$0xff] }
  0x53   :  { %v548_v9 = vmax.f32 %v484_v58, 0.0  ;;  %v416_v11 = vadd.f32 %v352_v57, %v217_v60  ;;  %611 = vst [vmem:[%s1516_s6 + $0x180] sm:$0xff] %v547_v0  ;;  %v354_v16 = vmul.f32 %v694_v5, %v283_v62  ;;  %v149_v17 = vmul.f32 %v680_v1, %v78_v63  ;;  %v85_v57 = vld [vmem:[%s1510_s0 + $0x1f0] sm:$0xff] }
  0x54   :  { %v486_v14 = vadd.f32 %v700_v7, %v415_v3  ;;  %v219_v15 = vadd.f32 %v685_v2, %v148_v6  ;;  %v549_v20 = vmax.f32 %v485_v10, 0.0  ;;  %v417_v22 = vadd.f32 %v353_v4, %v218_v12  ;;  %v291_v4 = vld [vmem:[%s1513_s3 + $0x1f0] sm:$0xff]  ;;  %v86_v6 = vld [vmem:[%s1510_s0 + $0x1f8] sm:$0xff] }
  0x55   :  { %612 = vst [vmem:[%s1516_s6 + $0x188] sm:$0xff] %v548_v9  ;;  %v487_v21 = vadd.f32 %v700_v7, %v416_v11  ;;  %v355_v23 = vmul.f32 %v694_v5, %v284_v8  ;;  %v220_v27 = vadd.f32 %v685_v2, %v149_v17  ;;  %v150_v28 = vmul.f32 %v680_v1, %v79_v13  ;;  %v292_v12 = vld [vmem:[%s1513_s3 + $0x1f8] sm:$0xff] }
  0x56   :  { %v550_v25 = vmax.f32 %v486_v14, 0.0  ;;  %v418_v26 = vadd.f32 %v354_v16, %v219_v15  ;;  %613 = vst [vmem:[%s1516_s6 + $0x190] sm:$0xff] %v549_v20  ;;  %v488_v32 = vadd.f32 %v700_v7, %v417_v22  ;;  %v356_v33 = vmul.f32 %v694_v5, %v285_v18 }
  0x57   :  { %v551_v31 = vmax.f32 %v487_v21, 0.0  ;;  %v151_v34 = vmul.f32 %v680_v1, %v80_v19  ;;  %v419_v37 = vadd.f32 %v355_v23, %v220_v27  ;;  %v221_v38 = vadd.f32 %v685_v2, %v150_v28  ;;  %v83_v1 = vld [vmem:[%s1510_s0 + $0x1e0] sm:$0xff] }
  0x58   :  { %614 = vst [vmem:[%s1516_s6 + $0x198] sm:$0xff] %v550_v25  ;;  %v489_v36 = vadd.f32 %v700_v7, %v418_v26  ;;  %v357_v39 = vmul.f32 %v694_v5, %v286_v24  ;;  %v552_v41 = vmax.f32 %v488_v32, 0.0  ;;  %v635_v7 = vld [vmem:[%s1512_s2] ss:$0 sm:$0xff]  ;;  %v358_v44 = vmul.f32 %v637_v43, %v287_v30 }
  0x59   :  { %615 = vst [vmem:[%s1516_s6 + $0x1a0] sm:$0xff] %v551_v31  ;;  %v222_v2 = vadd.f32 %v635_v7, %v151_v34  ;;  %v636_v5 = vld [vmem:[%s1511_s1] ss:$0 sm:$0xff]  ;;  %v490_v48 = vadd.f32 %v638_v47, %v419_v37  ;;  %v420_v49 = vadd.f32 %v356_v33, %v221_v38  ;;  %v359_v54 = vmul.f32 %v637_v43, %v288_v40 }
  0x5a   :  { %v152_v42 = vmul.f32 %v636_v5, %v81_v29  ;;  %v553_v46 = vmax.f32 %v489_v36, 0.0  ;;  %v153_v50 = vmul.f32 %v636_v5, %v82_v35  ;;  %616 = vst [vmem:[%s1516_s6 + $0x1a8] sm:$0xff] %v552_v41  ;;  %v154_v55 = vmul.f32 %v636_v5, %v83_v1 }
  0x5b   :  { %v421_v52 = vadd.f32 %v357_v39, %v222_v2  ;;  %v554_v58 = vmax.f32 %v490_v48, 0.0  ;;  %v491_v59 = vadd.f32 %v638_v47, %v420_v49  ;;  %v360_v61 = vmul.f32 %v637_v43, %v289_v45 }
  0x5c   :  { %v223_v53 = vadd.f32 %v635_v7, %v152_v42  ;;  %617 = vst [vmem:[%s1516_s6 + $0x1b0] sm:$0xff] %v553_v46  ;;  %v224_v60 = vadd.f32 %v635_v7, %v153_v50  ;;  %v225_v0 = vadd.f32 %v635_v7, %v154_v55  ;;  %v155_v3 = vmul.f32 %v636_v5, %v84_v51 }
  0x5d   :  { %v492_v62 = vadd.f32 %v638_v47, %v421_v52  ;;  %618 = vst [vmem:[%s1516_s6 + $0x1b8] sm:$0xff] %v554_v58  ;;  %v555_v8 = vmax.f32 %v491_v59, 0.0  ;;  %v361_v10 = vmul.f32 %v637_v43, %v290_v56  ;;  %v156_v11 = vmul.f32 %v636_v5, %v85_v57 }
  0x5e   :  { %v422_v63 = vadd.f32 %v358_v44, %v223_v53  ;;  %v423_v9 = vadd.f32 %v359_v54, %v224_v60  ;;  %v424_v15 = vadd.f32 %v360_v61, %v225_v0  ;;  %v226_v16 = vadd.f32 %v635_v7, %v155_v3 }
  0x5f   :  { %v556_v13 = vmax.f32 %v492_v62, 0.0  ;;  %619 = vst [vmem:[%s1516_s6 + $0x1c0] sm:$0xff] %v555_v8  ;;  %v227_v18 = vadd.f32 %v635_v7, %v156_v11  ;;  %v362_v19 = vmul.f32 %v637_v43, %v291_v4  ;;  %v157_v20 = vmul.f32 %v636_v5, %v86_v6 }
  0x60   :  { %v493_v14 = vadd.f32 %v638_v47, %v422_v63  ;;  %v494_v17 = vadd.f32 %v638_v47, %v423_v9  ;;  %v495_v22 = vadd.f32 %v638_v47, %v424_v15  ;;  %v425_v23 = vadd.f32 %v361_v10, %v226_v16 }
  0x61   :  { %620 = vst [vmem:[%s1516_s6 + $0x1c8] sm:$0xff] %v556_v13  ;;  %v363_v24 = vmul.f32 %v637_v43, %v292_v12  ;;  %v426_v26 = vadd.f32 %v362_v19, %v227_v18  ;;  %v228_v27 = vadd.f32 %v635_v7, %v157_v20 }
  0x62   :  { %v557_v21 = vmax.f32 %v493_v14, 0.0  ;;  %v558_v25 = vmax.f32 %v494_v17, 0.0  ;;  %v559_v28 = vmax.f32 %v495_v22, 0.0  ;;  %v496_v29 = vadd.f32 %v638_v47, %v425_v23 }
  0x63   :  { %v497_v30 = vadd.f32 %v638_v47, %v426_v26  ;;  %v427_v31 = vadd.f32 %v363_v24, %v228_v27 }
  0x64   :  { %621 = vst [vmem:[%s1516_s6 + $0x1d0] sm:$0xff] %v557_v21  ;;  %622 = vst [vmem:[%s1516_s6 + $0x1d8] sm:$0xff] %v558_v25  ;;  %v560_v32 = vmax.f32 %v496_v29, 0.0 }
  0x65   :  { %623 = vst [vmem:[%s1516_s6 + $0x1e0] sm:$0xff] %v559_v28  ;;  %v561_v33 = vmax.f32 %v497_v30, 0.0  ;;  %v498_v34 = vadd.f32 %v638_v47, %v427_v31 }
  0x66   :  { %624 = vst [vmem:[%s1516_s6 + $0x1e8] sm:$0xff] %v560_v32 }
  0x67   :  { %625 = vst [vmem:[%s1516_s6 + $0x1f0] sm:$0xff] %v561_v33  ;;  %v562_v35 = vmax.f32 %v498_v34, 0.0 }
  0x69   :  { %626 = vst [vmem:[%s1516_s6 + $0x1f8] sm:$0xff] %v562_v35 }

// kernel: basic_block_forward.4
= control target key start
LH: loop header
LB: loop body
LE: loop exit
PB: predicated region body
PF: predicated region fallthrough
CT: control target
= control target key end

     0   :  { %s3396_s12 = smov 0   ;;  %s3398_s13 = smov 0   ;;  %s3929_s0 = inlined_call_operand.vmem [shape: f32[2,16,16,128], index: 0, kind: input, shape index: {}]   ;;  %s3930_s1 = inlined_call_operand.vmem [shape: bf16[9,128,128], index: 1, kind: input, shape index: {}]   ;;  %s3931_s2 = inlined_call_operand.vmem [shape: f32[2,256,128], index: 2, kind: output, shape index: {0}]   ;;  %s3932_s3 = inlined_call_operand.vmem [shape: f32[2,8,128], index: 3, kind: output, shape index: {1}]  }
   0x1   :  { %s3400_s14 = smov 0   ;;  %s3402_s15 = smov 0  }
   0x2   :  { %s3404_s16 = smov 0  }
   0x3 LB: > { %s23_s17 = sadd.s32 1, %s3365_s14  ;;  %s26_s18 = sadd.s32 1, %s3369_s15  ;;  %s3373_s16 = sphi %s3404_s16, %s14_s16   ;;  %s3369_s15 = sphi %s3402_s15, %s3936_s15   ;;  %s3365_s14 = sphi %s3400_s14, %s3935_s14   ;;  %s3361_s13 = sphi %s3398_s13, %s3934_s13   ;;  %s3357_s12 = sphi %s3396_s12, %s3933_s12  }
   0x4   : > { %p24_p0 = scmp.ge.s32.totalorder %s23_s17, 2  ;;  %p2333_p1 = scmp.ge.s32.totalorder %s3373_s16, 1 }
   0x5   : > { %p154_p2 = scmp.lt.s32.totalorder %s3373_s16, 5 }
   0x6   : > { %s3938_s17 = smov (%p24_p0, %s23_s17), 0  ;;  %s3940_s18 = smov (!%p24_p0, %s26_s18), %s3369_s15 }
   0x7   : > { %p155_p3 = pnand %p2333_p1, %p154_p2  ;;  %p28_p4 = scmp.ge.s32.totalorder %s3940_s18, 2 }
   0x8   : > { %p186_p5 = scmp.lt.s32.totalorder (!%p155_p3), %s3361_s13, 1  ;;  %s2336_s19 = sshll.u32 (!%p155_p3), %s3357_s12, 4 }
   0x9   : > { %s3942_s18 = smov (%p28_p4, %s3940_s18), 0  ;;  %158 = sbr.rel (%p155_p3) target bundleno = 488 (0x1e8), region = 28 }
   0xa   : > { %p194_p6 = scmp.lt.s32.totalorder (!%p155_p3), %s2336_s19, 31  ;;  %p2340_p7 = scmp.ne.s32.totalorder (!%p155_p3), %s3357_s12, 0 }
  0x10   : > { %s3944_s13 = smov (!%p186_p5, %s3361_s13), 1  ;;  %s3946_s19 = smov (!%p194_p6, %s2336_s19), 31 }
  0x11   : > { %s2645_s20 = sshll.u32 %s3944_s13, 8  ;;  %s2337_s21 = sshll.u32 %s3944_s13, 5  ;;  %v3375_v3 = vmov (!%p2340_p7), 0.0  }
  0x12   : > { %s3432_s24 = scalar_lea.vmem %s3929_s0, %s2645_s20  ;;  %s197_s25 = sadd.s32 %s2337_s21, %s3946_s19  ;;  %213 = vst [vmem:[#allocation2 + $0x18] sm:$0xff] (!%p2340_p7), %v3375_v3  ;;  %210 = vst [vmem:[#allocation2] sm:$0xff] (!%p2340_p7), %v3375_v3 }
  0x13   : > { %s2338_s26 = sshll.u32 %s197_s25, 3  ;;  %s2339_s27 = sshll.u32 %s3944_s13, 3  ;;  %v264_v0 = vld [vmem:[%s3432_s24] sm:$0xff] (!%p2340_p7)  ;;  %v265_v1 = vld [vmem:[%s3432_s24 + $0x8] sm:$0xff] (!%p2340_p7)  ;;  %v266_v2 = vld [vmem:[%s3432_s24 + $0x10] sm:$0xff] (!%p2340_p7)  ;;  %211 = vst [vmem:[#allocation2 + $0x8] sm:$0xff] (!%p2340_p7), %v3375_v3 }
  0x14   : > { %s3437_s30 = scalar_lea.vmem %s3931_s2, %s2338_s26  ;;  %s3442_s6 = scalar_lea.vmem %s3932_s3, %s2339_s27  ;;  %212 = vst [vmem:[#allocation2 + $0x10] sm:$0x3] (!%p2340_p7), %v3375_v3  ;;  %214 = vst [vmem:[#allocation2 + $0x20] sm:$0xff] (!%p2340_p7), %v3375_v3  ;;  %v267_v4 = vld [vmem:[%s3432_s24 + $0x18] sm:$0xff] (!%p2340_p7)  ;;  %v268_v5 = vld [vmem:[%s3432_s24 + $0x20] sm:$0xff] (!%p2340_p7) }
  0x15   : > { %209 = sbr.rel (%p2340_p7) target bundleno = 62 (0x3e), region = 32  ;;  %215 = vst [vmem:[#allocation2 + $0x28] sm:$0x3] (!%p2340_p7), %v3375_v3  ;;  %216 = vst [vmem:[#allocation2 + $0x30] sm:$0xff] (!%p2340_p7), %v3375_v3  ;;  %v269_v6 = vld [vmem:[%s3432_s24 + $0x28] sm:$0xff] (!%p2340_p7)  ;;  %v270_v7 = vld [vmem:[%s3432_s24 + $0x30] sm:$0xff] (!%p2340_p7) }
  0x16   : > { %217 = vst [vmem:[#allocation2 + $0x38] sm:$0xff] (!%p2340_p7), %v3375_v3  ;;  %218 = vst [vmem:[#allocation2 + $0x40] sm:$0x3] (!%p2340_p7), %v3375_v3  ;;  %v271_v8 = vld [vmem:[%s3432_s24 + $0x38] sm:$0xff] (!%p2340_p7)  ;;  %v272_v9 = vld [vmem:[%s3432_s24 + $0x40] sm:$0xff] (!%p2340_p7) }
  0x17   : > { %219 = vst [vmem:[#allocation2 + $0x48] sm:$0xff] (!%p2340_p7), %v3375_v3  ;;  %220 = vst [vmem:[#allocation2 + $0x50] sm:$0xff] (!%p2340_p7), %v3375_v3  ;;  %v273_v10 = vld [vmem:[%s3432_s24 + $0x48] sm:$0xff] (!%p2340_p7)  ;;  %v274_v11 = vld [vmem:[%s3432_s24 + $0x50] sm:$0xff] (!%p2340_p7) }
  0x18   : > { %221 = vst [vmem:[#allocation2 + $0x58] sm:$0x3] (!%p2340_p7), %v3375_v3  ;;  %222 = vst [vmem:[#allocation2 + $0x60] sm:$0xff] (!%p2340_p7), %v3375_v3  ;;  %v275_v12 = vld [vmem:[%s3432_s24 + $0x58] sm:$0xff] (!%p2340_p7)  ;;  %v276_v13 = vld [vmem:[%s3432_s24 + $0x60] sm:$0xff] (!%p2340_p7) }
  0x19   : > { %223 = vst [vmem:[#allocation2 + $0x68] sm:$0xff] (!%p2340_p7), %v3375_v3  ;;  %224 = vst [vmem:[#allocation2 + $0x70] sm:$0x3] (!%p2340_p7), %v3375_v3  ;;  %v277_v14 = vld [vmem:[%s3432_s24 + $0x68] sm:$0xff] (!%p2340_p7)  ;;  %v278_v15 = vld [vmem:[%s3432_s24 + $0x70] sm:$0xff] (!%p2340_p7) }
  0x1a   : > { %225 = vst [vmem:[#allocation2 + $0x78] sm:$0xff] (!%p2340_p7), %v3375_v3  ;;  %226 = vst [vmem:[#allocation2 + $0x80] sm:$0xff] (!%p2340_p7), %v3375_v3  ;;  %v279_v16 = vld [vmem:[%s3432_s24 + $0x78] sm:$0xff] (!%p2340_p7)  ;;  %v280_v17 = vld [vmem:[%s3432_s24 + $0x80] sm:$0xff] (!%p2340_p7) }
  0x1b   : > { %227 = vst [vmem:[#allocation2 + $0x88] sm:$0x3] (!%p2340_p7), %v3375_v3  ;;  %228 = vst [vmem:[#allocation2 + $0x90] sm:$0xff] (!%p2340_p7), %v3375_v3  ;;  %v281_v18 = vld [vmem:[%s3432_s24 + $0x88] sm:$0xff] (!%p2340_p7)  ;;  %v282_v19 = vld [vmem:[%s3432_s24 + $0x90] sm:$0xff] (!%p2340_p7) }
  0x1c   : > { %229 = vst [vmem:[#allocation2 + $0x98] sm:$0xff] %v3375_v3  ;;  %230 = vst [vmem:[#allocation2 + $0xa0] sm:$0x3] %v3375_v3  ;;  %v283_v20 = vld [vmem:[%s3432_s24 + $0x98] sm:$0xff]  ;;  %v284_v21 = vld [vmem:[%s3432_s24 + $0xa0] sm:$0xff] }
  0x1d   : > { %231 = vst [vmem:[#allocation2 + $0xa8] sm:$0xff] %v3375_v3  ;;  %232 = vst [vmem:[#allocation2 + $0xb0] sm:$0xff] %v3375_v3  ;;  %v285_v22 = vld [vmem:[%s3432_s24 + $0xa8] sm:$0xff]  ;;  %v286_v23 = vld [vmem:[%s3432_s24 + $0xb0] sm:$0xff] }
  0x1e   : > { %233 = vst [vmem:[#allocation2 + $0xb8] sm:$0x3] %v3375_v3  ;;  %234 = vst [vmem:[#allocation2 + $0xc0] sm:$0xff] %v3375_v3  ;;  %v287_v24 = vld [vmem:[%s3432_s24 + $0xb8] sm:$0xff]  ;;  %v288_v25 = vld [vmem:[%s3432_s24 + $0xc0] sm:$0xff] }
  0x1f   : > { %235 = vst [vmem:[#allocation2 + $0xc8] sm:$0xff] %v3375_v3  ;;  %236 = vst [vmem:[#allocation2 + $0xd0] sm:$0x3] %v3375_v3  ;;  %v289_v26 = vld [vmem:[%s3432_s24 + $0xc8] sm:$0xff]  ;;  %v290_v27 = vld [vmem:[%s3432_s24 + $0xd0] sm:$0xff] }
  0x20   : > { %237 = vst [vmem:[#allocation2 + $0xd8] sm:$0xff] %v3375_v3  ;;  %238 = vst [vmem:[#allocation2 + $0xe0] sm:$0xff] %v3375_v3  ;;  %v291_v28 = vld [vmem:[%s3432_s24 + $0xd8] sm:$0xff]  ;;  %v292_v29 = vld [vmem:[%s3432_s24 + $0xe0] sm:$0xff] }
  0x21   : > { %239 = vst [vmem:[#allocation2 + $0xe8] sm:$0x3] %v3375_v3  ;;  %240 = vst [vmem:[#allocation2 + $0xf0] sm:$0xff] %v3375_v3  ;;  %v293_v30 = vld [vmem:[%s3432_s24 + $0xe8] sm:$0xff]  ;;  %v294_v31 = vld [vmem:[%s3432_s24 + $0xf0] sm:$0xff] }
  0x22   : > { %241 = vst [vmem:[#allocation2 + $0xf8] sm:$0xff] %v3375_v3  ;;  %242 = vst [vmem:[#allocation2 + $0x100] sm:$0x3] %v3375_v3  ;;  %v295_v32 = vld [vmem:[%s3432_s24 + $0xf8] sm:$0xff] }
  0x23   : > { %243 = vst [vmem:[#allocation2 + $0x108] sm:$0xff] %v3375_v3  ;;  %244 = vst [vmem:[#allocation2 + $0x110] sm:$0xff] %v3375_v3 }
  0x24   : > { %245 = vst [vmem:[#allocation2 + $0x118] sm:$0x3] %v3375_v3  ;;  %246 = vst [vmem:[#allocation2 + $0x120] sm:$0xff] %v3375_v3 }
  0x25   : > { %247 = vst [vmem:[#allocation2 + $0x128] sm:$0xff] %v3375_v3  ;;  %248 = vst [vmem:[#allocation2 + $0x130] sm:$0x3] %v3375_v3 }
  0x26   : > { %249 = vst [vmem:[#allocation2 + $0x138] sm:$0xff] %v3375_v3  ;;  %250 = vst [vmem:[#allocation2 + $0x140] sm:$0xff] %v3375_v3 }
  0x27   : > { %251 = vst [vmem:[#allocation2 + $0x148] sm:$0x3] %v3375_v3  ;;  %252 = vst [vmem:[#allocation2 + $0x150] sm:$0xff] %v3375_v3 }
  0x28   : > { %253 = vst [vmem:[#allocation2 + $0x158] sm:$0xff] %v3375_v3  ;;  %254 = vst [vmem:[#allocation2 + $0x160] sm:$0x3] %v3375_v3 }
  0x29   : > { %255 = vst [vmem:[#allocation2 + $0x168] sm:$0xff] %v3375_v3  ;;  %256 = vst [vmem:[#allocation2 + $0x170] sm:$0xff] %v3375_v3 }
  0x2a   : > { %257 = vst [vmem:[#allocation2 + $0x178] sm:$0x3] %v3375_v3  ;;  %258 = vst [vmem:[#allocation2 + $0x180] sm:$0xff] %v3375_v3 }
  0x2b   : > { %259 = vst [vmem:[#allocation2 + $0x188] sm:$0xff] %v3375_v3  ;;  %260 = vst [vmem:[#allocation2 + $0x190] sm:$0x3] %v3375_v3 }
  0x2c   : > { %261 = vst [vmem:[#allocation2 + $0x198] sm:$0xff] %v3375_v3  ;;  %262 = vst [vmem:[#allocation2 + $0x1a0] sm:$0xff] %v3375_v3 }
  0x2d   : > { %263 = vst [vmem:[#allocation2 + $0x1a8] sm:$0x3] %v3375_v3  ;;  %329 = vst [vmem:[%s3442_s6] sm:$0xff] %v3375_v3 }
  0x2e   : > { %297 = vst [vmem:[#allocation2 + $0x19] sm:$0xff] %v264_v0  ;;  %298 = vst [vmem:[#allocation2 + $0x21] sm:$0xff] %v265_v1 }
  0x2f   : > { %299 = vst [vmem:[#allocation2 + $0x31] sm:$0xff] %v266_v2  ;;  %300 = vst [vmem:[#allocation2 + $0x39] sm:$0xff] %v267_v4 }
  0x30   : > { %301 = vst [vmem:[#allocation2 + $0x49] sm:$0xff] %v268_v5  ;;  %302 = vst [vmem:[#allocation2 + $0x51] sm:$0xff] %v269_v6 }
  0x31   : > { %303 = vst [vmem:[#allocation2 + $0x61] sm:$0xff] %v270_v7  ;;  %304 = vst [vmem:[#allocation2 + $0x69] sm:$0xff] %v271_v8 }
  0x32   : > { %305 = vst [vmem:[#allocation2 + $0x79] sm:$0xff] %v272_v9  ;;  %306 = vst [vmem:[#allocation2 + $0x81] sm:$0xff] %v273_v10 }
  0x33   : > { %307 = vst [vmem:[#allocation2 + $0x91] sm:$0xff] %v274_v11  ;;  %308 = vst [vmem:[#allocation2 + $0x99] sm:$0xff] %v275_v12 }
  0x34   : > { %309 = vst [vmem:[#allocation2 + $0xa9] sm:$0xff] %v276_v13  ;;  %310 = vst [vmem:[#allocation2 + $0xb1] sm:$0xff] %v277_v14 }
  0x35   : > { %311 = vst [vmem:[#allocation2 + $0xc1] sm:$0xff] %v278_v15  ;;  %312 = vst [vmem:[#allocation2 + $0xc9] sm:$0xff] %v279_v16 }
  0x36   : > { %313 = vst [vmem:[#allocation2 + $0xd9] sm:$0xff] %v280_v17  ;;  %314 = vst [vmem:[#allocation2 + $0xe1] sm:$0xff] %v281_v18 }
  0x37   : > { %315 = vst [vmem:[#allocation2 + $0xf1] sm:$0xff] %v282_v19  ;;  %316 = vst [vmem:[#allocation2 + $0xf9] sm:$0xff] %v283_v20 }
  0x38   : > { %317 = vst [vmem:[#allocation2 + $0x109] sm:$0xff] %v284_v21  ;;  %318 = vst [vmem:[#allocation2 + $0x111] sm:$0xff] %v285_v22 }
  0x39   : > { %319 = vst [vmem:[#allocation2 + $0x121] sm:$0xff] %v286_v23  ;;  %320 = vst [vmem:[#allocation2 + $0x129] sm:$0xff] %v287_v24 }
  0x3a   : > { %321 = vst [vmem:[#allocation2 + $0x139] sm:$0xff] %v288_v25  ;;  %322 = vst [vmem:[#allocation2 + $0x141] sm:$0xff] %v289_v26 }
  0x3b   : > { %323 = vst [vmem:[#allocation2 + $0x151] sm:$0xff] %v290_v27  ;;  %324 = vst [vmem:[#allocation2 + $0x159] sm:$0xff] %v291_v28 }
  0x3c   : > { %325 = vst [vmem:[#allocation2 + $0x169] sm:$0xff] %v292_v29  ;;  %326 = vst [vmem:[#allocation2 + $0x171] sm:$0xff] %v293_v30 }
  0x3d   : > { %327 = vst [vmem:[#allocation2 + $0x181] sm:$0xff] %v294_v31  ;;  %328 = vst [vmem:[#allocation2 + $0x189] sm:$0xff] %v295_v32 }
  0x3e PF: > { %v3263_v33 = vld [vmem:[%s3930_s1 + $0x40] sm:$0xff]   ;;  %v3265_v35 = vld [vmem:[%s3930_s1 + $0x48] sm:$0xff]   ;;  %v3267_v37 = vld [vmem:[%s3930_s1 + $0x50] sm:$0xff]   ;;  %s2342_s29 = smul.u32 192, %s3357_s12 }
  0x3f   : > { %v3264_v34 = vld [vmem:[%s3930_s1 + $0x100] sm:$0xff]   ;;  %2790 = vmatprep.subr.bf16.mxu1 %v3263_v33  ;;  %v3266_v36 = vld [vmem:[%s3930_s1 + $0x108] sm:$0xff]   ;;  %v3268_v38 = vld [vmem:[%s3930_s1 + $0x110] sm:$0xff]  }
  0x40   : > { %2918 = vmatprep.subr.bf16.mxu0 %v3264_v34  ;;  %2791 = vmatpush3.bf16.msra.mxu1 %v3263_v33  ;;  %v3269_v39 = vld [vmem:[%s3930_s1 + $0x58] sm:$0xff]   ;;  %v3271_v41 = vld [vmem:[%s3930_s1 + $0x60] sm:$0xff]   ;;  %v3273_v43 = vld [vmem:[%s3930_s1 + $0x68] sm:$0xff]   ;;  %s3515_s12 = scalar_lea.vmem [#allocation2], %s2342_s29 }
  0x41   : > { %2919 = vmatpush3.bf16.msra.mxu0 %v3264_v34  ;;  %2792 = vmatprep.subr.bf16.mxu1 %v3265_v35  ;;  %v3270_v40 = vld [vmem:[%s3930_s1 + $0x118] sm:$0xff]   ;;  %v3272_v42 = vld [vmem:[%s3930_s1 + $0x120] sm:$0xff]   ;;  %v3274_v44 = vld [vmem:[%s3930_s1 + $0x128] sm:$0xff]  }
  0x42   : > { %2920 = vmatprep.subr.bf16.mxu0 %v3266_v36  ;;  %v3275_v51 = vld [vmem:[%s3930_s1 + $0x70] sm:$0xff]   ;;  %v3277_v53 = vld [vmem:[%s3930_s1 + $0x78] sm:$0xff]   ;;  %v3279_v55 = vld [vmem:[%s3930_s1] sm:$0xff]  }
  0x43   : > { %v3276_v52 = vld [vmem:[%s3930_s1 + $0x130] sm:$0xff]   ;;  %v3278_v54 = vld [vmem:[%s3930_s1 + $0x138] sm:$0xff]   ;;  %v3280_v58 = vld [vmem:[%s3930_s1 + $0x140] sm:$0xff]  }
  0x44   : > { %2793 = vmatpush3.bf16.msra.mxu1 %v3265_v35  ;;  %v373_v45 = vld [vmem:[%s3515_s12 + $0x1] sm:$0xff]  ;;  %v374_v46 = vld [vmem:[%s3515_s12 + $0x9] sm:$0xff]  ;;  %v2441_v47 = vld [vmem:[%s3515_s12 + $0x19] sm:$0xff] }
  0x45   : > { %2921 = vmatpush3.bf16.msra.mxu0 %v3266_v36  ;;  %2794 = vmatprep.subr.bf16.mxu1 %v3267_v37  ;;  %v389_v48 = vpack.c.bf16 %v374_v46, %v373_v45  ;;  %v2442_v49 = vld [vmem:[%s3515_s12 + $0x21] sm:$0xff]  ;;  %v2443_v56 = vld [vmem:[%s3515_s12 + $0x31] sm:$0xff]  ;;  %v2444_v57 = vld [vmem:[%s3515_s12 + $0x39] sm:$0xff] }
  0x46   : > { %2922 = vmatprep.subr.bf16.mxu0 %v3268_v38  ;;  %v1127_v50 = vpack.c.bf16 %v2442_v49, %v2441_v47  ;;  %v2445_v59 = vld [vmem:[%s3515_s12 + $0x49] sm:$0xff]  ;;  %v3542_v60 = vpack.c.bf16 %v2444_v57, %v2443_v56  ;;  %v2446_v61 = vld [vmem:[%s3515_s12 + $0x51] sm:$0xff]  ;;  %v2447_v2 = vld [vmem:[%s3515_s12 + $0x61] sm:$0xff] }
  0x47   : > { %2806 = vmatprep.mubr.bf16.mxu1 %v389_v48  ;;  %v3281_v62 = vld [vmem:[%s3930_s1 + $0x8] sm:$0xff]   ;;  %v3551_v0 = vpack.c.bf16 %v2446_v61, %v2445_v59  ;;  %v3283_v1 = vld [vmem:[%s3930_s1 + $0x10] sm:$0xff]   ;;  %v2449_v6 = vld [vmem:[%s3515_s12 + $0x79] sm:$0xff] }
  0x48   : > { %2795 = vmatpush3.bf16.msra.mxu1 %v3267_v37  ;;  %2934 = vmatprep.mubr.bf16.mxu0 %v1127_v50  ;;  %v3282_v63 = vld [vmem:[%s3930_s1 + $0x148] sm:$0xff]   ;;  %v3284_v4 = vld [vmem:[%s3930_s1 + $0x150] sm:$0xff]   ;;  %v3285_v8 = vld [vmem:[%s3930_s1 + $0x18] sm:$0xff]  }
  0x49   : > { %2923 = vmatpush3.bf16.msra.mxu0 %v3268_v38  ;;  %2796 = vmatprep.subr.bf16.mxu1 %v3269_v39  ;;  %v2448_v3 = vld [vmem:[%s3515_s12 + $0x69] sm:$0xff]  ;;  %v2450_v7 = vld [vmem:[%s3515_s12 + $0x81] sm:$0xff]  ;;  %v3286_v9 = vld [vmem:[%s3930_s1 + $0x158] sm:$0xff]  }
  0x4a   : > { %2924 = vmatprep.subr.bf16.mxu0 %v3270_v40  ;;  %v3564_v5 = vpack.c.bf16 %v2448_v3, %v2447_v2  ;;  %v3575_v10 = vpack.c.bf16 %v2450_v7, %v2449_v6  ;;  %v3287_v11 = vld [vmem:[%s3930_s1 + $0x20] sm:$0xff]   ;;  %v2451_v12 = vld [vmem:[%s3515_s12 + $0x91] sm:$0xff]  ;;  %v2453_v16 = vld [vmem:[%s3515_s12 + $0xa9] sm:$0xff] }
  0x4b   : > { %v2452_v13 = vld [vmem:[%s3515_s12 + $0x99] sm:$0xff]  ;;  %v2454_v17 = vld [vmem:[%s3515_s12 + $0xb1] sm:$0xff]  ;;  %v3289_v18 = vld [vmem:[%s3930_s1 + $0x28] sm:$0xff]  }
  0x4c   : > { %2797 = vmatpush3.bf16.msra.mxu1 %v3269_v39  ;;  %v3288_v14 = vld [vmem:[%s3930_s1 + $0x160] sm:$0xff]   ;;  %v3588_v15 = vpack.c.bf16 %v2452_v13, %v2451_v12  ;;  %v3290_v19 = vld [vmem:[%s3930_s1 + $0x168] sm:$0xff]   ;;  %v3599_v20 = vpack.c.bf16 %v2454_v17, %v2453_v16  ;;  %v3291_v21 = vld [vmem:[%s3930_s1 + $0x30] sm:$0xff]  }
  0x4d   : > { %2925 = vmatpush3.bf16.msra.mxu0 %v3270_v40  ;;  %2798 = vmatprep.subr.bf16.mxu1 %v3271_v41  ;;  %v2455_v22 = vld [vmem:[%s3515_s12 + $0xc1] sm:$0xff]  ;;  %v2456_v23 = vld [vmem:[%s3515_s12 + $0xc9] sm:$0xff]  ;;  %v3293_v30 = vld [vmem:[%s3930_s1 + $0x38] sm:$0xff]  }
  0x4e   : > { %2926 = vmatprep.subr.bf16.mxu0 %v3272_v42  ;;  %v3292_v24 = vld [vmem:[%s3930_s1 + $0x170] sm:$0xff]   ;;  %v333_v25 = vld [vmem:[%s3515_s12] sm:$0xff]  ;;  %v334_v26 = vld [vmem:[%s3515_s12 + $0x8] sm:$0xff]  ;;  %v3615_v28 = vpack.c.bf16 %v2456_v23, %v2455_v22 }
  0x4f   : > { %v2481_v27 = vld [vmem:[%s3515_s12 + $0x1a] sm:$0xff]  ;;  %v2482_v29 = vld [vmem:[%s3515_s12 + $0x22] sm:$0xff]  ;;  %v349_v32 = vpack.c.bf16 %v334_v26, %v333_v25  ;;  %v2483_v37 = vld [vmem:[%s3515_s12 + $0x32] sm:$0xff] }
  0x50   : > { %2799 = vmatpush3.bf16.msra.mxu1 %v3271_v41  ;;  %v3294_v31 = vld [vmem:[%s3930_s1 + $0x178] sm:$0xff]   ;;  %v3625_v33 = vpack.c.bf16 %v2482_v29, %v2481_v27  ;;  %v336_v35 = vld [vmem:[%s3515_s12 + $0x20] sm:$0xff]  ;;  %v337_v40 = vld [vmem:[%s3515_s12 + $0x30] sm:$0xff] }
  0x51   : > { %2927 = vmatpush3.bf16.msra.mxu0 %v3272_v42  ;;  %2800 = vmatprep.subr.bf16.mxu1 %v3273_v43  ;;  %v335_v34 = vld [vmem:[%s3515_s12 + $0x18] sm:$0xff]  ;;  %v3295_v36 = vld [vmem:[%s3930_s1 + $0x80] sm:$0xff]   ;;  %v3297_v46 = vld [vmem:[%s3930_s1 + $0x88] sm:$0xff]  }
  0x52   : > { %2928 = vmatprep.subr.bf16.mxu0 %v3274_v44  ;;  %v2484_v38 = vld [vmem:[%s3515_s12 + $0x3a] sm:$0xff]  ;;  %v3641_v42 = vpack.c.bf16 %v336_v35, %v335_v34  ;;  %v2486_v45 = vld [vmem:[%s3515_s12 + $0x52] sm:$0xff]  ;;  %v3298_v47 = vld [vmem:[%s3930_s1 + $0x188] sm:$0xff]  }
  0x53   : > { %v3296_v39 = vld [vmem:[%s3930_s1 + $0x180] sm:$0xff]   ;;  %v338_v41 = vld [vmem:[%s3515_s12 + $0x38] sm:$0xff]  ;;  %v339_v49 = vld [vmem:[%s3515_s12 + $0x48] sm:$0xff] }
  0x54   : > { %2801 = vmatpush3.bf16.msra.mxu1 %v3273_v43  ;;  %v2485_v43 = vld [vmem:[%s3515_s12 + $0x4a] sm:$0xff]  ;;  %v3653_v48 = vpack.c.bf16 %v338_v41, %v337_v40  ;;  %v341_v56 = vld [vmem:[%s3515_s12 + $0x60] sm:$0xff]  ;;  %v3301_v59 = vld [vmem:[%s3930_s1 + $0x98] sm:$0xff]  }
  0x55   : > { %2929 = vmatpush3.bf16.msra.mxu0 %v3274_v44  ;;  %2802 = vmatprep.subr.bf16.mxu1 %v3275_v51  ;;  %v3644_v44 = vpack.c.bf16 %v2484_v38, %v2483_v37  ;;  %v342_v57 = vld [vmem:[%s3515_s12 + $0x68] sm:$0xff]  ;;  %v2489_v61 = vld [vmem:[%s3515_s12 + $0x7a] sm:$0xff]  ;;  %v345_v12 = vld [vmem:[%s3515_s12 + $0x90] sm:$0xff] }
  0x56   : > { %2930 = vmatprep.subr.bf16.mxu0 %v3276_v52  ;;  %v3685_v2 = vpack.c.bf16 %v342_v57, %v341_v56  ;;  %v343_v3 = vld [vmem:[%s3515_s12 + $0x78] sm:$0xff]  ;;  %v3303_v7 = vld [vmem:[%s3930_s1 + $0xa0] sm:$0xff]   ;;  %v347_v23 = vld [vmem:[%s3515_s12 + $0xa8] sm:$0xff] }
  0x57   : > { %v346_v16 = vld [vmem:[%s3515_s12 + $0x98] sm:$0xff]  ;;  %v3307_v26 = vld [vmem:[%s3930_s1 + $0xb0] sm:$0xff]   ;;  %v2495_v27 = vld [vmem:[%s3515_s12 + $0xc2] sm:$0xff] }
  0x58   : > { %2803 = vmatpush3.bf16.msra.mxu1 %v3275_v51  ;;  %v3658_v51 = vpack.c.bf16 %v2486_v45, %v2485_v43  ;;  %v3717_v22 = vpack.c.bf16 %v346_v16, %v345_v12  ;;  %v2496_v29 = vld [vmem:[%s3515_s12 + $0xca] sm:$0xff]  ;;  %v3310_v37 = vld [vmem:[%s3930_s1 + $0x1b8] sm:$0xff]   ;;  %v3312_v40 = vld [vmem:[%s3930_s1 + $0x1c0] sm:$0xff]  }
  0x59   : > { %2931 = vmatpush3.bf16.msra.mxu0 %v3276_v52  ;;  %2804 = vmatprep.subr.bf16.mxu1 %v3277_v53  ;;  %v3299_v52 = vld [vmem:[%s3930_s1 + $0x90] sm:$0xff]   ;;  %v3739_v35 = vpack.c.bf16 %v2496_v29, %v2495_v27  ;;  %v3313_v41 = vld [vmem:[%s3930_s1 + $0xc8] sm:$0xff]  }
  0x5a   : > { %2932 = vmatprep.subr.bf16.mxu0 %v3278_v54  ;;  %v705_v34 = vld [vmem:[%s3515_s12 + $0xa] sm:$0xff] }
  0x5b   : > { %v3314_v43 = vld [vmem:[%s3930_s1 + $0x1c8] sm:$0xff]   ;;  %v3315_v45 = vld [vmem:[%s3930_s1 + $0xd0] sm:$0xff]  }
  0x5c   : > { %2805 = vmatpush3.bf16.msra.mxu1 %v3277_v53  ;;  %v2487_v53 = vld [vmem:[%s3515_s12 + $0x62] sm:$0xff]  ;;  %v3323_v57 = vld [vmem:[%s3930_s1 + $0xf0] sm:$0xff]  }
  0x5d   : > { %2933 = vmatpush3.bf16.msra.mxu0 %v3278_v54  ;;  %2822 = vmatprep.subr.bf16.mxu1 %v3279_v55  ;;  %v2488_v54 = vld [vmem:[%s3515_s12 + $0x6a] sm:$0xff] }
  0x5e   : > { %2950 = vmatprep.subr.bf16.mxu0 %v3280_v58 }
  0x5f   : > { %2807 = vmatmul.mubr.bf16.vlgmr.msra.gmra.mrb[0].mxu1 %v1127_v50  ;;  %v340_v50 = vld [vmem:[%s3515_s12 + $0x50] sm:$0xff] }
  0x60   : > { %2935 = vmatmul.mubr.bf16.vlgmr.msra.gmra.mrb[0].mxu0 %v3542_v60  ;;  %2823 = vmatpush3.bf16.msra.mxu1 %v3279_v55  ;;  %v3300_v55 = vld [vmem:[%s3930_s1 + $0x190] sm:$0xff]  }
  0x61   : > { %2951 = vmatpush3.bf16.msra.mxu0 %v3280_v58  ;;  %2824 = vmatprep.subr.bf16.mxu1 %v3281_v62  ;;  %v3673_v58 = vpack.c.bf16 %v340_v50, %v339_v49  ;;  %v3319_v49 = vld [vmem:[%s3930_s1 + $0xe0] sm:$0xff]  }
  0x62   : > { %2952 = vmatprep.subr.bf16.mxu0 %v3282_v63  ;;  %2810 = vmatprep.mubr.bf16.mxu1 %v3542_v60  ;;  %v3320_v50 = vld [vmem:[%s3930_s1 + $0x1e0] sm:$0xff]  }
  0x63   : > { %2938 = vmatprep.mubr.bf16.mxu0 %v3551_v0 }
  0x64   : > { %2825 = vmatpush3.bf16.msra.mxu1 %v3281_v62  ;;  %v3679_v62 = vpack.c.bf16 %v2488_v54, %v2487_v53  ;;  %v2536_v53 = vld [vmem:[%s3515_s12 + $0xc8] sm:$0xff] }
  0x65   : > { %2953 = vmatpush3.bf16.msra.mxu0 %v3282_v63  ;;  %2826 = vmatprep.subr.bf16.mxu1 %v3283_v1  ;;  %v2490_v63 = vld [vmem:[%s3515_s12 + $0x82] sm:$0xff] }
  0x66   : > { %2954 = vmatprep.subr.bf16.mxu0 %v3284_v4  ;;  %v3690_v6 = vpack.c.bf16 %v2490_v63, %v2489_v61  ;;  %v3321_v54 = vld [vmem:[%s3930_s1 + $0xe8] sm:$0xff]   ;;  %v2538_v61 = vld [vmem:[%s3515_s12 + $0xe0] sm:$0xff]  ;;  %v3324_v63 = vld [vmem:[%s3930_s1 + $0x1f0] sm:$0xff]  }
  0x67   : > { %2811 = vmatmul.mubr.bf16.gmra.mrb[4].mxu1 %v3551_v0 }
  0x68   : > { %2939 = vmatmul.mubr.bf16.gmra.mrb[4].mxu0 %v3564_v5  ;;  %2827 = vmatpush3.bf16.msra.mxu1 %v3283_v1  ;;  %v3302_v1 = vld [vmem:[%s3930_s1 + $0x198] sm:$0xff]  }
  0x69   : > { %2955 = vmatpush3.bf16.msra.mxu0 %v3284_v4  ;;  %2828 = vmatprep.subr.bf16.mxu1 %v3285_v8  ;;  %v344_v4 = vld [vmem:[%s3515_s12 + $0x80] sm:$0xff] }
  0x6a   : > { %2956 = vmatprep.subr.bf16.mxu0 %v3286_v9  ;;  %2814 = vmatprep.mubr.bf16.mxu1 %v3564_v5  ;;  %v3704_v13 = vpack.c.bf16 %v344_v4, %v343_v3  ;;  %v3325_v3 = vld [vmem:[%s3930_s1 + $0xf8] sm:$0xff]  }
  0x6b   : > { %2942 = vmatprep.mubr.bf16.mxu0 %v3575_v10  ;;  %v3326_v4 = vld [vmem:[%s3930_s1 + $0x1f8] sm:$0xff]  }
  0x6c   : > { %2829 = vmatpush3.bf16.msra.mxu1 %v3285_v8  ;;  %v2491_v8 = vld [vmem:[%s3515_s12 + $0x92] sm:$0xff] }
  0x6d   : > { %2957 = vmatpush3.bf16.msra.mxu0 %v3286_v9  ;;  %2830 = vmatprep.subr.bf16.mxu1 %v3287_v11  ;;  %v2492_v9 = vld [vmem:[%s3515_s12 + $0x9a] sm:$0xff] }
  0x6e   : > { %2958 = vmatprep.subr.bf16.mxu0 %v3288_v14  ;;  %v3710_v17 = vpack.c.bf16 %v2492_v9, %v2491_v8  ;;  %v3328_v8 = vld [vmem:[%s3930_s1 + $0x208] sm:$0xff]  }
  0x6f   : > { %2815 = vmatmul.mubr.bf16.gmra.mrb[8].mxu1 %v3575_v10 }
  0x70   : > { %2943 = vmatmul.mubr.bf16.gmra.mrb[8].mxu0 %v3588_v15  ;;  %2831 = vmatpush3.bf16.msra.mxu1 %v3287_v11  ;;  %v3304_v11 = vld [vmem:[%s3930_s1 + $0x1a0] sm:$0xff]  }
  0x71   : > { %2959 = vmatpush3.bf16.msra.mxu0 %v3288_v14  ;;  %2832 = vmatprep.subr.bf16.mxu1 %v3289_v18  ;;  %v3305_v14 = vld [vmem:[%s3930_s1 + $0xa8] sm:$0xff]  }
  0x72   : > { %2960 = vmatprep.subr.bf16.mxu0 %v3290_v19  ;;  %2818 = vmatprep.mubr.bf16.mxu1 %v3588_v15 }
  0x73   : > { %2946 = vmatprep.mubr.bf16.mxu0 %v3599_v20 }
  0x74   : > { %2833 = vmatpush3.bf16.msra.mxu1 %v3289_v18  ;;  %v2493_v18 = vld [vmem:[%s3515_s12 + $0xaa] sm:$0xff] }
  0x75   : > { %2961 = vmatpush3.bf16.msra.mxu0 %v3290_v19  ;;  %2834 = vmatprep.subr.bf16.mxu1 %v3291_v21  ;;  %v2494_v19 = vld [vmem:[%s3515_s12 + $0xb2] sm:$0xff] }
  0x76   : > { %2962 = vmatprep.subr.bf16.mxu0 %v3292_v24  ;;  %v3722_v25 = vpack.c.bf16 %v2494_v19, %v2493_v18 }
  0x77   : > { %2819 = vmatmul.mubr.bf16.gmra.mrb[12].mxu1 %v3599_v20 }
  0x78   : > { %2947 = vmatmul.mubr.bf16.gmra.mrb[12].mxu0 %v3615_v28  ;;  %2835 = vmatpush3.bf16.msra.mxu1 %v3291_v21  ;;  %v3306_v21 = vld [vmem:[%s3930_s1 + $0x1a8] sm:$0xff]  }
  0x79   : > { %2963 = vmatpush3.bf16.msra.mxu0 %v3292_v24  ;;  %2836 = vmatprep.subr.bf16.mxu1 %v3293_v30  ;;  %v348_v24 = vld [vmem:[%s3515_s12 + $0xb0] sm:$0xff] }
  0x7a   : > { %2964 = vmatprep.subr.bf16.mxu0 %v3294_v31  ;;  %2838 = vmatprep.mubr.bf16.mxu1 %v349_v32  ;;  %v3736_v32 = vpack.c.bf16 %v348_v24, %v347_v23 }
  0x7b   : > { %2966 = vmatprep.mubr.bf16.mxu0 %v3625_v33 }
  0x7c   : > { %2837 = vmatpush3.bf16.msra.mxu1 %v3293_v30  ;;  %v3308_v30 = vld [vmem:[%s3930_s1 + $0x1b0] sm:$0xff]  }
  0x7d   : > { %2965 = vmatpush3.bf16.msra.mxu0 %v3294_v31  ;;  %2854 = vmatprep.subr.bf16.mxu1 %v3295_v36  ;;  %v704_v31 = vld [vmem:[%s3515_s12 + $0x2] sm:$0xff] }
  0x7e   : > { %2982 = vmatprep.subr.bf16.mxu0 %v3296_v39  ;;  %v720_v38 = vpack.c.bf16 %v705_v34, %v704_v31 }
  0x7f   : > { %2839 = vmatmul.mubr.bf16.vlgmr.msra.gmra.mrb[0].mxu1 %v3641_v42 }
  0x80   : > { %2967 = vmatmul.mubr.bf16.vlgmr.msra.gmra.mrb[0].mxu0 %v3644_v44  ;;  %2855 = vmatpush3.bf16.msra.mxu1 %v3295_v36  ;;  %v3309_v36 = vld [vmem:[%s3930_s1 + $0xb8] sm:$0xff]  }
  0x81   : > { %2983 = vmatpush3.bf16.msra.mxu0 %v3296_v39  ;;  %2856 = vmatprep.subr.bf16.mxu1 %v3297_v46  ;;  %v3311_v39 = vld [vmem:[%s3930_s1 + $0xc0] sm:$0xff]  }
  0x82   : > { %2984 = vmatprep.subr.bf16.mxu0 %v3298_v47  ;;  %2842 = vmatprep.mubr.bf16.mxu1 %v3653_v48 }
  0x83   : > { %2970 = vmatprep.mubr.bf16.mxu0 %v3658_v51 }
  0x84   : > { %2857 = vmatpush3.bf16.msra.mxu1 %v3297_v46  ;;  %v3316_v46 = vld [vmem:[%s3930_s1 + $0x1d0] sm:$0xff]  }
  0x85   : > { %2985 = vmatpush3.bf16.msra.mxu0 %v3298_v47  ;;  %2858 = vmatprep.subr.bf16.mxu1 %v3299_v52  ;;  %v3318_v47 = vld [vmem:[%s3930_s1 + $0x1d8] sm:$0xff]  }
  0x86   : > { %2986 = vmatprep.subr.bf16.mxu0 %v3300_v55 }
  0x87   : > { %2843 = vmatmul.mubr.bf16.gmra.mrb[4].mxu1 %v3673_v58 }
  0x88   : > { %2971 = vmatmul.mubr.bf16.gmra.mrb[4].mxu0 %v3679_v62  ;;  %2859 = vmatpush3.bf16.msra.mxu1 %v3299_v52  ;;  %v2535_v52 = vld [vmem:[%s3515_s12 + $0xc0] sm:$0xff] }
  0x89   : > { %2987 = vmatpush3.bf16.msra.mxu0 %v3300_v55  ;;  %2860 = vmatprep.subr.bf16.mxu1 %v3301_v59  ;;  %v3322_v55 = vld [vmem:[%s3930_s1 + $0x1e8] sm:$0xff]   ;;  %v3797_v56 = vpack.c.bf16 %v2536_v53, %v2535_v52 }
  0x8a   : > { %2988 = vmatprep.subr.bf16.mxu0 %v3302_v1  ;;  %2846 = vmatprep.mubr.bf16.mxu1 %v3685_v2 }
  0x8b   : > { %2974 = vmatprep.mubr.bf16.mxu0 %v3690_v6 }
  0x8c   : > { %2861 = vmatpush3.bf16.msra.mxu1 %v3301_v59  ;;  %v2537_v59 = vld [vmem:[%s3515_s12 + $0xd8] sm:$0xff] }
  0x8d   : > { %2989 = vmatpush3.bf16.msra.mxu0 %v3302_v1  ;;  %2862 = vmatprep.subr.bf16.mxu1 %v3303_v7  ;;  %v1541_v1 = vpack.c.bf16 %v2538_v61, %v2537_v59 }
  0x8e   : > { %2990 = vmatprep.subr.bf16.mxu0 %v3304_v11 }
  0x8f   : > { %2847 = vmatmul.mubr.bf16.gmra.mrb[8].mxu1 %v3704_v13 }
  0x90   : > { %2975 = vmatmul.mubr.bf16.gmra.mrb[8].mxu0 %v3710_v17  ;;  %2863 = vmatpush3.bf16.msra.mxu1 %v3303_v7  ;;  %v3327_v7 = vld [vmem:[%s3930_s1 + $0x200] sm:$0xff]  }
  0x91   : > { %2991 = vmatpush3.bf16.msra.mxu0 %v3304_v11  ;;  %2864 = vmatprep.subr.bf16.mxu1 %v3305_v14 }
  0x92   : > { %2992 = vmatprep.subr.bf16.mxu0 %v3306_v21  ;;  %2850 = vmatprep.mubr.bf16.mxu1 %v3717_v22 }
  0x93   : > { %2978 = vmatprep.mubr.bf16.mxu0 %v3722_v25 }
  0x94   : > { %2865 = vmatpush3.bf16.msra.mxu1 %v3305_v14 }
  0x95   : > { %2993 = vmatpush3.bf16.msra.mxu0 %v3306_v21  ;;  %2866 = vmatprep.subr.bf16.mxu1 %v3307_v26 }
  0x96   : > { %2994 = vmatprep.subr.bf16.mxu0 %v3308_v30 }
  0x97   : > { %2851 = vmatmul.mubr.bf16.gmra.mrb[12].mxu1 %v3736_v32 }
  0x98   : > { %2979 = vmatmul.mubr.bf16.gmra.mrb[12].mxu0 %v3739_v35  ;;  %2867 = vmatpush3.bf16.msra.mxu1 %v3307_v26 }
  0x99   : > { %2995 = vmatpush3.bf16.msra.mxu0 %v3308_v30  ;;  %2868 = vmatprep.subr.bf16.mxu1 %v3309_v36 }
  0x9a   : > { %2996 = vmatprep.subr.bf16.mxu0 %v3310_v37  ;;  %2870 = vmatprep.mubr.bf16.mxu1 %v720_v38 }
  0x9b   : > { %2998 = vmatprep.mubr.bf16.mxu0 %v3653_v48 }
  0x9c   : > { %2869 = vmatpush3.bf16.msra.mxu1 %v3309_v36 }
  0x9d   : > { %2997 = vmatpush3.bf16.msra.mxu0 %v3310_v37  ;;  %2886 = vmatprep.subr.bf16.mxu1 %v3311_v39 }
  0x9e   : > { %3014 = vmatprep.subr.bf16.mxu0 %v3312_v40 }
  0x9f   : > { %2871 = vmatmul.mubr.bf16.vlgmr.msra.gmra.mrb[0].mxu1 %v3625_v33  ;;  %v3317_v33 = vld [vmem:[%s3930_s1 + $0xd8] sm:$0xff]  }
  0xa0   : > { %2999 = vmatmul.mubr.bf16.vlgmr.msra.gmra.mrb[0].mxu0 %v3673_v58  ;;  %2887 = vmatpush3.bf16.msra.mxu1 %v3311_v39 }
  0xa1   : > { %3015 = vmatpush3.bf16.msra.mxu0 %v3312_v40  ;;  %2888 = vmatprep.subr.bf16.mxu1 %v3313_v41 }
  0xa2   : > { %3016 = vmatprep.subr.bf16.mxu0 %v3314_v43  ;;  %2874 = vmatprep.mubr.bf16.mxu1 %v3644_v44 }
  0xa3   : > { %3002 = vmatprep.mubr.bf16.mxu0 %v3685_v2 }
  0xa4   : > { %2889 = vmatpush3.bf16.msra.mxu1 %v3313_v41 }
  0xa5   : > { %3017 = vmatpush3.bf16.msra.mxu0 %v3314_v43  ;;  %2890 = vmatprep.subr.bf16.mxu1 %v3315_v45 }
  0xa6   : > { %3018 = vmatprep.subr.bf16.mxu0 %v3316_v46 }
  0xa7   : > { %2875 = vmatmul.mubr.bf16.gmra.mrb[4].mxu1 %v3658_v51 }
  0xa8   : > { %3003 = vmatmul.mubr.bf16.gmra.mrb[4].mxu0 %v3704_v13  ;;  %2891 = vmatpush3.bf16.msra.mxu1 %v3315_v45 }
  0xa9   : > { %3019 = vmatpush3.bf16.msra.mxu0 %v3316_v46  ;;  %2892 = vmatprep.subr.bf16.mxu1 %v3317_v33 }
  0xaa   : > { %3020 = vmatprep.subr.bf16.mxu0 %v3318_v47  ;;  %2878 = vmatprep.mubr.bf16.mxu1 %v3679_v62 }
  0xab   : > { %3006 = vmatprep.mubr.bf16.mxu0 %v3717_v22 }
  0xac   : > { %2893 = vmatpush3.bf16.msra.mxu1 %v3317_v33 }
  0xad   : > { %3021 = vmatpush3.bf16.msra.mxu0 %v3318_v47  ;;  %2894 = vmatprep.subr.bf16.mxu1 %v3319_v49 }
  0xae   : > { %3022 = vmatprep.subr.bf16.mxu0 %v3320_v50 }
  0xaf   : > { %2879 = vmatmul.mubr.bf16.gmra.mrb[8].mxu1 %v3690_v6 }
  0xb0   : > { %3007 = vmatmul.mubr.bf16.gmra.mrb[8].mxu0 %v3736_v32  ;;  %2895 = vmatpush3.bf16.msra.mxu1 %v3319_v49 }
  0xb1   : > { %3023 = vmatpush3.bf16.msra.mxu0 %v3320_v50  ;;  %2896 = vmatprep.subr.bf16.mxu1 %v3321_v54 }
  0xb2   : > { %3024 = vmatprep.subr.bf16.mxu0 %v3322_v55  ;;  %2882 = vmatprep.mubr.bf16.mxu1 %v3710_v17 }
  0xb3   : > { %3010 = vmatprep.mubr.bf16.mxu0 %v3797_v56 }
  0xb4   : > { %2897 = vmatpush3.bf16.msra.mxu1 %v3321_v54 }
  0xb5   : > { %3025 = vmatpush3.bf16.msra.mxu0 %v3322_v55  ;;  %2898 = vmatprep.subr.bf16.mxu1 %v3323_v57 }
  0xb6   : > { %3026 = vmatprep.subr.bf16.mxu0 %v3324_v63 }
  0xb7   : > { %2883 = vmatmul.mubr.bf16.gmra.mrb[12].mxu1 %v3722_v25 }
  0xb8   : > { %3011 = vmatmul.mubr.bf16.gmra.mrb[12].mxu0 %v1541_v1  ;;  %2899 = vmatpush3.bf16.msra.mxu1 %v3323_v57 }
  0xb9   : > { %3027 = vmatpush3.bf16.msra.mxu0 %v3324_v63  ;;  %2900 = vmatprep.subr.bf16.mxu1 %v3325_v3 }
  0xba   : > { %3028 = vmatprep.subr.bf16.mxu0 %v3326_v4  ;;  %2902 = vmatprep.mubr.bf16.mxu1 %v3641_v42  ;;  %v3329_v42 = vld [vmem:[%s3930_s1 + $0x210] sm:$0xff]  }
  0xbb   : > { %3030 = vmatprep.mubr.bf16.mxu0 %v3542_v60  ;;  %v3330_v60 = vld [vmem:[%s3930_s1 + $0x218] sm:$0xff]  }
  0xbc   : > { %2901 = vmatpush3.bf16.msra.mxu1 %v3325_v3 }
  0xbd   : > { %3029 = vmatpush3.bf16.msra.mxu0 %v3326_v4  ;;  %3078 = vmatprep.subr.bf16.mxu1 %v3327_v7 }
  0xbe   : > { %3046 = vmatprep.subr.bf16.mxu0 %v3327_v7 }
  0xbf   : > { %2903 = vmatmul.mubr.bf16.vlgmr.msra.gmra.mrb[0].mxu1 %v3653_v48  ;;  %v2578_v48 = vld [vmem:[%s3515_s12 + $0xe1] sm:$0xff] }
  0xc0   : > { %3031 = vmatmul.mubr.bf16.vlgmr.msra.gmra.mrb[0].mxu0 %v3551_v0  ;;  %3086 = vmatpush3.bf16.msra.mxu1 %v3327_v7  ;;  %v3331_v0 = vld [vmem:[%s3930_s1 + $0x220] sm:$0xff]  }
  0xc1   : > { %3047 = vmatpush3.bf16.msra.mxu0 %v3327_v7  ;;  %3079 = vmatprep.subr.bf16.mxu1 %v3328_v8 }
  0xc2   : > { %3048 = vmatprep.subr.bf16.mxu0 %v3328_v8  ;;  %2906 = vmatprep.mubr.bf16.mxu1 %v3673_v58 }
  0xc3   : > { %3034 = vmatprep.mubr.bf16.mxu0 %v3564_v5  ;;  %v3332_v5 = vld [vmem:[%s3930_s1 + $0x228] sm:$0xff]  }
  0xc4   : > { %3087 = vmatpush3.bf16.msra.mxu1 %v3328_v8 }
  0xc5   : > { %3049 = vmatpush3.bf16.msra.mxu0 %v3328_v8  ;;  %3080 = vmatprep.subr.bf16.mxu1 %v3329_v42 }
  0xc6   : > { %3050 = vmatprep.subr.bf16.mxu0 %v3329_v42 }
  0xc7   : > { %2907 = vmatmul.mubr.bf16.gmra.mrb[4].mxu1 %v3685_v2  ;;  %v2618_v2 = vld [vmem:[%s3515_s12 + $0xe2] sm:$0xff] }
  0xc8   : > { %3035 = vmatmul.mubr.bf16.gmra.mrb[4].mxu0 %v3575_v10  ;;  %3088 = vmatpush3.bf16.msra.mxu1 %v3329_v42  ;;  %v2577_v10 = vld [vmem:[%s3515_s12 + $0xd9] sm:$0xff] }
  0xc9   : > { %3051 = vmatpush3.bf16.msra.mxu0 %v3329_v42  ;;  %3081 = vmatprep.subr.bf16.mxu1 %v3330_v60  ;;  %v1743_v58 = vpack.c.bf16 %v2578_v48, %v2577_v10 }
  0xca   : > { %3052 = vmatprep.subr.bf16.mxu0 %v3330_v60  ;;  %2910 = vmatprep.mubr.bf16.mxu1 %v3704_v13 }
  0xcb   : > { %3038 = vmatprep.mubr.bf16.mxu0 %v3588_v15  ;;  %v3333_v15 = vld [vmem:[%s3930_s1 + $0x230] sm:$0xff]  }
  0xcc   : > { %3089 = vmatpush3.bf16.msra.mxu1 %v3330_v60 }
  0xcd   : > { %3053 = vmatpush3.bf16.msra.mxu0 %v3330_v60  ;;  %3082 = vmatprep.subr.bf16.mxu1 %v3331_v0 }
  0xce   : > { %3054 = vmatprep.subr.bf16.mxu0 %v3331_v0 }
  0xcf   : > { %2911 = vmatmul.mubr.bf16.gmra.mrb[8].mxu1 %v3717_v22 }
  0xd0   : > { %3039 = vmatmul.mubr.bf16.gmra.mrb[8].mxu0 %v3599_v20  ;;  %3090 = vmatpush3.bf16.msra.mxu1 %v3331_v0  ;;  %v3334_v20 = vld [vmem:[%s3930_s1 + $0x238] sm:$0xff]  }
  0xd1   : > { %3055 = vmatpush3.bf16.msra.mxu0 %v3331_v0  ;;  %3083 = vmatprep.subr.bf16.mxu1 %v3332_v5 }
  0xd2   : > { %3056 = vmatprep.subr.bf16.mxu0 %v3332_v5  ;;  %2914 = vmatprep.mubr.bf16.mxu1 %v3736_v32 }
  0xd3   : > { %3042 = vmatprep.mubr.bf16.mxu0 %v3615_v28  ;;  %v2617_v28 = vld [vmem:[%s3515_s12 + $0xda] sm:$0xff] }
  0xd4   : > { %3091 = vmatpush3.bf16.msra.mxu1 %v3332_v5  ;;  %v1945_v9 = vpack.c.bf16 %v2618_v2, %v2617_v28 }
  0xd5   : > { %3057 = vmatpush3.bf16.msra.mxu0 %v3332_v5  ;;  %3084 = vmatprep.subr.bf16.mxu1 %v3333_v15 }
  0xd6   : > { %3058 = vmatprep.subr.bf16.mxu0 %v3333_v15 }
  0xd7   : > { %2915 = vmatmul.mubr.bf16.gmra.mrb[12].mxu1 %v3797_v56 }
  0xd8   : > { %3043 = vmatmul.mubr.bf16.gmra.mrb[12].mxu0 %v1743_v58  ;;  %3092 = vmatpush3.bf16.msra.mxu1 %v3333_v15 }
  0xd9   : > { %3059 = vmatpush3.bf16.msra.mxu0 %v3333_v15  ;;  %3085 = vmatprep.subr.bf16.mxu1 %v3334_v20 }
  0xda   : > { %3060 = vmatprep.subr.bf16.mxu0 %v3334_v20  ;;  %3062 = vmatprep.mubr.bf16.mxu0 %v3644_v44 }
  0xdb   : > { %3070 = vmatprep.mubr.bf16.mxu1 %v3710_v17 }
  0xdc   : > { %3093 = vmatpush3.bf16.msra.mxu1 %v3334_v20 }
  0xdd   : > { %3061 = vmatpush3.bf16.msra.mxu0 %v3334_v20 }
  0xdf   : > { %3071 = vmatmul.mubr.bf16.vlgmr.msra.gmra.mrb[16].mxu1 %v3722_v25 }
  0xe0   : > { %3063 = vmatmul.mubr.bf16.vlgmr.msra.gmra.mrb[0].mxu0 %v3658_v51  ;;  %3074 = vmatprep.mubr.bf16.mxu1 %v3739_v35 }
  0xe1   : > { %3066 = vmatprep.mubr.bf16.mxu0 %v3679_v62 }
  0xe7   : > { %3075 = vmatmul.mubr.bf16.gmra.mrb[20].mxu1 %v1945_v9 }
  0xe8   : > { %3067 = vmatmul.mubr.bf16.gmra.mrb[4].mxu0 %v3690_v6 }
 0x192   : > { %v2904_v11 = vpop.f32.mrb[0].mxu1 }
 0x193   : > { %v1032_v44 = vpop.f32.mrb[1].mxu1 }
 0x194   : > { %v2905_v12 = vpop.f32.mrb[2].mxu1 }
 0x195   : > { %v1035_v13 = vpop.f32.mrb[3].mxu1 }
 0x19a   : > { %v2908_v14 = vpop.f32.mrb[4].mxu1 }
 0x19b   : > { %v3867_v16 = vpop.f32.mrb[5].mxu1 }
 0x19c   : > { %v3869_v17 = vpop.f32.mrb[6].mxu1 }
 0x19d   : > { %v3871_v51 = vpop.f32.mrb[7].mxu1 }
 0x1a2   : > { %v2912_v18 = vpop.f32.mrb[8].mxu1 }
 0x1a3   : > { %v3040_v19 = vpop.f32.mrb[8].mxu0  ;;  %v1064_v21 = vpop.f32.mrb[9].mxu1 }
 0x1a4   : > { %v3102_v22 = vadd.f32 %v3040_v19, %v2912_v18  ;;  %v1875_v62 = vpop.f32.mrb[9].mxu0  ;;  %v2913_v23 = vpop.f32.mrb[10].mxu1 }
 0x1a5   : > { %v3104_v24 = vadd.f32 %v1875_v62, %v1064_v21  ;;  %v3041_v25 = vpop.f32.mrb[10].mxu0  ;;  %v1067_v6 = vpop.f32.mrb[11].mxu1 }
 0x1a6   : > { %v3106_v26 = vadd.f32 %v3041_v25, %v2913_v23  ;;  %v1878_v27 = vpop.f32.mrb[11].mxu0 }
 0x1a7   : > { %v3108_v29 = vadd.f32 %v1878_v27, %v1067_v6 }
 0x1aa   : > { %v2916_v30 = vpop.f32.mrb[12].mxu1 }
 0x1ab   : > { %v3044_v31 = vpop.f32.mrb[12].mxu0  ;;  %v1080_v32 = vpop.f32.mrb[13].mxu1 }
 0x1ac   : > { %v3110_v34 = vadd.f32 %v3044_v31, %v2916_v30  ;;  %v1891_v35 = vpop.f32.mrb[13].mxu0  ;;  %v2917_v36 = vpop.f32.mrb[14].mxu1 }
 0x1ad   : > { %v3112_v37 = vadd.f32 %v1891_v35, %v1080_v32  ;;  %v3045_v38 = vpop.f32.mrb[14].mxu0  ;;  %v1083_v39 = vpop.f32.mrb[15].mxu1 }
 0x1ae   : > { %v3114_v40 = vadd.f32 %v3045_v38, %v2917_v36  ;;  %v1894_v41 = vpop.f32.mrb[15].mxu0 }
 0x1af   : > { %v3116_v43 = vadd.f32 %v1894_v41, %v1083_v39 }
 0x1b2   : > { %v3072_v45 = vpop.f32.mrb[16].mxu1 }
 0x1b3   : > { %v3064_v46 = vpop.f32.mrb[0].mxu0  ;;  %v3873_v33 = vadd.f32 %v3102_v22, %v3072_v45  ;;  %v2077_v47 = vpop.f32.mrb[17].mxu1 }
 0x1b4   : > { %v3094_v49 = vadd.f32 %v3064_v46, %v2904_v11  ;;  %v2045_v50 = vpop.f32.mrb[1].mxu0  ;;  %v3875_v52 = vadd.f32 %v3104_v24, %v2077_v47  ;;  %v3073_v53 = vpop.f32.mrb[18].mxu1 }
 0x1b5   : > { %2134 = vst [vmem:[%s3437_s30 + $0x50] sm:$0xff] %v3873_v33  ;;  %v3095_v54 = vadd.f32 %v2045_v50, %v1032_v44  ;;  %v3065_v55 = vpop.f32.mrb[2].mxu0  ;;  %v3879_v56 = vadd.f32 %v3106_v26, %v3073_v53  ;;  %v2080_v57 = vpop.f32.mrb[19].mxu1  ;;  %v2175_v38 = vmul.f32 %v3873_v33, %v3873_v33 }
 0x1b6   : > { %2126 = vst [vmem:[%s3437_s30 + $0x10] sm:$0xff] %v3094_v49  ;;  %2132 = vst [vmem:[%s3437_s30 + $0x40] sm:$0xff] %v3875_v52  ;;  %v3096_v59 = vadd.f32 %v3065_v55, %v2905_v12  ;;  %v2048_v61 = vpop.f32.mrb[3].mxu0  ;;  %v3109_v63 = vadd.f32 %v3108_v29, %v2080_v57  ;;  %v2167_v42 = vmul.f32 %v3094_v49, %v3094_v49 }
 0x1b7   : > { %2124 = vst [vmem:[%s3437_s30] sm:$0xff] %v3095_v54  ;;  %2135 = vst [vmem:[%s3437_s30 + $0x58] sm:$0xff] %v3879_v56  ;;  %v3097_v1 = vadd.f32 %v2048_v61, %v1035_v13  ;;  %v2165_v3 = vmul.f32 %v3095_v54, %v3095_v54  ;;  %v2173_v32 = vmul.f32 %v3875_v52, %v3875_v52 }
 0x1b8   : > { %2127 = vst [vmem:[%s3437_s30 + $0x18] sm:$0xff] %v3096_v59  ;;  %2133 = vst [vmem:[%s3437_s30 + $0x48] sm:$0xff] %v3109_v63  ;;  %v2168_v2 = vmul.f32 %v3096_v59, %v3096_v59  ;;  %v2174_v35 = vmul.f32 %v3109_v63, %v3109_v63  ;;  %v2176_v41 = vmul.f32 %v3879_v56, %v3879_v56 }
 0x1b9   : > { %2125 = vst [vmem:[%s3437_s30 + $0x8] sm:$0xff] %v3097_v1  ;;  %v2141_v4 = vadd.f32 %v3097_v1, %v3095_v54  ;;  %v2166_v7 = vmul.f32 %v3097_v1, %v3097_v1 }
 0x1ba   : > { %v3076_v8 = vpop.f32.mrb[20].mxu1 }
 0x1bb   : > { %v2142_v60 = vadd.f32 %v3094_v49, %v2141_v4  ;;  %v2181_v0 = vadd.f32 %v2166_v7, %v2165_v3  ;;  %v3068_v5 = vpop.f32.mrb[4].mxu0  ;;  %v3111_v10 = vadd.f32 %v3110_v34, %v3076_v8  ;;  %v2093_v48 = vpop.f32.mrb[21].mxu1 }
 0x1bc   : > { %v3098_v15 = vadd.f32 %v3068_v5, %v2908_v14  ;;  %v2061_v58 = vpop.f32.mrb[5].mxu0  ;;  %v3113_v20 = vadd.f32 %v3112_v37, %v2093_v48  ;;  %v3077_v28 = vpop.f32.mrb[22].mxu1  ;;  %v2140_v5 = vld [vmem:[%s3442_s6] sm:$0x1] }
 0x1bd   : > { %v2182_v9 = vadd.f32 %v2181_v0, %v2167_v42  ;;  %2138 = vst [vmem:[%s3437_s30 + $0x70] sm:$0xff] %v3111_v10  ;;  %v3099_v11 = vadd.f32 %v2061_v58, %v3867_v16  ;;  %v2143_v44 = vadd.f32 %v3096_v59, %v2142_v60  ;;  %v3069_v12 = vpop.f32.mrb[6].mxu0  ;;  %v2096_v13 = vpop.f32.mrb[23].mxu1  ;;  %v3115_v18 = vadd.f32 %v3114_v40, %v3077_v28 }
 0x1be   : > { %2130 = vst [vmem:[%s3437_s30 + $0x30] sm:$0xff] %v3098_v15  ;;  %2136 = vst [vmem:[%s3437_s30 + $0x60] sm:$0xff] %v3113_v20  ;;  %v3100_v14 = vadd.f32 %v3069_v12, %v3869_v17  ;;  %v2064_v19 = vpop.f32.mrb[7].mxu0  ;;  %v3117_v16 = vadd.f32 %v3116_v43, %v2096_v13  ;;  %v2171_v26 = vmul.f32 %v3098_v15, %v3098_v15 }
 0x1bf   : > { %2128 = vst [vmem:[%s3437_s30 + $0x20] sm:$0xff] %v3099_v11  ;;  %v2144_v21 = vadd.f32 %v3099_v11, %v2143_v44  ;;  %v2169_v22 = vmul.f32 %v3099_v11, %v3099_v11  ;;  %v2183_v62 = vadd.f32 %v2182_v9, %v2168_v2  ;;  %v3101_v23 = vadd.f32 %v2064_v19, %v3871_v51 }
 0x1c0   : > { %2131 = vst [vmem:[%s3437_s30 + $0x38] sm:$0xff] %v3100_v14  ;;  %2139 = vst [vmem:[%s3437_s30 + $0x78] sm:$0xff] %v3115_v18  ;;  %v2172_v17 = vmul.f32 %v3100_v14, %v3100_v14  ;;  %v2177_v46 = vmul.f32 %v3113_v20, %v3113_v20  ;;  %v2179_v54 = vmul.f32 %v3111_v10, %v3111_v10 }
 0x1c1   : > { %v2184_v24 = vadd.f32 %v2183_v62, %v2169_v22  ;;  %2129 = vst [vmem:[%s3437_s30 + $0x28] sm:$0xff] %v3101_v23  ;;  %v2145_v25 = vadd.f32 %v3101_v23, %v2144_v21  ;;  %v2170_v6 = vmul.f32 %v3101_v23, %v3101_v23  ;;  %2137 = vst [vmem:[%s3437_s30 + $0x68] sm:$0xff] %v3117_v16 }
 0x1c2   : > { %v2180_v59 = vmul.f32 %v3115_v18, %v3115_v18 }
 0x1c3   : > { %v2146_v27 = vadd.f32 %v3098_v15, %v2145_v25  ;;  %v2185_v29 = vadd.f32 %v2184_v24, %v2170_v6  ;;  %v2164_v15 = vld [vmem:[%s3442_s6 + $0x1] sm:$0x1] }
 0x1c5   : > { %v2147_v30 = vadd.f32 %v3100_v14, %v2146_v27  ;;  %v2186_v31 = vadd.f32 %v2185_v29, %v2171_v26 }
 0x1c7   : > { %v2148_v34 = vadd.f32 %v3875_v52, %v2147_v30  ;;  %v2187_v51 = vadd.f32 %v2186_v31, %v2172_v17  ;;  %v2178_v52 = vmul.f32 %v3117_v16, %v3117_v16 }
 0x1c9   : > { %v2188_v36 = vadd.f32 %v2187_v51, %v2173_v32  ;;  %v2149_v37 = vadd.f32 %v3109_v63, %v2148_v34 }
 0x1cb   : > { %v2150_v39 = vadd.f32 %v3873_v33, %v2149_v37  ;;  %v2189_v40 = vadd.f32 %v2188_v36, %v2174_v35 }
 0x1cd   : > { %v2151_v43 = vadd.f32 %v3879_v56, %v2150_v39  ;;  %v2190_v45 = vadd.f32 %v2189_v40, %v2175_v38 }
 0x1cf   : > { %v2152_v47 = vadd.f32 %v3113_v20, %v2151_v43  ;;  %v2191_v49 = vadd.f32 %v2190_v45, %v2176_v41 }
 0x1d1   : > { %v2153_v50 = vadd.f32 %v3117_v16, %v2152_v47  ;;  %v2192_v53 = vadd.f32 %v2191_v49, %v2177_v46 }
 0x1d3   : > { %v2154_v55 = vadd.f32 %v3111_v10, %v2153_v50  ;;  %v2193_v57 = vadd.f32 %v2192_v53, %v2178_v52 }
 0x1d5   : > { %v2155_v33 = vadd.f32 %v3115_v18, %v2154_v55  ;;  %v2194_v61 = vadd.f32 %v2193_v57, %v2179_v54 }
 0x1d7   : > { %v2156_v63 = vrot.slane %v2155_v33, 4  ;;  %v2195_v1 = vadd.f32 %v2194_v61, %v2180_v59 }
 0x1d9   : > { %v2157_v3 = vadd.f32 %v2156_v63, %v2155_v33  ;;  %v2196_v56 = vrot.slane %v2195_v1, 4 }
 0x1db   : > { %v2158_v4 = vrot.slane %v2157_v3, 2  ;;  %v2197_v7 = vadd.f32 %v2196_v56, %v2195_v1 }
 0x1dd   : > { %v2159_v8 = vadd.f32 %v2158_v4, %v2157_v3  ;;  %v2198_v42 = vrot.slane %v2197_v7, 2 }
 0x1df   : > { %v2160_v60 = vrot.slane %v2159_v8, 1  ;;  %v2199_v0 = vadd.f32 %v2198_v42, %v2197_v7 }
 0x1e1   : > { %v2161_v48 = vadd.f32 %v2160_v60, %v2159_v8  ;;  %v2200_v10 = vrot.slane %v2199_v0, 1 }
 0x1e3   : > { %v2162_v58 = vadd.f32 %v2161_v48, %v2140_v5  ;;  %v2201_v20 = vadd.f32 %v2200_v10, %v2199_v0 }
 0x1e5   : > { %2163 = vst [vmem:[%s3442_s6] sm:$0x1] %v2162_v58  ;;  %v2202_v28 = vadd.f32 %v2201_v20, %v2164_v15 }
 0x1e7   : > { %2203 = vst [vmem:[%s3442_s6 + $0x1] sm:$0x1] %v2202_v28 }
 0x1e8 PF: > { %s14_s16 = sadd.s32 1, %s3373_s16   ;;  %s3933_s12 = smov %s3365_s14 }
 0x1e9   : > { %p11_p8 = scmp.ge.s32.totalorder %s14_s16, 6   ;;  %s3934_s13 = smov %s3369_s15 }
 0x1ea   : > { %s3935_s14 = smov %s3938_s17  ;;  %s3936_s15 = smov %s3942_s18 }
 0x1eb   :  { %13 = sbr.rel (!%p11_p8) target bundleno = 3 (0x3), region = 86 }

// kernel: basic_block_forward.5
= control target key start
LH: loop header
LB: loop body
LE: loop exit
PB: predicated region body
PF: predicated region fallthrough
CT: control target
= control target key end

     0   :  { %s3572_s18 = smov 0   ;;  %s3574_s19 = smov 0   ;;  %s4179_s0 = inlined_call_operand.vmem [shape: f32[2,16,16,128], index: 0, kind: input, shape index: {}]   ;;  %s4180_s1 = inlined_call_operand.vmem [shape: bf16[9,128,128], index: 1, kind: input, shape index: {}]   ;;  %s4181_s2 = inlined_call_operand.vmem [shape: f32[1,128], index: 2, kind: input, shape index: {}]   ;;  %s4182_s3 = inlined_call_operand.vmem [shape: f32[1,128], index: 3, kind: input, shape index: {}]   ;;  %s4183_s4 = inlined_call_operand.vmem [shape: f32[2,256,128], index: 4, kind: output, shape index: {0}]   ;;  %s4184_s5 = inlined_call_operand.vmem [shape: f32[2,8,128], index: 5, kind: output, shape index: {1}]  }
   0x1   :  { %s3576_s20 = smov 0   ;;  %s3578_s21 = smov 0  }
   0x2   :  { %s3580_s22 = smov 0  }
   0x3 LB: > { %s25_s23 = sadd.s32 1, %s3531_s20  ;;  %s28_s24 = sadd.s32 1, %s3535_s21  ;;  %s3539_s22 = sphi %s3580_s22, %s16_s22   ;;  %s3535_s21 = sphi %s3578_s21, %s4188_s21   ;;  %s3531_s20 = sphi %s3576_s20, %s4187_s20   ;;  %s3527_s19 = sphi %s3574_s19, %s4186_s19   ;;  %s3523_s18 = sphi %s3572_s18, %s4185_s18  }
   0x4   : > { %p26_p0 = scmp.ge.s32.totalorder %s25_s23, 2  ;;  %p2497_p1 = scmp.ge.s32.totalorder %s3539_s22, 1 }
   0x5   : > { %p204_p2 = scmp.lt.s32.totalorder %s3539_s22, 5 }
   0x6   : > { %s4190_s23 = smov (%p26_p0, %s25_s23), 0  ;;  %s4192_s24 = smov (!%p26_p0, %s28_s24), %s3535_s21 }
   0x7   : > { %p205_p3 = pnand %p2497_p1, %p204_p2  ;;  %p30_p4 = scmp.ge.s32.totalorder %s4192_s24, 2 }
   0x8   : > { %p240_p5 = scmp.lt.s32.totalorder (!%p205_p3), %s3527_s19, 1  ;;  %s2500_s25 = sshll.u32 (!%p205_p3), %s3523_s18, 4 }
   0x9   : > { %s4194_s24 = smov (%p30_p4, %s4192_s24), 0  ;;  %208 = sbr.rel (%p205_p3) target bundleno = 488 (0x1e8), region = 36 }
   0xa   : > { %p248_p6 = scmp.lt.s32.totalorder (!%p205_p3), %s2500_s25, 31  ;;  %p2504_p7 = scmp.ne.s32.totalorder (!%p205_p3), %s3523_s18, 0 }
  0x10   : > { %s4196_s19 = smov (!%p240_p5, %s3527_s19), 1  ;;  %s4198_s25 = smov (!%p248_p6, %s2500_s25), 31 }
  0x11   : > { %s2811_s26 = sshll.u32 %s4196_s19, 8  ;;  %s2501_s27 = sshll.u32 %s4196_s19, 5  ;;  %v3625_v1 = vld [vmem:[%s4181_s2] ss:$0 sm:$0xff] (!%p2504_p7)  ;;  %v3541_v3 = vmov (!%p2504_p7), 0.0  }
  0x12   : > { %s3608_s30 = scalar_lea.vmem %s4179_s0, %s2811_s26  ;;  %s251_s6 = sadd.s32 %s2501_s27, %s4198_s25  ;;  %v3630_v2 = vld [vmem:[%s4182_s3] ss:$0 sm:$0xff] (!%p2504_p7)  ;;  %267 = vst [vmem:[#allocation2 + $0x18] sm:$0xff] (!%p2504_p7), %v3541_v3  ;;  %264 = vst [vmem:[#allocation2] sm:$0xff] (!%p2504_p7), %v3541_v3 }
  0x13   : > { %s2502_s7 = sshll.u32 %s251_s6, 3  ;;  %s2503_s8 = sshll.u32 %s4196_s19, 3  ;;  %v318_v0 = vld [vmem:[%s3608_s30] sm:$0xff] (!%p2504_p7)  ;;  %265 = vst [vmem:[#allocation2 + $0x8] sm:$0xff] (!%p2504_p7), %v3541_v3  ;;  %266 = vst [vmem:[#allocation2 + $0x10] sm:$0x3] (!%p2504_p7), %v3541_v3 }
  0x14   : > { %s3613_s11 = scalar_lea.vmem %s4183_s4, %s2502_s7  ;;  %s3618_s14 = scalar_lea.vmem %s4184_s5, %s2503_s8  ;;  %268 = vst [vmem:[#allocation2 + $0x20] sm:$0xff] (!%p2504_p7), %v3541_v3  ;;  %269 = vst [vmem:[#allocation2 + $0x28] sm:$0x3] (!%p2504_p7), %v3541_v3  ;;  %v358_v4 = vmul.f32 (!%p2504_p7), %v3625_v1, %v318_v0  ;;  %v319_v5 = vld [vmem:[%s3608_s30 + $0x8] sm:$0xff] (!%p2504_p7)  ;;  %v320_v6 = vld [vmem:[%s3608_s30 + $0x10] sm:$0xff] (!%p2504_p7) }
  0x15   : > { %263 = sbr.rel (%p2504_p7) target bundleno = 62 (0x3e), region = 40  ;;  %270 = vst [vmem:[#allocation2 + $0x30] sm:$0xff] (!%p2504_p7), %v3541_v3  ;;  %271 = vst [vmem:[#allocation2 + $0x38] sm:$0xff] (!%p2504_p7), %v3541_v3  ;;  %v321_v7 = vld [vmem:[%s3608_s30 + $0x18] sm:$0xff] (!%p2504_p7)  ;;  %v359_v8 = vmul.f32 (!%p2504_p7), %v3625_v1, %v319_v5  ;;  %v360_v9 = vmul.f32 (!%p2504_p7), %v3625_v1, %v320_v6  ;;  %v322_v11 = vld [vmem:[%s3608_s30 + $0x20] sm:$0xff] (!%p2504_p7) }
  0x16   : > { %272 = vst [vmem:[#allocation2 + $0x40] sm:$0x3] (!%p2504_p7), %v3541_v3  ;;  %273 = vst [vmem:[#allocation2 + $0x48] sm:$0xff] (!%p2504_p7), %v3541_v3  ;;  %v361_v10 = vmul.f32 (!%p2504_p7), %v3625_v1, %v321_v7  ;;  %v323_v12 = vld [vmem:[%s3608_s30 + $0x28] sm:$0xff] (!%p2504_p7)  ;;  %v324_v13 = vld [vmem:[%s3608_s30 + $0x30] sm:$0xff] (!%p2504_p7)  ;;  %v396_v14 = vadd.f32 (!%p2504_p7), %v3630_v2, %v358_v4  ;;  %v362_v15 = vmul.f32 (!%p2504_p7), %v3625_v1, %v322_v11 }
  0x17   : > { %274 = vst [vmem:[#allocation2 + $0x50] sm:$0xff] (!%p2504_p7), %v3541_v3  ;;  %275 = vst [vmem:[#allocation2 + $0x58] sm:$0x3] (!%p2504_p7), %v3541_v3  ;;  %v363_v16 = vmul.f32 (!%p2504_p7), %v3625_v1, %v323_v12  ;;  %v364_v17 = vmul.f32 (!%p2504_p7), %v3625_v1, %v324_v13  ;;  %v325_v18 = vld [vmem:[%s3608_s30 + $0x38] sm:$0xff] (!%p2504_p7)  ;;  %v397_v19 = vadd.f32 (!%p2504_p7), %v3630_v2, %v359_v8  ;;  %v326_v23 = vld [vmem:[%s3608_s30 + $0x40] sm:$0xff] (!%p2504_p7) }
  0x18   : > { %276 = vst [vmem:[#allocation2 + $0x60] sm:$0xff] (!%p2504_p7), %v3541_v3  ;;  %277 = vst [vmem:[#allocation2 + $0x68] sm:$0xff] (!%p2504_p7), %v3541_v3  ;;  %v398_v20 = vadd.f32 (!%p2504_p7), %v3630_v2, %v360_v9  ;;  %v399_v21 = vadd.f32 (!%p2504_p7), %v3630_v2, %v361_v10  ;;  %v365_v22 = vmul.f32 (!%p2504_p7), %v3625_v1, %v325_v18  ;;  %v428_v24 = vmax.f32 (!%p2504_p7), %v396_v14, 0.0  ;;  %v327_v28 = vld [vmem:[%s3608_s30 + $0x48] sm:$0xff] (!%p2504_p7)  ;;  %v328_v29 = vld [vmem:[%s3608_s30 + $0x50] sm:$0xff] (!%p2504_p7) }
  0x19   : > { %278 = vst [vmem:[#allocation2 + $0x70] sm:$0x3] (!%p2504_p7), %v3541_v3  ;;  %279 = vst [vmem:[#allocation2 + $0x78] sm:$0xff] (!%p2504_p7), %v3541_v3  ;;  %v400_v25 = vadd.f32 (!%p2504_p7), %v3630_v2, %v362_v15  ;;  %v401_v26 = vadd.f32 (!%p2504_p7), %v3630_v2, %v363_v16  ;;  %v402_v27 = vadd.f32 (!%p2504_p7), %v3630_v2, %v364_v17  ;;  %v329_v30 = vld [vmem:[%s3608_s30 + $0x58] sm:$0xff] (!%p2504_p7)  ;;  %v429_v31 = vmax.f32 (!%p2504_p7), %v397_v19, 0.0  ;;  %v330_v35 = vld [vmem:[%s3608_s30 + $0x60] sm:$0xff] (!%p2504_p7) }
  0x1a   : > { %280 = vst [vmem:[#allocation2 + $0x80] sm:$0xff] (!%p2504_p7), %v3541_v3  ;;  %281 = vst [vmem:[#allocation2 + $0x88] sm:$0x3] (!%p2504_p7), %v3541_v3  ;;  %v430_v32 = vmax.f32 (!%p2504_p7), %v398_v20, 0.0  ;;  %v431_v33 = vmax.f32 (!%p2504_p7), %v399_v21, 0.0  ;;  %v403_v34 = vadd.f32 (!%p2504_p7), %v3630_v2, %v365_v22  ;;  %v331_v36 = vld [vmem:[%s3608_s30 + $0x68] sm:$0xff] (!%p2504_p7)  ;;  %v366_v41 = vmul.f32 (!%p2504_p7), %v3625_v1, %v326_v23 }
  0x1b   : > { %282 = vst [vmem:[#allocation2 + $0x90] sm:$0xff] (!%p2504_p7), %v3541_v3  ;;  %283 = vst [vmem:[#allocation2 + $0x98] sm:$0xff] (!%p2504_p7), %v3541_v3  ;;  %v332_v37 = vld [vmem:[%s3608_s30 + $0x70] sm:$0xff] (!%p2504_p7)  ;;  %v432_v38 = vmax.f32 (!%p2504_p7), %v400_v25, 0.0  ;;  %v433_v39 = vmax.f32 (!%p2504_p7), %v401_v26, 0.0  ;;  %v434_v40 = vmax.f32 (!%p2504_p7), %v402_v27, 0.0  ;;  %v367_v44 = vmul.f32 (!%p2504_p7), %v3625_v1, %v327_v28 }
  0x1c   : > { %284 = vst [vmem:[#allocation2 + $0xa0] sm:$0x3] %v3541_v3  ;;  %285 = vst [vmem:[#allocation2 + $0xa8] sm:$0xff] %v3541_v3  ;;  %v333_v42 = vld [vmem:[%s3608_s30 + $0x78] sm:$0xff]  ;;  %v435_v43 = vmax.f32 %v403_v34, 0.0  ;;  %v368_v45 = vmul.f32 %v3625_v1, %v328_v29  ;;  %v369_v46 = vmul.f32 %v3625_v1, %v329_v30  ;;  %v404_v47 = vadd.f32 %v3630_v2, %v366_v41  ;;  %v334_v55 = vld [vmem:[%s3608_s30 + $0x80] sm:$0xff] }
  0x1d   : > { %286 = vst [vmem:[#allocation2 + $0xb0] sm:$0xff] %v3541_v3  ;;  %287 = vst [vmem:[#allocation2 + $0xb8] sm:$0x3] %v3541_v3  ;;  %v370_v48 = vmul.f32 %v3625_v1, %v330_v35  ;;  %v371_v49 = vmul.f32 %v3625_v1, %v331_v36  ;;  %v372_v50 = vmul.f32 %v3625_v1, %v332_v37  ;;  %v335_v60 = vld [vmem:[%s3608_s30 + $0x88] sm:$0xff]  ;;  %v336_v61 = vld [vmem:[%s3608_s30 + $0x90] sm:$0xff] }
  0x1e   : > { %288 = vst [vmem:[#allocation2 + $0xc0] sm:$0xff] %v3541_v3  ;;  %289 = vst [vmem:[#allocation2 + $0xc8] sm:$0xff] %v3541_v3  ;;  %v405_v51 = vadd.f32 %v3630_v2, %v367_v44  ;;  %v406_v52 = vadd.f32 %v3630_v2, %v368_v45  ;;  %v407_v53 = vadd.f32 %v3630_v2, %v369_v46  ;;  %v436_v56 = vmax.f32 %v404_v47, 0.0  ;;  %v337_v62 = vld [vmem:[%s3608_s30 + $0x98] sm:$0xff]  ;;  %v338_v5 = vld [vmem:[%s3608_s30 + $0xa0] sm:$0xff] }
  0x1f   : > { %290 = vst [vmem:[#allocation2 + $0xd0] sm:$0x3] %v3541_v3  ;;  %291 = vst [vmem:[#allocation2 + $0xd8] sm:$0xff] %v3541_v3  ;;  %v373_v54 = vmul.f32 %v3625_v1, %v333_v42  ;;  %v408_v57 = vadd.f32 %v3630_v2, %v370_v48  ;;  %v409_v58 = vadd.f32 %v3630_v2, %v371_v49  ;;  %v339_v6 = vld [vmem:[%s3608_s30 + $0xa8] sm:$0xff]  ;;  %v340_v7 = vld [vmem:[%s3608_s30 + $0xb0] sm:$0xff] }
  0x20   : > { %292 = vst [vmem:[#allocation2 + $0xe0] sm:$0xff] %v3541_v3  ;;  %293 = vst [vmem:[#allocation2 + $0xe8] sm:$0x3] %v3541_v3  ;;  %v410_v59 = vadd.f32 %v3630_v2, %v372_v50  ;;  %v437_v63 = vmax.f32 %v405_v51, 0.0  ;;  %v438_v0 = vmax.f32 %v406_v52, 0.0  ;;  %v374_v11 = vmul.f32 %v3625_v1, %v334_v55  ;;  %v341_v12 = vld [vmem:[%s3608_s30 + $0xb8] sm:$0xff] }
  0x21   : > { %294 = vst [vmem:[#allocation2 + $0xf0] sm:$0xff] %v3541_v3  ;;  %295 = vst [vmem:[#allocation2 + $0xf8] sm:$0xff] %v3541_v3  ;;  %v411_v4 = vadd.f32 %v3630_v2, %v373_v54  ;;  %v440_v8 = vmax.f32 %v408_v57, 0.0  ;;  %v441_v9 = vmax.f32 %v409_v58, 0.0  ;;  %v375_v14 = vmul.f32 %v3625_v1, %v335_v60  ;;  %v342_v25 = vld [vmem:[%s3608_s30 + $0xc0] sm:$0xff]  ;;  %v343_v30 = vld [vmem:[%s3608_s30 + $0xc8] sm:$0xff] }
  0x22   : > { %296 = vst [vmem:[#allocation2 + $0x100] sm:$0x3] %v3541_v3  ;;  %297 = vst [vmem:[#allocation2 + $0x108] sm:$0xff] %v3541_v3  ;;  %v442_v10 = vmax.f32 %v410_v59, 0.0  ;;  %v376_v15 = vmul.f32 %v3625_v1, %v336_v61  ;;  %v377_v16 = vmul.f32 %v3625_v1, %v337_v62  ;;  %v412_v17 = vadd.f32 %v3630_v2, %v374_v11  ;;  %v346_v37 = vld [vmem:[%s3608_s30 + $0xe0] sm:$0xff]  ;;  %v349_v44 = vld [vmem:[%s3608_s30 + $0xf8] sm:$0xff] }
  0x23   : > { %298 = vst [vmem:[#allocation2 + $0x110] sm:$0xff] %v3541_v3  ;;  %299 = vst [vmem:[#allocation2 + $0x118] sm:$0x3] %v3541_v3  ;;  %v443_v13 = vmax.f32 %v411_v4, 0.0  ;;  %v378_v18 = vmul.f32 %v3625_v1, %v338_v5  ;;  %v379_v19 = vmul.f32 %v3625_v1, %v339_v6  ;;  %v380_v20 = vmul.f32 %v3625_v1, %v340_v7 }
  0x24   : > { %300 = vst [vmem:[#allocation2 + $0x120] sm:$0xff] %v3541_v3  ;;  %301 = vst [vmem:[#allocation2 + $0x128] sm:$0xff] %v3541_v3  ;;  %v413_v21 = vadd.f32 %v3630_v2, %v375_v14  ;;  %v414_v22 = vadd.f32 %v3630_v2, %v376_v15  ;;  %v415_v23 = vadd.f32 %v3630_v2, %v377_v16  ;;  %v444_v26 = vmax.f32 %v412_v17, 0.0 }
  0x25   : > { %302 = vst [vmem:[#allocation2 + $0x130] sm:$0x3] %v3541_v3  ;;  %303 = vst [vmem:[#allocation2 + $0x138] sm:$0xff] %v3541_v3  ;;  %v416_v27 = vadd.f32 %v3630_v2, %v378_v18  ;;  %v417_v28 = vadd.f32 %v3630_v2, %v379_v19  ;;  %v418_v29 = vadd.f32 %v3630_v2, %v380_v20 }
  0x26   : > { %304 = vst [vmem:[#allocation2 + $0x140] sm:$0xff] %v3541_v3  ;;  %305 = vst [vmem:[#allocation2 + $0x148] sm:$0x3] %v3541_v3  ;;  %v446_v34 = vmax.f32 %v414_v22, 0.0  ;;  %v447_v35 = vmax.f32 %v415_v23, 0.0  ;;  %v383_v46 = vmul.f32 %v3625_v1, %v343_v30  ;;  %v386_v50 = vmul.f32 %v3625_v1, %v346_v37 }
  0x27   : > { %306 = vst [vmem:[#allocation2 + $0x150] sm:$0xff] %v3541_v3  ;;  %307 = vst [vmem:[#allocation2 + $0x158] sm:$0xff] %v3541_v3  ;;  %v449_v41 = vmax.f32 %v417_v28, 0.0  ;;  %v450_v42 = vmax.f32 %v418_v29, 0.0 }
  0x28   : > { %308 = vst [vmem:[#allocation2 + $0x160] sm:$0x3] %v3541_v3  ;;  %309 = vst [vmem:[#allocation2 + $0x168] sm:$0xff] %v3541_v3  ;;  %v424_v58 = vadd.f32 %v3630_v2, %v386_v50 }
  0x29   : > { %310 = vst [vmem:[#allocation2 + $0x170] sm:$0xff] %v3541_v3  ;;  %311 = vst [vmem:[#allocation2 + $0x178] sm:$0x3] %v3541_v3 }
  0x2a   : > { %312 = vst [vmem:[#allocation2 + $0x180] sm:$0xff] %v3541_v3  ;;  %313 = vst [vmem:[#allocation2 + $0x188] sm:$0xff] %v3541_v3 }
  0x2b   : > { %314 = vst [vmem:[#allocation2 + $0x190] sm:$0x3] %v3541_v3  ;;  %315 = vst [vmem:[#allocation2 + $0x198] sm:$0xff] %v3541_v3 }
  0x2c   : > { %316 = vst [vmem:[#allocation2 + $0x1a0] sm:$0xff] %v3541_v3  ;;  %317 = vst [vmem:[#allocation2 + $0x1a8] sm:$0x3] %v3541_v3 }
  0x2d   : > { %493 = vst [vmem:[%s3618_s14] sm:$0xff] %v3541_v3  ;;  %461 = vst [vmem:[#allocation2 + $0x19] sm:$0xff] %v428_v24  ;;  %v439_v3 = vmax.f32 %v407_v53, 0.0  ;;  %v381_v24 = vmul.f32 %v3625_v1, %v341_v12  ;;  %v421_v53 = vadd.f32 %v3630_v2, %v383_v46 }
  0x2e   : > { %462 = vst [vmem:[#allocation2 + $0x21] sm:$0xff] %v429_v31  ;;  %463 = vst [vmem:[#allocation2 + $0x31] sm:$0xff] %v430_v32  ;;  %v344_v31 = vld [vmem:[%s3608_s30 + $0xd0] sm:$0xff]  ;;  %v345_v32 = vld [vmem:[%s3608_s30 + $0xd8] sm:$0xff] }
  0x2f   : > { %464 = vst [vmem:[#allocation2 + $0x39] sm:$0xff] %v431_v33  ;;  %465 = vst [vmem:[#allocation2 + $0x49] sm:$0xff] %v432_v38  ;;  %v445_v33 = vmax.f32 %v413_v21, 0.0  ;;  %v419_v36 = vadd.f32 %v3630_v2, %v381_v24  ;;  %v347_v38 = vld [vmem:[%s3608_s30 + $0xe8] sm:$0xff]  ;;  %v384_v47 = vmul.f32 %v3625_v1, %v344_v31  ;;  %v385_v48 = vmul.f32 %v3625_v1, %v345_v32 }
  0x30   : > { %466 = vst [vmem:[#allocation2 + $0x51] sm:$0xff] %v433_v39  ;;  %467 = vst [vmem:[#allocation2 + $0x61] sm:$0xff] %v434_v40  ;;  %v348_v39 = vld [vmem:[%s3608_s30 + $0xf0] sm:$0xff]  ;;  %v448_v40 = vmax.f32 %v416_v27, 0.0  ;;  %v387_v51 = vmul.f32 %v3625_v1, %v347_v38  ;;  %v453_v61 = vmax.f32 %v421_v53, 0.0 }
  0x31   : > { %468 = vst [vmem:[#allocation2 + $0x69] sm:$0xff] %v435_v43  ;;  %469 = vst [vmem:[#allocation2 + $0x79] sm:$0xff] %v436_v56  ;;  %v382_v43 = vmul.f32 %v3625_v1, %v342_v25  ;;  %v451_v45 = vmax.f32 %v419_v36, 0.0  ;;  %v388_v52 = vmul.f32 %v3625_v1, %v348_v39  ;;  %v422_v54 = vadd.f32 %v3630_v2, %v384_v47 }
  0x32   : > { %470 = vst [vmem:[#allocation2 + $0x81] sm:$0xff] %v437_v63  ;;  %471 = vst [vmem:[#allocation2 + $0x91] sm:$0xff] %v438_v0  ;;  %v423_v55 = vadd.f32 %v3630_v2, %v385_v48  ;;  %v389_v56 = vmul.f32 %v3625_v1, %v349_v44  ;;  %v425_v59 = vadd.f32 %v3630_v2, %v387_v51 }
  0x33   : > { %472 = vst [vmem:[#allocation2 + $0x99] sm:$0xff] %v439_v3  ;;  %473 = vst [vmem:[#allocation2 + $0xa9] sm:$0xff] %v440_v8  ;;  %v420_v49 = vadd.f32 %v3630_v2, %v382_v43  ;;  %v426_v60 = vadd.f32 %v3630_v2, %v388_v52  ;;  %v454_v62 = vmax.f32 %v422_v54, 0.0  ;;  %v456_v3 = vmax.f32 %v424_v58, 0.0 }
  0x34   : > { %474 = vst [vmem:[#allocation2 + $0xb1] sm:$0xff] %v441_v9  ;;  %475 = vst [vmem:[#allocation2 + $0xc1] sm:$0xff] %v442_v10  ;;  %v455_v63 = vmax.f32 %v423_v55, 0.0  ;;  %v427_v0 = vadd.f32 %v3630_v2, %v389_v56  ;;  %v457_v4 = vmax.f32 %v425_v59, 0.0 }
  0x35   : > { %476 = vst [vmem:[#allocation2 + $0xc9] sm:$0xff] %v443_v13  ;;  %477 = vst [vmem:[#allocation2 + $0xd9] sm:$0xff] %v444_v26  ;;  %v452_v57 = vmax.f32 %v420_v49, 0.0  ;;  %v458_v5 = vmax.f32 %v426_v60, 0.0 }
  0x36   : > { %478 = vst [vmem:[#allocation2 + $0xe1] sm:$0xff] %v445_v33  ;;  %479 = vst [vmem:[#allocation2 + $0xf1] sm:$0xff] %v446_v34  ;;  %v459_v1 = vmax.f32 %v427_v0, 0.0 }
  0x37   : > { %480 = vst [vmem:[#allocation2 + $0xf9] sm:$0xff] %v447_v35  ;;  %481 = vst [vmem:[#allocation2 + $0x109] sm:$0xff] %v448_v40 }
  0x38   : > { %482 = vst [vmem:[#allocation2 + $0x111] sm:$0xff] %v449_v41  ;;  %483 = vst [vmem:[#allocation2 + $0x121] sm:$0xff] %v450_v42 }
  0x39   : > { %484 = vst [vmem:[#allocation2 + $0x129] sm:$0xff] %v451_v45  ;;  %485 = vst [vmem:[#allocation2 + $0x139] sm:$0xff] %v452_v57 }
  0x3a   : > { %486 = vst [vmem:[#allocation2 + $0x141] sm:$0xff] %v453_v61  ;;  %487 = vst [vmem:[#allocation2 + $0x151] sm:$0xff] %v454_v62 }
  0x3b   : > { %488 = vst [vmem:[#allocation2 + $0x159] sm:$0xff] %v455_v63  ;;  %489 = vst [vmem:[#allocation2 + $0x169] sm:$0xff] %v456_v3 }
  0x3c   : > { %490 = vst [vmem:[#allocation2 + $0x171] sm:$0xff] %v457_v4  ;;  %491 = vst [vmem:[#allocation2 + $0x181] sm:$0xff] %v458_v5 }
  0x3d   : > { %492 = vst [vmem:[#allocation2 + $0x189] sm:$0xff] %v459_v1 }
  0x3e PF: > { %v3429_v6 = vld [vmem:[%s4180_s1 + $0x40] sm:$0xff]   ;;  %v3431_v7 = vld [vmem:[%s4180_s1 + $0x48] sm:$0xff]   ;;  %v3433_v9 = vld [vmem:[%s4180_s1 + $0x50] sm:$0xff]   ;;  %s2508_s19 = smul.u32 192, %s3523_s18 }
  0x3f   : > { %v3430_v2 = vld [vmem:[%s4180_s1 + $0x100] sm:$0xff]   ;;  %2956 = vmatprep.subr.bf16.mxu1 %v3429_v6  ;;  %v3432_v8 = vld [vmem:[%s4180_s1 + $0x108] sm:$0xff]   ;;  %v3434_v10 = vld [vmem:[%s4180_s1 + $0x110] sm:$0xff]  }
  0x40   : > { %3084 = vmatprep.subr.bf16.mxu0 %v3430_v2  ;;  %2957 = vmatpush3.bf16.msra.mxu1 %v3429_v6  ;;  %v3435_v11 = vld [vmem:[%s4180_s1 + $0x58] sm:$0xff]   ;;  %v3437_v13 = vld [vmem:[%s4180_s1 + $0x60] sm:$0xff]   ;;  %v3439_v15 = vld [vmem:[%s4180_s1 + $0x68] sm:$0xff]   ;;  %s3765_s18 = scalar_lea.vmem [#allocation2], %s2508_s19 }
  0x41   : > { %3085 = vmatpush3.bf16.msra.mxu0 %v3430_v2  ;;  %2958 = vmatprep.subr.bf16.mxu1 %v3431_v7  ;;  %v3436_v12 = vld [vmem:[%s4180_s1 + $0x118] sm:$0xff]   ;;  %v3438_v14 = vld [vmem:[%s4180_s1 + $0x120] sm:$0xff]   ;;  %v3440_v16 = vld [vmem:[%s4180_s1 + $0x128] sm:$0xff]  }
  0x42   : > { %3086 = vmatprep.subr.bf16.mxu0 %v3432_v8  ;;  %v3441_v23 = vld [vmem:[%s4180_s1 + $0x70] sm:$0xff]   ;;  %v3443_v25 = vld [vmem:[%s4180_s1 + $0x78] sm:$0xff]   ;;  %v3445_v27 = vld [vmem:[%s4180_s1] sm:$0xff]  }
  0x43   : > { %v3442_v24 = vld [vmem:[%s4180_s1 + $0x130] sm:$0xff]   ;;  %v3444_v26 = vld [vmem:[%s4180_s1 + $0x138] sm:$0xff]   ;;  %v3446_v30 = vld [vmem:[%s4180_s1 + $0x140] sm:$0xff]  }
  0x44   : > { %2959 = vmatpush3.bf16.msra.mxu1 %v3431_v7  ;;  %v537_v17 = vld [vmem:[%s3765_s18 + $0x1] sm:$0xff]  ;;  %v538_v18 = vld [vmem:[%s3765_s18 + $0x9] sm:$0xff]  ;;  %v2607_v19 = vld [vmem:[%s3765_s18 + $0x19] sm:$0xff] }
  0x45   : > { %3087 = vmatpush3.bf16.msra.mxu0 %v3432_v8  ;;  %2960 = vmatprep.subr.bf16.mxu1 %v3433_v9  ;;  %v553_v20 = vpack.c.bf16 %v538_v18, %v537_v17  ;;  %v2608_v21 = vld [vmem:[%s3765_s18 + $0x21] sm:$0xff]  ;;  %v2609_v28 = vld [vmem:[%s3765_s18 + $0x31] sm:$0xff]  ;;  %v2610_v29 = vld [vmem:[%s3765_s18 + $0x39] sm:$0xff] }
  0x46   : > { %3088 = vmatprep.subr.bf16.mxu0 %v3434_v10  ;;  %v1291_v22 = vpack.c.bf16 %v2608_v21, %v2607_v19  ;;  %v2611_v31 = vld [vmem:[%s3765_s18 + $0x49] sm:$0xff]  ;;  %v3792_v32 = vpack.c.bf16 %v2610_v29, %v2609_v28  ;;  %v2612_v33 = vld [vmem:[%s3765_s18 + $0x51] sm:$0xff]  ;;  %v2613_v38 = vld [vmem:[%s3765_s18 + $0x61] sm:$0xff] }
  0x47   : > { %2972 = vmatprep.mubr.bf16.mxu1 %v553_v20  ;;  %v3447_v34 = vld [vmem:[%s4180_s1 + $0x8] sm:$0xff]   ;;  %v3801_v36 = vpack.c.bf16 %v2612_v33, %v2611_v31  ;;  %v3449_v37 = vld [vmem:[%s4180_s1 + $0x10] sm:$0xff]   ;;  %v2615_v42 = vld [vmem:[%s3765_s18 + $0x79] sm:$0xff] }
  0x48   : > { %2961 = vmatpush3.bf16.msra.mxu1 %v3433_v9  ;;  %3100 = vmatprep.mubr.bf16.mxu0 %v1291_v22  ;;  %v3448_v35 = vld [vmem:[%s4180_s1 + $0x148] sm:$0xff]   ;;  %v3450_v40 = vld [vmem:[%s4180_s1 + $0x150] sm:$0xff]   ;;  %v3451_v44 = vld [vmem:[%s4180_s1 + $0x18] sm:$0xff]  }
  0x49   : > { %3089 = vmatpush3.bf16.msra.mxu0 %v3434_v10  ;;  %2962 = vmatprep.subr.bf16.mxu1 %v3435_v11  ;;  %v2614_v39 = vld [vmem:[%s3765_s18 + $0x69] sm:$0xff]  ;;  %v2616_v43 = vld [vmem:[%s3765_s18 + $0x81] sm:$0xff]  ;;  %v3452_v45 = vld [vmem:[%s4180_s1 + $0x158] sm:$0xff]  }
  0x4a   : > { %3090 = vmatprep.subr.bf16.mxu0 %v3436_v12  ;;  %v3814_v41 = vpack.c.bf16 %v2614_v39, %v2613_v38  ;;  %v3825_v46 = vpack.c.bf16 %v2616_v43, %v2615_v42  ;;  %v3453_v47 = vld [vmem:[%s4180_s1 + $0x20] sm:$0xff]   ;;  %v2617_v48 = vld [vmem:[%s3765_s18 + $0x91] sm:$0xff]  ;;  %v2619_v52 = vld [vmem:[%s3765_s18 + $0xa9] sm:$0xff] }
  0x4b   : > { %v2618_v49 = vld [vmem:[%s3765_s18 + $0x99] sm:$0xff]  ;;  %v2620_v53 = vld [vmem:[%s3765_s18 + $0xb1] sm:$0xff]  ;;  %v3455_v54 = vld [vmem:[%s4180_s1 + $0x28] sm:$0xff]  }
  0x4c   : > { %2963 = vmatpush3.bf16.msra.mxu1 %v3435_v11  ;;  %v3454_v50 = vld [vmem:[%s4180_s1 + $0x160] sm:$0xff]   ;;  %v3838_v51 = vpack.c.bf16 %v2618_v49, %v2617_v48  ;;  %v3456_v55 = vld [vmem:[%s4180_s1 + $0x168] sm:$0xff]   ;;  %v3849_v56 = vpack.c.bf16 %v2620_v53, %v2619_v52  ;;  %v3457_v57 = vld [vmem:[%s4180_s1 + $0x30] sm:$0xff]  }
  0x4d   : > { %3091 = vmatpush3.bf16.msra.mxu0 %v3436_v12  ;;  %2964 = vmatprep.subr.bf16.mxu1 %v3437_v13  ;;  %v2621_v58 = vld [vmem:[%s3765_s18 + $0xc1] sm:$0xff]  ;;  %v2622_v59 = vld [vmem:[%s3765_s18 + $0xc9] sm:$0xff]  ;;  %v3459_v4 = vld [vmem:[%s4180_s1 + $0x38] sm:$0xff]  }
  0x4e   : > { %3092 = vmatprep.subr.bf16.mxu0 %v3438_v14  ;;  %v3458_v60 = vld [vmem:[%s4180_s1 + $0x170] sm:$0xff]   ;;  %v497_v61 = vld [vmem:[%s3765_s18] sm:$0xff]  ;;  %v498_v62 = vld [vmem:[%s3765_s18 + $0x8] sm:$0xff]  ;;  %v3865_v0 = vpack.c.bf16 %v2622_v59, %v2621_v58 }
  0x4f   : > { %v2647_v63 = vld [vmem:[%s3765_s18 + $0x1a] sm:$0xff]  ;;  %v2648_v3 = vld [vmem:[%s3765_s18 + $0x22] sm:$0xff]  ;;  %v513_v1 = vpack.c.bf16 %v498_v62, %v497_v61  ;;  %v2649_v9 = vld [vmem:[%s3765_s18 + $0x32] sm:$0xff] }
  0x50   : > { %2965 = vmatpush3.bf16.msra.mxu1 %v3437_v13  ;;  %v3460_v5 = vld [vmem:[%s4180_s1 + $0x178] sm:$0xff]   ;;  %v3875_v6 = vpack.c.bf16 %v2648_v3, %v2647_v63  ;;  %v500_v7 = vld [vmem:[%s3765_s18 + $0x20] sm:$0xff]  ;;  %v501_v12 = vld [vmem:[%s3765_s18 + $0x30] sm:$0xff] }
  0x51   : > { %3093 = vmatpush3.bf16.msra.mxu0 %v3438_v14  ;;  %2966 = vmatprep.subr.bf16.mxu1 %v3439_v15  ;;  %v499_v2 = vld [vmem:[%s3765_s18 + $0x18] sm:$0xff]  ;;  %v3461_v8 = vld [vmem:[%s4180_s1 + $0x80] sm:$0xff]   ;;  %v3463_v18 = vld [vmem:[%s4180_s1 + $0x88] sm:$0xff]  }
  0x52   : > { %3094 = vmatprep.subr.bf16.mxu0 %v3440_v16  ;;  %v2650_v10 = vld [vmem:[%s3765_s18 + $0x3a] sm:$0xff]  ;;  %v3891_v14 = vpack.c.bf16 %v500_v7, %v499_v2  ;;  %v2652_v17 = vld [vmem:[%s3765_s18 + $0x52] sm:$0xff]  ;;  %v3464_v19 = vld [vmem:[%s4180_s1 + $0x188] sm:$0xff]  }
  0x53   : > { %v3462_v11 = vld [vmem:[%s4180_s1 + $0x180] sm:$0xff]   ;;  %v502_v13 = vld [vmem:[%s3765_s18 + $0x38] sm:$0xff]  ;;  %v503_v21 = vld [vmem:[%s3765_s18 + $0x48] sm:$0xff] }
  0x54   : > { %2967 = vmatpush3.bf16.msra.mxu1 %v3439_v15  ;;  %v2651_v15 = vld [vmem:[%s3765_s18 + $0x4a] sm:$0xff]  ;;  %v3903_v20 = vpack.c.bf16 %v502_v13, %v501_v12  ;;  %v505_v28 = vld [vmem:[%s3765_s18 + $0x60] sm:$0xff]  ;;  %v3467_v31 = vld [vmem:[%s4180_s1 + $0x98] sm:$0xff]  }
  0x55   : > { %3095 = vmatpush3.bf16.msra.mxu0 %v3440_v16  ;;  %2968 = vmatprep.subr.bf16.mxu1 %v3441_v23  ;;  %v3894_v16 = vpack.c.bf16 %v2650_v10, %v2649_v9  ;;  %v506_v29 = vld [vmem:[%s3765_s18 + $0x68] sm:$0xff]  ;;  %v2655_v33 = vld [vmem:[%s3765_s18 + $0x7a] sm:$0xff]  ;;  %v509_v48 = vld [vmem:[%s3765_s18 + $0x90] sm:$0xff] }
  0x56   : > { %3096 = vmatprep.subr.bf16.mxu0 %v3442_v24  ;;  %v3935_v38 = vpack.c.bf16 %v506_v29, %v505_v28  ;;  %v507_v39 = vld [vmem:[%s3765_s18 + $0x78] sm:$0xff]  ;;  %v3469_v43 = vld [vmem:[%s4180_s1 + $0xa0] sm:$0xff]   ;;  %v511_v59 = vld [vmem:[%s3765_s18 + $0xa8] sm:$0xff] }
  0x57   : > { %v510_v52 = vld [vmem:[%s3765_s18 + $0x98] sm:$0xff]  ;;  %v3473_v62 = vld [vmem:[%s4180_s1 + $0xb0] sm:$0xff]   ;;  %v2661_v63 = vld [vmem:[%s3765_s18 + $0xc2] sm:$0xff] }
  0x58   : > { %2969 = vmatpush3.bf16.msra.mxu1 %v3441_v23  ;;  %v3908_v23 = vpack.c.bf16 %v2652_v17, %v2651_v15  ;;  %v3967_v58 = vpack.c.bf16 %v510_v52, %v509_v48  ;;  %v2662_v3 = vld [vmem:[%s3765_s18 + $0xca] sm:$0xff]  ;;  %v3476_v9 = vld [vmem:[%s4180_s1 + $0x1b8] sm:$0xff]   ;;  %v3478_v12 = vld [vmem:[%s4180_s1 + $0x1c0] sm:$0xff]  }
  0x59   : > { %3097 = vmatpush3.bf16.msra.mxu0 %v3442_v24  ;;  %2970 = vmatprep.subr.bf16.mxu1 %v3443_v25  ;;  %v3465_v24 = vld [vmem:[%s4180_s1 + $0x90] sm:$0xff]   ;;  %v3989_v7 = vpack.c.bf16 %v2662_v3, %v2661_v63  ;;  %v3479_v13 = vld [vmem:[%s4180_s1 + $0xc8] sm:$0xff]  }
  0x5a   : > { %3098 = vmatprep.subr.bf16.mxu0 %v3444_v26  ;;  %v869_v2 = vld [vmem:[%s3765_s18 + $0xa] sm:$0xff] }
  0x5b   : > { %v3480_v15 = vld [vmem:[%s4180_s1 + $0x1c8] sm:$0xff]   ;;  %v3481_v17 = vld [vmem:[%s4180_s1 + $0xd0] sm:$0xff]  }
  0x5c   : > { %2971 = vmatpush3.bf16.msra.mxu1 %v3443_v25  ;;  %v2653_v25 = vld [vmem:[%s3765_s18 + $0x62] sm:$0xff]  ;;  %v3489_v29 = vld [vmem:[%s4180_s1 + $0xf0] sm:$0xff]  }
  0x5d   : > { %3099 = vmatpush3.bf16.msra.mxu0 %v3444_v26  ;;  %2988 = vmatprep.subr.bf16.mxu1 %v3445_v27  ;;  %v2654_v26 = vld [vmem:[%s3765_s18 + $0x6a] sm:$0xff] }
  0x5e   : > { %3116 = vmatprep.subr.bf16.mxu0 %v3446_v30 }
  0x5f   : > { %2973 = vmatmul.mubr.bf16.vlgmr.msra.gmra.mrb[0].mxu1 %v1291_v22  ;;  %v504_v22 = vld [vmem:[%s3765_s18 + $0x50] sm:$0xff] }
  0x60   : > { %3101 = vmatmul.mubr.bf16.vlgmr.msra.gmra.mrb[0].mxu0 %v3792_v32  ;;  %2989 = vmatpush3.bf16.msra.mxu1 %v3445_v27  ;;  %v3466_v27 = vld [vmem:[%s4180_s1 + $0x190] sm:$0xff]  }
  0x61   : > { %3117 = vmatpush3.bf16.msra.mxu0 %v3446_v30  ;;  %2990 = vmatprep.subr.bf16.mxu1 %v3447_v34  ;;  %v3923_v30 = vpack.c.bf16 %v504_v22, %v503_v21  ;;  %v3485_v21 = vld [vmem:[%s4180_s1 + $0xe0] sm:$0xff]  }
  0x62   : > { %3118 = vmatprep.subr.bf16.mxu0 %v3448_v35  ;;  %2976 = vmatprep.mubr.bf16.mxu1 %v3792_v32  ;;  %v3486_v22 = vld [vmem:[%s4180_s1 + $0x1e0] sm:$0xff]  }
  0x63   : > { %3104 = vmatprep.mubr.bf16.mxu0 %v3801_v36 }
  0x64   : > { %2991 = vmatpush3.bf16.msra.mxu1 %v3447_v34  ;;  %v3929_v34 = vpack.c.bf16 %v2654_v26, %v2653_v25  ;;  %v2702_v25 = vld [vmem:[%s3765_s18 + $0xc8] sm:$0xff] }
  0x65   : > { %3119 = vmatpush3.bf16.msra.mxu0 %v3448_v35  ;;  %2992 = vmatprep.subr.bf16.mxu1 %v3449_v37  ;;  %v2656_v35 = vld [vmem:[%s3765_s18 + $0x82] sm:$0xff] }
  0x66   : > { %3120 = vmatprep.subr.bf16.mxu0 %v3450_v40  ;;  %v3940_v42 = vpack.c.bf16 %v2656_v35, %v2655_v33  ;;  %v3487_v26 = vld [vmem:[%s4180_s1 + $0xe8] sm:$0xff]   ;;  %v2704_v33 = vld [vmem:[%s3765_s18 + $0xe0] sm:$0xff]  ;;  %v3490_v35 = vld [vmem:[%s4180_s1 + $0x1f0] sm:$0xff]  }
  0x67   : > { %2977 = vmatmul.mubr.bf16.gmra.mrb[4].mxu1 %v3801_v36 }
  0x68   : > { %3105 = vmatmul.mubr.bf16.gmra.mrb[4].mxu0 %v3814_v41  ;;  %2993 = vmatpush3.bf16.msra.mxu1 %v3449_v37  ;;  %v3468_v37 = vld [vmem:[%s4180_s1 + $0x198] sm:$0xff]  }
  0x69   : > { %3121 = vmatpush3.bf16.msra.mxu0 %v3450_v40  ;;  %2994 = vmatprep.subr.bf16.mxu1 %v3451_v44  ;;  %v508_v40 = vld [vmem:[%s3765_s18 + $0x80] sm:$0xff] }
  0x6a   : > { %3122 = vmatprep.subr.bf16.mxu0 %v3452_v45  ;;  %2980 = vmatprep.mubr.bf16.mxu1 %v3814_v41  ;;  %v3954_v49 = vpack.c.bf16 %v508_v40, %v507_v39  ;;  %v3491_v39 = vld [vmem:[%s4180_s1 + $0xf8] sm:$0xff]  }
  0x6b   : > { %3108 = vmatprep.mubr.bf16.mxu0 %v3825_v46  ;;  %v3492_v40 = vld [vmem:[%s4180_s1 + $0x1f8] sm:$0xff]  }
  0x6c   : > { %2995 = vmatpush3.bf16.msra.mxu1 %v3451_v44  ;;  %v2657_v44 = vld [vmem:[%s3765_s18 + $0x92] sm:$0xff] }
  0x6d   : > { %3123 = vmatpush3.bf16.msra.mxu0 %v3452_v45  ;;  %2996 = vmatprep.subr.bf16.mxu1 %v3453_v47  ;;  %v2658_v45 = vld [vmem:[%s3765_s18 + $0x9a] sm:$0xff] }
  0x6e   : > { %3124 = vmatprep.subr.bf16.mxu0 %v3454_v50  ;;  %v3960_v53 = vpack.c.bf16 %v2658_v45, %v2657_v44  ;;  %v3494_v44 = vld [vmem:[%s4180_s1 + $0x208] sm:$0xff]  }
  0x6f   : > { %2981 = vmatmul.mubr.bf16.gmra.mrb[8].mxu1 %v3825_v46 }
  0x70   : > { %3109 = vmatmul.mubr.bf16.gmra.mrb[8].mxu0 %v3838_v51  ;;  %2997 = vmatpush3.bf16.msra.mxu1 %v3453_v47  ;;  %v3470_v47 = vld [vmem:[%s4180_s1 + $0x1a0] sm:$0xff]  }
  0x71   : > { %3125 = vmatpush3.bf16.msra.mxu0 %v3454_v50  ;;  %2998 = vmatprep.subr.bf16.mxu1 %v3455_v54  ;;  %v3471_v50 = vld [vmem:[%s4180_s1 + $0xa8] sm:$0xff]  }
  0x72   : > { %3126 = vmatprep.subr.bf16.mxu0 %v3456_v55  ;;  %2984 = vmatprep.mubr.bf16.mxu1 %v3838_v51 }
  0x73   : > { %3112 = vmatprep.mubr.bf16.mxu0 %v3849_v56 }
  0x74   : > { %2999 = vmatpush3.bf16.msra.mxu1 %v3455_v54  ;;  %v2659_v54 = vld [vmem:[%s3765_s18 + $0xaa] sm:$0xff] }
  0x75   : > { %3127 = vmatpush3.bf16.msra.mxu0 %v3456_v55  ;;  %3000 = vmatprep.subr.bf16.mxu1 %v3457_v57  ;;  %v2660_v55 = vld [vmem:[%s3765_s18 + $0xb2] sm:$0xff] }
  0x76   : > { %3128 = vmatprep.subr.bf16.mxu0 %v3458_v60  ;;  %v3972_v61 = vpack.c.bf16 %v2660_v55, %v2659_v54 }
  0x77   : > { %2985 = vmatmul.mubr.bf16.gmra.mrb[12].mxu1 %v3849_v56 }
  0x78   : > { %3113 = vmatmul.mubr.bf16.gmra.mrb[12].mxu0 %v3865_v0  ;;  %3001 = vmatpush3.bf16.msra.mxu1 %v3457_v57  ;;  %v3472_v57 = vld [vmem:[%s4180_s1 + $0x1a8] sm:$0xff]  }
  0x79   : > { %3129 = vmatpush3.bf16.msra.mxu0 %v3458_v60  ;;  %3002 = vmatprep.subr.bf16.mxu1 %v3459_v4  ;;  %v512_v60 = vld [vmem:[%s3765_s18 + $0xb0] sm:$0xff] }
  0x7a   : > { %3130 = vmatprep.subr.bf16.mxu0 %v3460_v5  ;;  %3004 = vmatprep.mubr.bf16.mxu1 %v513_v1  ;;  %v3986_v1 = vpack.c.bf16 %v512_v60, %v511_v59 }
  0x7b   : > { %3132 = vmatprep.mubr.bf16.mxu0 %v3875_v6 }
  0x7c   : > { %3003 = vmatpush3.bf16.msra.mxu1 %v3459_v4  ;;  %v3474_v4 = vld [vmem:[%s4180_s1 + $0x1b0] sm:$0xff]  }
  0x7d   : > { %3131 = vmatpush3.bf16.msra.mxu0 %v3460_v5  ;;  %3020 = vmatprep.subr.bf16.mxu1 %v3461_v8  ;;  %v868_v5 = vld [vmem:[%s3765_s18 + $0x2] sm:$0xff] }
  0x7e   : > { %3148 = vmatprep.subr.bf16.mxu0 %v3462_v11  ;;  %v884_v10 = vpack.c.bf16 %v869_v2, %v868_v5 }
  0x7f   : > { %3005 = vmatmul.mubr.bf16.vlgmr.msra.gmra.mrb[0].mxu1 %v3891_v14 }
  0x80   : > { %3133 = vmatmul.mubr.bf16.vlgmr.msra.gmra.mrb[0].mxu0 %v3894_v16  ;;  %3021 = vmatpush3.bf16.msra.mxu1 %v3461_v8  ;;  %v3475_v8 = vld [vmem:[%s4180_s1 + $0xb8] sm:$0xff]  }
  0x81   : > { %3149 = vmatpush3.bf16.msra.mxu0 %v3462_v11  ;;  %3022 = vmatprep.subr.bf16.mxu1 %v3463_v18  ;;  %v3477_v11 = vld [vmem:[%s4180_s1 + $0xc0] sm:$0xff]  }
  0x82   : > { %3150 = vmatprep.subr.bf16.mxu0 %v3464_v19  ;;  %3008 = vmatprep.mubr.bf16.mxu1 %v3903_v20 }
  0x83   : > { %3136 = vmatprep.mubr.bf16.mxu0 %v3908_v23 }
  0x84   : > { %3023 = vmatpush3.bf16.msra.mxu1 %v3463_v18  ;;  %v3482_v18 = vld [vmem:[%s4180_s1 + $0x1d0] sm:$0xff]  }
  0x85   : > { %3151 = vmatpush3.bf16.msra.mxu0 %v3464_v19  ;;  %3024 = vmatprep.subr.bf16.mxu1 %v3465_v24  ;;  %v3484_v19 = vld [vmem:[%s4180_s1 + $0x1d8] sm:$0xff]  }
  0x86   : > { %3152 = vmatprep.subr.bf16.mxu0 %v3466_v27 }
  0x87   : > { %3009 = vmatmul.mubr.bf16.gmra.mrb[4].mxu1 %v3923_v30 }
  0x88   : > { %3137 = vmatmul.mubr.bf16.gmra.mrb[4].mxu0 %v3929_v34  ;;  %3025 = vmatpush3.bf16.msra.mxu1 %v3465_v24  ;;  %v2701_v24 = vld [vmem:[%s3765_s18 + $0xc0] sm:$0xff] }
  0x89   : > { %3153 = vmatpush3.bf16.msra.mxu0 %v3466_v27  ;;  %3026 = vmatprep.subr.bf16.mxu1 %v3467_v31  ;;  %v3488_v27 = vld [vmem:[%s4180_s1 + $0x1e8] sm:$0xff]   ;;  %v4047_v28 = vpack.c.bf16 %v2702_v25, %v2701_v24 }
  0x8a   : > { %3154 = vmatprep.subr.bf16.mxu0 %v3468_v37  ;;  %3012 = vmatprep.mubr.bf16.mxu1 %v3935_v38 }
  0x8b   : > { %3140 = vmatprep.mubr.bf16.mxu0 %v3940_v42 }
  0x8c   : > { %3027 = vmatpush3.bf16.msra.mxu1 %v3467_v31  ;;  %v2703_v31 = vld [vmem:[%s3765_s18 + $0xd8] sm:$0xff] }
  0x8d   : > { %3155 = vmatpush3.bf16.msra.mxu0 %v3468_v37  ;;  %3028 = vmatprep.subr.bf16.mxu1 %v3469_v43  ;;  %v1705_v37 = vpack.c.bf16 %v2704_v33, %v2703_v31 }
  0x8e   : > { %3156 = vmatprep.subr.bf16.mxu0 %v3470_v47 }
  0x8f   : > { %3013 = vmatmul.mubr.bf16.gmra.mrb[8].mxu1 %v3954_v49 }
  0x90   : > { %3141 = vmatmul.mubr.bf16.gmra.mrb[8].mxu0 %v3960_v53  ;;  %3029 = vmatpush3.bf16.msra.mxu1 %v3469_v43  ;;  %v3493_v43 = vld [vmem:[%s4180_s1 + $0x200] sm:$0xff]  }
  0x91   : > { %3157 = vmatpush3.bf16.msra.mxu0 %v3470_v47  ;;  %3030 = vmatprep.subr.bf16.mxu1 %v3471_v50 }
  0x92   : > { %3158 = vmatprep.subr.bf16.mxu0 %v3472_v57  ;;  %3016 = vmatprep.mubr.bf16.mxu1 %v3967_v58 }
  0x93   : > { %3144 = vmatprep.mubr.bf16.mxu0 %v3972_v61 }
  0x94   : > { %3031 = vmatpush3.bf16.msra.mxu1 %v3471_v50 }
  0x95   : > { %3159 = vmatpush3.bf16.msra.mxu0 %v3472_v57  ;;  %3032 = vmatprep.subr.bf16.mxu1 %v3473_v62 }
  0x96   : > { %3160 = vmatprep.subr.bf16.mxu0 %v3474_v4 }
  0x97   : > { %3017 = vmatmul.mubr.bf16.gmra.mrb[12].mxu1 %v3986_v1 }
  0x98   : > { %3145 = vmatmul.mubr.bf16.gmra.mrb[12].mxu0 %v3989_v7  ;;  %3033 = vmatpush3.bf16.msra.mxu1 %v3473_v62 }
  0x99   : > { %3161 = vmatpush3.bf16.msra.mxu0 %v3474_v4  ;;  %3034 = vmatprep.subr.bf16.mxu1 %v3475_v8 }
  0x9a   : > { %3162 = vmatprep.subr.bf16.mxu0 %v3476_v9  ;;  %3036 = vmatprep.mubr.bf16.mxu1 %v884_v10 }
  0x9b   : > { %3164 = vmatprep.mubr.bf16.mxu0 %v3903_v20 }
  0x9c   : > { %3035 = vmatpush3.bf16.msra.mxu1 %v3475_v8 }
  0x9d   : > { %3163 = vmatpush3.bf16.msra.mxu0 %v3476_v9  ;;  %3052 = vmatprep.subr.bf16.mxu1 %v3477_v11 }
  0x9e   : > { %3180 = vmatprep.subr.bf16.mxu0 %v3478_v12 }
  0x9f   : > { %3037 = vmatmul.mubr.bf16.vlgmr.msra.gmra.mrb[0].mxu1 %v3875_v6  ;;  %v3483_v6 = vld [vmem:[%s4180_s1 + $0xd8] sm:$0xff]  }
  0xa0   : > { %3165 = vmatmul.mubr.bf16.vlgmr.msra.gmra.mrb[0].mxu0 %v3923_v30  ;;  %3053 = vmatpush3.bf16.msra.mxu1 %v3477_v11 }
  0xa1   : > { %3181 = vmatpush3.bf16.msra.mxu0 %v3478_v12  ;;  %3054 = vmatprep.subr.bf16.mxu1 %v3479_v13 }
  0xa2   : > { %3182 = vmatprep.subr.bf16.mxu0 %v3480_v15  ;;  %3040 = vmatprep.mubr.bf16.mxu1 %v3894_v16 }
  0xa3   : > { %3168 = vmatprep.mubr.bf16.mxu0 %v3935_v38 }
  0xa4   : > { %3055 = vmatpush3.bf16.msra.mxu1 %v3479_v13 }
  0xa5   : > { %3183 = vmatpush3.bf16.msra.mxu0 %v3480_v15  ;;  %3056 = vmatprep.subr.bf16.mxu1 %v3481_v17 }
  0xa6   : > { %3184 = vmatprep.subr.bf16.mxu0 %v3482_v18 }
  0xa7   : > { %3041 = vmatmul.mubr.bf16.gmra.mrb[4].mxu1 %v3908_v23 }
  0xa8   : > { %3169 = vmatmul.mubr.bf16.gmra.mrb[4].mxu0 %v3954_v49  ;;  %3057 = vmatpush3.bf16.msra.mxu1 %v3481_v17 }
  0xa9   : > { %3185 = vmatpush3.bf16.msra.mxu0 %v3482_v18  ;;  %3058 = vmatprep.subr.bf16.mxu1 %v3483_v6 }
  0xaa   : > { %3186 = vmatprep.subr.bf16.mxu0 %v3484_v19  ;;  %3044 = vmatprep.mubr.bf16.mxu1 %v3929_v34 }
  0xab   : > { %3172 = vmatprep.mubr.bf16.mxu0 %v3967_v58 }
  0xac   : > { %3059 = vmatpush3.bf16.msra.mxu1 %v3483_v6 }
  0xad   : > { %3187 = vmatpush3.bf16.msra.mxu0 %v3484_v19  ;;  %3060 = vmatprep.subr.bf16.mxu1 %v3485_v21 }
  0xae   : > { %3188 = vmatprep.subr.bf16.mxu0 %v3486_v22 }
  0xaf   : > { %3045 = vmatmul.mubr.bf16.gmra.mrb[8].mxu1 %v3940_v42 }
  0xb0   : > { %3173 = vmatmul.mubr.bf16.gmra.mrb[8].mxu0 %v3986_v1  ;;  %3061 = vmatpush3.bf16.msra.mxu1 %v3485_v21 }
  0xb1   : > { %3189 = vmatpush3.bf16.msra.mxu0 %v3486_v22  ;;  %3062 = vmatprep.subr.bf16.mxu1 %v3487_v26 }
  0xb2   : > { %3190 = vmatprep.subr.bf16.mxu0 %v3488_v27  ;;  %3048 = vmatprep.mubr.bf16.mxu1 %v3960_v53 }
  0xb3   : > { %3176 = vmatprep.mubr.bf16.mxu0 %v4047_v28 }
  0xb4   : > { %3063 = vmatpush3.bf16.msra.mxu1 %v3487_v26 }
  0xb5   : > { %3191 = vmatpush3.bf16.msra.mxu0 %v3488_v27  ;;  %3064 = vmatprep.subr.bf16.mxu1 %v3489_v29 }
  0xb6   : > { %3192 = vmatprep.subr.bf16.mxu0 %v3490_v35 }
  0xb7   : > { %3049 = vmatmul.mubr.bf16.gmra.mrb[12].mxu1 %v3972_v61 }
  0xb8   : > { %3177 = vmatmul.mubr.bf16.gmra.mrb[12].mxu0 %v1705_v37  ;;  %3065 = vmatpush3.bf16.msra.mxu1 %v3489_v29 }
  0xb9   : > { %3193 = vmatpush3.bf16.msra.mxu0 %v3490_v35  ;;  %3066 = vmatprep.subr.bf16.mxu1 %v3491_v39 }
  0xba   : > { %3194 = vmatprep.subr.bf16.mxu0 %v3492_v40  ;;  %3068 = vmatprep.mubr.bf16.mxu1 %v3891_v14  ;;  %v3495_v14 = vld [vmem:[%s4180_s1 + $0x210] sm:$0xff]  }
  0xbb   : > { %3196 = vmatprep.mubr.bf16.mxu0 %v3792_v32  ;;  %v3496_v32 = vld [vmem:[%s4180_s1 + $0x218] sm:$0xff]  }
  0xbc   : > { %3067 = vmatpush3.bf16.msra.mxu1 %v3491_v39 }
  0xbd   : > { %3195 = vmatpush3.bf16.msra.mxu0 %v3492_v40  ;;  %3244 = vmatprep.subr.bf16.mxu1 %v3493_v43 }
  0xbe   : > { %3212 = vmatprep.subr.bf16.mxu0 %v3493_v43 }
  0xbf   : > { %3069 = vmatmul.mubr.bf16.vlgmr.msra.gmra.mrb[0].mxu1 %v3903_v20  ;;  %v2744_v20 = vld [vmem:[%s3765_s18 + $0xe1] sm:$0xff] }
  0xc0   : > { %3197 = vmatmul.mubr.bf16.vlgmr.msra.gmra.mrb[0].mxu0 %v3801_v36  ;;  %3252 = vmatpush3.bf16.msra.mxu1 %v3493_v43  ;;  %v3497_v36 = vld [vmem:[%s4180_s1 + $0x220] sm:$0xff]  }
  0xc1   : > { %3213 = vmatpush3.bf16.msra.mxu0 %v3493_v43  ;;  %3245 = vmatprep.subr.bf16.mxu1 %v3494_v44 }
  0xc2   : > { %3214 = vmatprep.subr.bf16.mxu0 %v3494_v44  ;;  %3072 = vmatprep.mubr.bf16.mxu1 %v3923_v30 }
  0xc3   : > { %3200 = vmatprep.mubr.bf16.mxu0 %v3814_v41  ;;  %v3498_v41 = vld [vmem:[%s4180_s1 + $0x228] sm:$0xff]  }
  0xc4   : > { %3253 = vmatpush3.bf16.msra.mxu1 %v3494_v44 }
  0xc5   : > { %3215 = vmatpush3.bf16.msra.mxu0 %v3494_v44  ;;  %3246 = vmatprep.subr.bf16.mxu1 %v3495_v14 }
  0xc6   : > { %3216 = vmatprep.subr.bf16.mxu0 %v3495_v14 }
  0xc7   : > { %3073 = vmatmul.mubr.bf16.gmra.mrb[4].mxu1 %v3935_v38  ;;  %v2784_v38 = vld [vmem:[%s3765_s18 + $0xe2] sm:$0xff] }
  0xc8   : > { %3201 = vmatmul.mubr.bf16.gmra.mrb[4].mxu0 %v3825_v46  ;;  %3254 = vmatpush3.bf16.msra.mxu1 %v3495_v14  ;;  %v2743_v46 = vld [vmem:[%s3765_s18 + $0xd9] sm:$0xff] }
  0xc9   : > { %3217 = vmatpush3.bf16.msra.mxu0 %v3495_v14  ;;  %3247 = vmatprep.subr.bf16.mxu1 %v3496_v32  ;;  %v1907_v30 = vpack.c.bf16 %v2744_v20, %v2743_v46 }
  0xca   : > { %3218 = vmatprep.subr.bf16.mxu0 %v3496_v32  ;;  %3076 = vmatprep.mubr.bf16.mxu1 %v3954_v49 }
  0xcb   : > { %3204 = vmatprep.mubr.bf16.mxu0 %v3838_v51  ;;  %v3499_v51 = vld [vmem:[%s4180_s1 + $0x230] sm:$0xff]  }
  0xcc   : > { %3255 = vmatpush3.bf16.msra.mxu1 %v3496_v32 }
  0xcd   : > { %3219 = vmatpush3.bf16.msra.mxu0 %v3496_v32  ;;  %3248 = vmatprep.subr.bf16.mxu1 %v3497_v36 }
  0xce   : > { %3220 = vmatprep.subr.bf16.mxu0 %v3497_v36 }
  0xcf   : > { %3077 = vmatmul.mubr.bf16.gmra.mrb[8].mxu1 %v3967_v58 }
  0xd0   : > { %3205 = vmatmul.mubr.bf16.gmra.mrb[8].mxu0 %v3849_v56  ;;  %3256 = vmatpush3.bf16.msra.mxu1 %v3497_v36  ;;  %v3500_v56 = vld [vmem:[%s4180_s1 + $0x238] sm:$0xff]  }
  0xd1   : > { %3221 = vmatpush3.bf16.msra.mxu0 %v3497_v36  ;;  %3249 = vmatprep.subr.bf16.mxu1 %v3498_v41 }
  0xd2   : > { %3222 = vmatprep.subr.bf16.mxu0 %v3498_v41  ;;  %3080 = vmatprep.mubr.bf16.mxu1 %v3986_v1 }
  0xd3   : > { %3208 = vmatprep.mubr.bf16.mxu0 %v3865_v0  ;;  %v2783_v0 = vld [vmem:[%s3765_s18 + $0xda] sm:$0xff] }
  0xd4   : > { %3257 = vmatpush3.bf16.msra.mxu1 %v3498_v41  ;;  %v2109_v45 = vpack.c.bf16 %v2784_v38, %v2783_v0 }
  0xd5   : > { %3223 = vmatpush3.bf16.msra.mxu0 %v3498_v41  ;;  %3250 = vmatprep.subr.bf16.mxu1 %v3499_v51 }
  0xd6   : > { %3224 = vmatprep.subr.bf16.mxu0 %v3499_v51 }
  0xd7   : > { %3081 = vmatmul.mubr.bf16.gmra.mrb[12].mxu1 %v4047_v28 }
  0xd8   : > { %3209 = vmatmul.mubr.bf16.gmra.mrb[12].mxu0 %v1907_v30  ;;  %3258 = vmatpush3.bf16.msra.mxu1 %v3499_v51 }
  0xd9   : > { %3225 = vmatpush3.bf16.msra.mxu0 %v3499_v51  ;;  %3251 = vmatprep.subr.bf16.mxu1 %v3500_v56 }
  0xda   : > { %3226 = vmatprep.subr.bf16.mxu0 %v3500_v56  ;;  %3228 = vmatprep.mubr.bf16.mxu0 %v3894_v16 }
  0xdb   : > { %3236 = vmatprep.mubr.bf16.mxu1 %v3960_v53 }
  0xdc   : > { %3259 = vmatpush3.bf16.msra.mxu1 %v3500_v56 }
  0xdd   : > { %3227 = vmatpush3.bf16.msra.mxu0 %v3500_v56 }
  0xdf   : > { %3237 = vmatmul.mubr.bf16.vlgmr.msra.gmra.mrb[16].mxu1 %v3972_v61 }
  0xe0   : > { %3229 = vmatmul.mubr.bf16.vlgmr.msra.gmra.mrb[0].mxu0 %v3908_v23  ;;  %3240 = vmatprep.mubr.bf16.mxu1 %v3989_v7 }
  0xe1   : > { %3232 = vmatprep.mubr.bf16.mxu0 %v3929_v34 }
  0xe7   : > { %3241 = vmatmul.mubr.bf16.gmra.mrb[20].mxu1 %v2109_v45 }
  0xe8   : > { %3233 = vmatmul.mubr.bf16.gmra.mrb[4].mxu0 %v3940_v42 }
 0x192   : > { %v3070_v47 = vpop.f32.mrb[0].mxu1 }
 0x193   : > { %v1196_v16 = vpop.f32.mrb[1].mxu1 }
 0x194   : > { %v3071_v48 = vpop.f32.mrb[2].mxu1 }
 0x195   : > { %v1199_v49 = vpop.f32.mrb[3].mxu1 }
 0x19a   : > { %v3074_v50 = vpop.f32.mrb[4].mxu1 }
 0x19b   : > { %v4117_v52 = vpop.f32.mrb[5].mxu1 }
 0x19c   : > { %v4119_v53 = vpop.f32.mrb[6].mxu1 }
 0x19d   : > { %v4121_v23 = vpop.f32.mrb[7].mxu1 }
 0x1a2   : > { %v3078_v54 = vpop.f32.mrb[8].mxu1 }
 0x1a3   : > { %v3206_v55 = vpop.f32.mrb[8].mxu0  ;;  %v1228_v57 = vpop.f32.mrb[9].mxu1 }
 0x1a4   : > { %v3268_v58 = vadd.f32 %v3206_v55, %v3078_v54  ;;  %v2039_v34 = vpop.f32.mrb[9].mxu0  ;;  %v3079_v59 = vpop.f32.mrb[10].mxu1 }
 0x1a5   : > { %v3270_v60 = vadd.f32 %v2039_v34, %v1228_v57  ;;  %v3207_v61 = vpop.f32.mrb[10].mxu0  ;;  %v1231_v42 = vpop.f32.mrb[11].mxu1 }
 0x1a6   : > { %v3272_v62 = vadd.f32 %v3207_v61, %v3079_v59  ;;  %v2042_v63 = vpop.f32.mrb[11].mxu0 }
 0x1a7   : > { %v3274_v3 = vadd.f32 %v2042_v63, %v1231_v42 }
 0x1aa   : > { %v3082_v4 = vpop.f32.mrb[12].mxu1 }
 0x1ab   : > { %v3210_v5 = vpop.f32.mrb[12].mxu0  ;;  %v1244_v1 = vpop.f32.mrb[13].mxu1 }
 0x1ac   : > { %v3276_v2 = vadd.f32 %v3210_v5, %v3082_v4  ;;  %v2055_v7 = vpop.f32.mrb[13].mxu0  ;;  %v3083_v8 = vpop.f32.mrb[14].mxu1 }
 0x1ad   : > { %v3278_v9 = vadd.f32 %v2055_v7, %v1244_v1  ;;  %v3211_v10 = vpop.f32.mrb[14].mxu0  ;;  %v1247_v11 = vpop.f32.mrb[15].mxu1 }
 0x1ae   : > { %v3280_v12 = vadd.f32 %v3211_v10, %v3083_v8  ;;  %v2058_v13 = vpop.f32.mrb[15].mxu0 }
 0x1af   : > { %v3282_v15 = vadd.f32 %v2058_v13, %v1247_v11 }
 0x1b2   : > { %v3238_v17 = vpop.f32.mrb[16].mxu1 }
 0x1b3   : > { %v3230_v18 = vpop.f32.mrb[0].mxu0  ;;  %v4123_v6 = vadd.f32 %v3268_v58, %v3238_v17  ;;  %v2241_v19 = vpop.f32.mrb[17].mxu1 }
 0x1b4   : > { %v3260_v21 = vadd.f32 %v3230_v18, %v3070_v47  ;;  %v2209_v22 = vpop.f32.mrb[1].mxu0  ;;  %v4125_v24 = vadd.f32 %v3270_v60, %v2241_v19  ;;  %v3239_v25 = vpop.f32.mrb[18].mxu1 }
 0x1b5   : > { %2298 = vst [vmem:[%s3613_s11 + $0x50] sm:$0xff] %v4123_v6  ;;  %v3261_v26 = vadd.f32 %v2209_v22, %v1196_v16  ;;  %v3231_v27 = vpop.f32.mrb[2].mxu0  ;;  %v4129_v28 = vadd.f32 %v3272_v62, %v3239_v25  ;;  %v2244_v29 = vpop.f32.mrb[19].mxu1  ;;  %v2339_v10 = vmul.f32 %v4123_v6, %v4123_v6 }
 0x1b6   : > { %2290 = vst [vmem:[%s3613_s11 + $0x10] sm:$0xff] %v3260_v21  ;;  %2296 = vst [vmem:[%s3613_s11 + $0x40] sm:$0xff] %v4125_v24  ;;  %v3262_v31 = vadd.f32 %v3231_v27, %v3071_v48  ;;  %v2212_v33 = vpop.f32.mrb[3].mxu0  ;;  %v3275_v35 = vadd.f32 %v3274_v3, %v2244_v29  ;;  %v2331_v14 = vmul.f32 %v3260_v21, %v3260_v21 }
 0x1b7   : > { %2288 = vst [vmem:[%s3613_s11] sm:$0xff] %v3261_v26  ;;  %2299 = vst [vmem:[%s3613_s11 + $0x58] sm:$0xff] %v4129_v28  ;;  %v3263_v37 = vadd.f32 %v2212_v33, %v1199_v49  ;;  %v2329_v39 = vmul.f32 %v3261_v26, %v3261_v26  ;;  %v2337_v1 = vmul.f32 %v4125_v24, %v4125_v24 }
 0x1b8   : > { %2291 = vst [vmem:[%s3613_s11 + $0x18] sm:$0xff] %v3262_v31  ;;  %2297 = vst [vmem:[%s3613_s11 + $0x48] sm:$0xff] %v3275_v35  ;;  %v2332_v38 = vmul.f32 %v3262_v31, %v3262_v31  ;;  %v2338_v7 = vmul.f32 %v3275_v35, %v3275_v35  ;;  %v2340_v13 = vmul.f32 %v4129_v28, %v4129_v28 }
 0x1b9   : > { %2289 = vst [vmem:[%s3613_s11 + $0x8] sm:$0xff] %v3263_v37  ;;  %v2305_v40 = vadd.f32 %v3263_v37, %v3261_v26  ;;  %v2330_v43 = vmul.f32 %v3263_v37, %v3263_v37 }
 0x1ba   : > { %v3242_v44 = vpop.f32.mrb[20].mxu1 }
 0x1bb   : > { %v2306_v32 = vadd.f32 %v3260_v21, %v2305_v40  ;;  %v2345_v36 = vadd.f32 %v2330_v43, %v2329_v39  ;;  %v3234_v41 = vpop.f32.mrb[4].mxu0  ;;  %v3277_v46 = vadd.f32 %v3276_v2, %v3242_v44  ;;  %v2257_v20 = vpop.f32.mrb[21].mxu1 }
 0x1bc   : > { %v3264_v51 = vadd.f32 %v3234_v41, %v3074_v50  ;;  %v2225_v30 = vpop.f32.mrb[5].mxu0  ;;  %v3279_v56 = vadd.f32 %v3278_v9, %v2257_v20  ;;  %v3243_v0 = vpop.f32.mrb[22].mxu1  ;;  %v2304_v41 = vld [vmem:[%s3618_s14] sm:$0x1] }
 0x1bd   : > { %v2346_v45 = vadd.f32 %v2345_v36, %v2331_v14  ;;  %2302 = vst [vmem:[%s3613_s11 + $0x70] sm:$0xff] %v3277_v46  ;;  %v3265_v47 = vadd.f32 %v2225_v30, %v4117_v52  ;;  %v2307_v16 = vadd.f32 %v3262_v31, %v2306_v32  ;;  %v3235_v48 = vpop.f32.mrb[6].mxu0  ;;  %v2260_v49 = vpop.f32.mrb[23].mxu1  ;;  %v3281_v54 = vadd.f32 %v3280_v12, %v3243_v0 }
 0x1be   : > { %2294 = vst [vmem:[%s3613_s11 + $0x30] sm:$0xff] %v3264_v51  ;;  %2300 = vst [vmem:[%s3613_s11 + $0x60] sm:$0xff] %v3279_v56  ;;  %v3266_v50 = vadd.f32 %v3235_v48, %v4119_v53  ;;  %v2228_v55 = vpop.f32.mrb[7].mxu0  ;;  %v3283_v52 = vadd.f32 %v3282_v15, %v2260_v49  ;;  %v2335_v62 = vmul.f32 %v3264_v51, %v3264_v51 }
 0x1bf   : > { %2292 = vst [vmem:[%s3613_s11 + $0x20] sm:$0xff] %v3265_v47  ;;  %v2308_v57 = vadd.f32 %v3265_v47, %v2307_v16  ;;  %v2333_v58 = vmul.f32 %v3265_v47, %v3265_v47  ;;  %v2347_v34 = vadd.f32 %v2346_v45, %v2332_v38  ;;  %v3267_v59 = vadd.f32 %v2228_v55, %v4121_v23 }
 0x1c0   : > { %2295 = vst [vmem:[%s3613_s11 + $0x38] sm:$0xff] %v3266_v50  ;;  %2303 = vst [vmem:[%s3613_s11 + $0x78] sm:$0xff] %v3281_v54  ;;  %v2336_v53 = vmul.f32 %v3266_v50, %v3266_v50  ;;  %v2341_v18 = vmul.f32 %v3279_v56, %v3279_v56  ;;  %v2343_v26 = vmul.f32 %v3277_v46, %v3277_v46 }
 0x1c1   : > { %v2348_v60 = vadd.f32 %v2347_v34, %v2333_v58  ;;  %2293 = vst [vmem:[%s3613_s11 + $0x28] sm:$0xff] %v3267_v59  ;;  %v2309_v61 = vadd.f32 %v3267_v59, %v2308_v57  ;;  %v2334_v42 = vmul.f32 %v3267_v59, %v3267_v59  ;;  %2301 = vst [vmem:[%s3613_s11 + $0x68] sm:$0xff] %v3283_v52 }
 0x1c2   : > { %v2344_v31 = vmul.f32 %v3281_v54, %v3281_v54 }
 0x1c3   : > { %v2310_v63 = vadd.f32 %v3264_v51, %v2309_v61  ;;  %v2349_v3 = vadd.f32 %v2348_v60, %v2334_v42  ;;  %v2328_v51 = vld [vmem:[%s3618_s14 + $0x1] sm:$0x1] }
 0x1c5   : > { %v2311_v4 = vadd.f32 %v3266_v50, %v2310_v63  ;;  %v2350_v5 = vadd.f32 %v2349_v3, %v2335_v62 }
 0x1c7   : > { %v2312_v2 = vadd.f32 %v4125_v24, %v2311_v4  ;;  %v2351_v23 = vadd.f32 %v2350_v5, %v2336_v53  ;;  %v2342_v24 = vmul.f32 %v3283_v52, %v3283_v52 }
 0x1c9   : > { %v2352_v8 = vadd.f32 %v2351_v23, %v2337_v1  ;;  %v2313_v9 = vadd.f32 %v3275_v35, %v2312_v2 }
 0x1cb   : > { %v2314_v11 = vadd.f32 %v4123_v6, %v2313_v9  ;;  %v2353_v12 = vadd.f32 %v2352_v8, %v2338_v7 }
 0x1cd   : > { %v2315_v15 = vadd.f32 %v4129_v28, %v2314_v11  ;;  %v2354_v17 = vadd.f32 %v2353_v12, %v2339_v10 }
 0x1cf   : > { %v2316_v19 = vadd.f32 %v3279_v56, %v2315_v15  ;;  %v2355_v21 = vadd.f32 %v2354_v17, %v2340_v13 }
 0x1d1   : > { %v2317_v22 = vadd.f32 %v3283_v52, %v2316_v19  ;;  %v2356_v25 = vadd.f32 %v2355_v21, %v2341_v18 }
 0x1d3   : > { %v2318_v27 = vadd.f32 %v3277_v46, %v2317_v22  ;;  %v2357_v29 = vadd.f32 %v2356_v25, %v2342_v24 }
 0x1d5   : > { %v2319_v6 = vadd.f32 %v3281_v54, %v2318_v27  ;;  %v2358_v33 = vadd.f32 %v2357_v29, %v2343_v26 }
 0x1d7   : > { %v2320_v35 = vrot.slane %v2319_v6, 4  ;;  %v2359_v37 = vadd.f32 %v2358_v33, %v2344_v31 }
 0x1d9   : > { %v2321_v39 = vadd.f32 %v2320_v35, %v2319_v6  ;;  %v2360_v28 = vrot.slane %v2359_v37, 4 }
 0x1db   : > { %v2322_v40 = vrot.slane %v2321_v39, 2  ;;  %v2361_v43 = vadd.f32 %v2360_v28, %v2359_v37 }
 0x1dd   : > { %v2323_v44 = vadd.f32 %v2322_v40, %v2321_v39  ;;  %v2362_v14 = vrot.slane %v2361_v43, 2 }
 0x1df   : > { %v2324_v32 = vrot.slane %v2323_v44, 1  ;;  %v2363_v36 = vadd.f32 %v2362_v14, %v2361_v43 }
 0x1e1   : > { %v2325_v20 = vadd.f32 %v2324_v32, %v2323_v44  ;;  %v2364_v46 = vrot.slane %v2363_v36, 1 }
 0x1e3   : > { %v2326_v30 = vadd.f32 %v2325_v20, %v2304_v41  ;;  %v2365_v56 = vadd.f32 %v2364_v46, %v2363_v36 }
 0x1e5   : > { %2327 = vst [vmem:[%s3618_s14] sm:$0x1] %v2326_v30  ;;  %v2366_v0 = vadd.f32 %v2365_v56, %v2328_v51 }
 0x1e7   : > { %2367 = vst [vmem:[%s3618_s14 + $0x1] sm:$0x1] %v2366_v0 }
 0x1e8 PF: > { %s16_s22 = sadd.s32 1, %s3539_s22   ;;  %s4185_s18 = smov %s3531_s20 }
 0x1e9   : > { %p13_p8 = scmp.ge.s32.totalorder %s16_s22, 6   ;;  %s4186_s19 = smov %s3535_s21 }
 0x1ea   : > { %s4187_s20 = smov %s4190_s23  ;;  %s4188_s21 = smov %s4194_s24 }
 0x1eb   :  { %15 = sbr.rel (!%p13_p8) target bundleno = 3 (0x3), region = 94 }

</bundles_post_ra>
